<compile_context>
chip_gen: v5e
topology: v5e:2x2
jax: 0.10.0
libtpu: 0.0.40
codegen_flags: <defaults>
</compile_context>

<pallas_src>
import functools

import jax
import jax.numpy as jnp
import numpy as np
from jax.experimental import pallas as pl
from jax.experimental.pallas import tpu as pltpu


# ---------------------------------------------------------------------------
# Kernel
# ---------------------------------------------------------------------------
def _convlstm_kernel(x_ref, w_ref, b_ref, c_ref, out_ref, *, hid):
    # x_ref   : (tile, K_pad)    bf16  im2col patches (row tile of B*H*W)
    # w_ref   : (K_pad, 4*hid)   bf16  im2col-reshaped conv weight
    # b_ref   : (1, 4*hid)       f32   conv bias
    # c_ref   : (tile, hid)      f32   current cell state rows
    # out_ref : (tile, 2*hid)    f32   [h_next | c_next]
    acc = jnp.dot(x_ref[...], w_ref[...],
                  preferred_element_type=jnp.float32)          # (tile, 4*hid) f32
    acc = acc + b_ref[...]                                     # broadcast bias

    # Slice BEFORE the nonlinearities: sigmoid only on the i/f/o lanes, tanh
    # only on the g lanes (no discarded full-tile transcendental results).
    sig = jax.nn.sigmoid(acc[:, :3 * hid])                     # (tile, 3*hid)
    g = jnp.tanh(acc[:, 3 * hid:])                             # (tile, hid)

    i = sig[:, 0 * hid:1 * hid]
    f = sig[:, 1 * hid:2 * hid]
    o = sig[:, 2 * hid:3 * hid]

    c_next = f * c_ref[...] + i * g                            # f32 state math
    h_next = o * jnp.tanh(c_next)

    # Direct slice stores (no lane-concat relayout).
    out_ref[:, :hid] = h_next
    out_ref[:, hid:] = c_next


# ---------------------------------------------------------------------------
# Loop-invariant weight preparation (call ONCE outside any time loop)
# ---------------------------------------------------------------------------
def prepare_conv_lstm_weights(weight_oikk, bias_o, kernel_size, input_dim,
                              hidden_dim):
    """(O,I,kh,kw) PyTorch conv weight -> bf16 (K_pad, 4*hid) + f32 (1,4*hid) bias."""
    kh, kw = kernel_size
    C = input_dim + hidden_dim
    K = kh * kw * C
    K_pad = ((K + 127) // 128) * 128
    # (O, I, kh, kw) -> (kh, kw, I, O) -> (kh*kw*I, O); row order matches the
    # im2col column order (ki-major, then kj, then channel).
    w = jnp.transpose(weight_oikk, (2, 3, 1, 0)).reshape(K, 4 * hidden_dim)
    w = jnp.pad(w, ((0, K_pad - K), (0, 0))).astype(jnp.bfloat16)
    b = bias_o.reshape(1, 4 * hidden_dim).astype(jnp.float32)
    return w, b, K_pad


def _default_row_tiles():
    """2 row tiles (one per TensorCore) on v7x-class chips, 1 otherwise."""
    try:
        kind = jax.devices()[0].device_kind.lower()
        return 2 if "v7" in kind else 1
    except Exception:  # pragma: no cover - conservative fallback
        return 1


def _im2col_nhwc(comb_nhwc, kh, kw):
    """(B,H,W,C) -> (B*H*W, kh*kw*C) same-padded im2col patches."""
    B, H, W, C = comb_nhwc.shape
    ph, pw = kh // 2, kw // 2
    comb_p = jnp.pad(comb_nhwc, ((0, 0), (ph, ph), (pw, pw), (0, 0)))
    cols = [comb_p[:, ki:ki + H, kj:kj + W, :]
            for ki in range(kh) for kj in range(kw)]
    return jnp.concatenate(cols, axis=-1).reshape(B * H * W, kh * kw * C)


# ---------------------------------------------------------------------------
# Loop-friendly forward: NHWC states, pre-prepped weights
# ---------------------------------------------------------------------------
def conv_lstm_cell_forward_nhwc(x_nhwc, h_nhwc, c_nhwc, w_bf16, b_f32, *,
                                K_pad, kernel_size, hidden_dim,
                                num_row_tiles=None):
    """One ConvLSTM step on NHWC tensors with pre-prepared weights.

    x_nhwc : (B, H, W, Cin)   h_nhwc / c_nhwc : (B, H, W, hid)
    Returns (h_next, c_next), both (B, H, W, hid) float32.
    """
    kh, kw = kernel_size
    B, H, W, Cin = x_nhwc.shape
    hid = hidden_dim
    R = B * H * W
    K = kh * kw * (Cin + hid)

    if num_row_tiles is None:
        num_row_tiles = _default_row_tiles()
    if R % (num_row_tiles * 8) != 0:
        num_row_tiles = 1
    tile_rows = R // num_row_tiles

    # im2col patches; the pad/concat/cast producer is allowed to fuse into the
    # pallas_call input load (allow_input_fusion) so it need not hit HBM.
    comb = jnp.concatenate([x_nhwc, h_nhwc], axis=-1)            # (B,H,W,C)
    patches = _im2col_nhwc(comb, kh, kw)                         # (R, K)
    patches = jnp.pad(patches, ((0, 0), (0, K_pad - K))).astype(jnp.bfloat16)

    c_flat = c_nhwc.reshape(R, hid).astype(jnp.float32)          # contiguous

    kernel = functools.partial(_convlstm_kernel, hid=hid)
    hc = pl.pallas_call(
        kernel,
        out_shape=jax.ShapeDtypeStruct((R, 2 * hid), jnp.float32),
        grid_spec=pltpu.PrefetchScalarGridSpec(
            num_scalar_prefetch=0,
            grid=(num_row_tiles,),
            in_specs=[
                pl.BlockSpec((tile_rows, K_pad), lambda r: (r, 0)),
                pl.BlockSpec((K_pad, 4 * hid), lambda r: (0, 0)),
                pl.BlockSpec((1, 4 * hid), lambda r: (0, 0)),
                pl.BlockSpec((tile_rows, hid), lambda r: (r, 0)),
            ],
            out_specs=pl.BlockSpec((tile_rows, 2 * hid), lambda r: (r, 0)),
        ),
        compiler_params=pltpu.CompilerParams(
            dimension_semantics=("parallel",),
            allow_input_fusion=[True, False, False, False],
        ),
    )(patches, w_bf16, b_f32, c_flat)

    h_next = hc[:, :hid].reshape(B, H, W, hid)
    c_next = hc[:, hid:].reshape(B, H, W, hid)
    return h_next, c_next


# ---------------------------------------------------------------------------
# PyTorch-compatible convenience wrapper (NCHW in / NCHW out, single step)
# ---------------------------------------------------------------------------
def conv_lstm_cell_forward(x_nchw, h_nchw, c_nchw, weight_oikk, bias_o,
                           kernel_size):
    """ConvLSTMCell.forward. Use the NHWC API + prepare_conv_lstm_weights for loops."""
    B, Cin, H, W = x_nchw.shape
    hid = h_nchw.shape[1]
    w_bf16, b_f32, K_pad = prepare_conv_lstm_weights(
        weight_oikk, bias_o, kernel_size, Cin, hid)

    x_nhwc = jnp.transpose(x_nchw, (0, 2, 3, 1))
    h_nhwc = jnp.transpose(h_nchw, (0, 2, 3, 1))
    c_nhwc = jnp.transpose(c_nchw, (0, 2, 3, 1))

    h_next, c_next = conv_lstm_cell_forward_nhwc(
        x_nhwc, h_nhwc, c_nhwc, w_bf16, b_f32,
        K_pad=K_pad, kernel_size=kernel_size, hidden_dim=hid,
        num_row_tiles=_default_row_tiles())

    h_next = jnp.transpose(h_next, (0, 3, 1, 2))
    c_next = jnp.transpose(c_next, (0, 3, 1, 2))
    return h_next, c_next


# ---------------------------------------------------------------------------
# Pure-JAX reference (f32 lax conv) for correctness checking
# ---------------------------------------------------------------------------
def _reference(x, h, c, w, b, kernel_size):
    kh, kw = kernel_size
    comb = jnp.concatenate([x, h], axis=1)                       # NCHW
    cc = jax.lax.conv_general_dilated(
        comb, w, window_strides=(1, 1),
        padding=((kh // 2, kh // 2), (kw // 2, kw // 2)),
        dimension_numbers=("NCHW", "OIHW", "NCHW"))
    cc = cc + b[None, :, None, None]
    cc_i, cc_f, cc_o, cc_g = jnp.split(cc, 4, axis=1)
    i = jax.nn.sigmoid(cc_i)
    f = jax.nn.sigmoid(cc_f)
    o = jax.nn.sigmoid(cc_o)
    g = jnp.tanh(cc_g)
    c_next = f * c + i * g
    h_next = o * jnp.tanh(c_next)
    return h_next, c_next


if __name__ == "__main__":
    # Module config: input_size=(16,16), input_dim=4, hidden_dim=32,
    # kernel_size=(3,3), bias=True.
    B, Cin, H, W = 2, 4, 16, 16
    hid = 32
    ksz = (3, 3)
    T = 4

    key = jax.random.PRNGKey(0)
    kx, kh_, kc, kw_, kb, kseq = jax.random.split(key, 6)
    x = jax.random.normal(kx, (B, Cin, H, W), dtype=jnp.float32)
    h_cur = jax.random.normal(kh_, (B, hid, H, W), dtype=jnp.float32)
    c_cur = jax.random.normal(kc, (B, hid, H, W), dtype=jnp.float32)

    # Deterministic synthetic conv weights (PyTorch layout: O, I, kh, kw).
    weight = 0.05 * jax.random.normal(
        kw_, (4 * hid, Cin + hid, ksz[0], ksz[1]), dtype=jnp.float32)
    bias = 0.05 * jax.random.normal(kb, (4 * hid,), dtype=jnp.float32)

    # --- Single step via the PyTorch-compatible API, checked vs f32 reference.
    h_next, c_next = conv_lstm_cell_forward(x, h_cur, c_cur, weight, bias, ksz)
    jax.block_until_ready((h_next, c_next))

    h_ref, c_ref = _reference(x, h_cur, c_cur, weight, bias, ksz)
    # bf16 matmul operands -> looser tolerance vs the f32 reference
    # (accumulation, bias add and all gate/state math stay f32).
    np.testing.assert_allclose(np.asarray(h_next), np.asarray(h_ref),
                               rtol=2e-2, atol=2e-2)
    np.testing.assert_allclose(np.asarray(c_next), np.asarray(c_ref),
                               rtol=2e-2, atol=2e-2)

    # --- Sequence usage: weights prepped ONCE, states kept in NHWC across
    #     steps, jitted loop-friendly forward.
    w_bf16, b_f32, K_pad = prepare_conv_lstm_weights(weight, bias, ksz, Cin, hid)
    step_fn = jax.jit(functools.partial(
        conv_lstm_cell_forward_nhwc,
        K_pad=K_pad, kernel_size=ksz, hidden_dim=hid,
        num_row_tiles=_default_row_tiles()))

    xs = jax.random.normal(kseq, (T, B, H, W, Cin), dtype=jnp.float32)  # NHWC
    h_t = jnp.zeros((B, H, W, hid), jnp.float32)
    c_t = jnp.zeros((B, H, W, hid), jnp.float32)
    for t in range(T):
        h_t, c_t = step_fn(xs[t], h_t, c_t, w_bf16, b_f32)
    jax.block_until_ready((h_t, c_t))
    assert bool(jnp.all(jnp.isfinite(h_t))) and bool(jnp.all(jnp.isfinite(c_t)))

    print("KERNEL_OK")
</pallas_src>

<mosaic_0001>
module attributes {stable_mosaic.version = 11 : i64} {
  func.func @_convlstm_kernel(%arg0: i32, %arg1: memref<512x384xbf16, #tpu.memory_space<vmem>>, %arg2: memref<384x128xbf16, #tpu.memory_space<vmem>>, %arg3: memref<1x128xf32, #tpu.memory_space<vmem>>, %arg4: memref<512x32xf32, #tpu.memory_space<vmem>>, %arg5: memref<512x64xf32, #tpu.memory_space<vmem>>) attributes {dimension_semantics = [#tpu.dimension_semantics<parallel>], iteration_bounds = array<i64: 1>, scalar_prefetch = 0 : i64, scratch_operands = 0 : i64, tpu.core_type = #tpu.core_type<tc>, window_params = [{transform_indices = @transform_0, window_bounds = array<i64: 512, 384>}, {pipeline_mode = #tpu.pipeline_mode<synchronous>, transform_indices = @transform_1, window_bounds = array<i64: 384, 128>}, {pipeline_mode = #tpu.pipeline_mode<synchronous>, transform_indices = @transform_2, window_bounds = array<i64: 1, 128>}, {transform_indices = @transform_3, window_bounds = array<i64: 512, 32>}, {transform_indices = @transform_4, window_bounds = array<i64: 512, 64>}]} {
    %c0 = arith.constant 0 : index
    %c0_0 = arith.constant 0 : index
    %0 = vector.load %arg1[%c0, %c0_0] : memref<512x384xbf16, #tpu.memory_space<vmem>>, vector<512x384xbf16>
    %c0_1 = arith.constant 0 : index
    %c0_2 = arith.constant 0 : index
    %1 = vector.load %arg2[%c0_1, %c0_2] : memref<384x128xbf16, #tpu.memory_space<vmem>>, vector<384x128xbf16>
    %cst = arith.constant dense<0.000000e+00> : vector<512x128xf32>
    %2 = tpu.matmul %0, %1, %cst {dimension_numbers = #tpu.dot_dimension_numbers<[1], [0], [0], [1], [0, 0, 1, 1], [], []>} : vector<512x384xbf16>, vector<384x128xbf16>, vector<512x128xf32> -> vector<512x128xf32>
    %c0_3 = arith.constant 0 : index
    %c0_4 = arith.constant 0 : index
    %3 = vector.load %arg3[%c0_3, %c0_4] : memref<1x128xf32, #tpu.memory_space<vmem>>, vector<1x128xf32>
    %4 = vector.broadcast %3 : vector<1x128xf32> to vector<512x128xf32>
    %5 = arith.addf %2, %4 : vector<512x128xf32>
    %6 = vector.extract_strided_slice %5 {offsets = [0, 0], sizes = [512, 96], strides = [1, 1]} : vector<512x128xf32> to vector<512x96xf32>
    %7 = arith.negf %6 : vector<512x96xf32>
    %8 = math.exp %7 : vector<512x96xf32>
    %cst_5 = arith.constant 1.000000e+00 : f32
    %9 = vector.broadcast %cst_5 : f32 to vector<512x96xf32>
    %10 = arith.addf %9, %8 : vector<512x96xf32>
    %11 = arith.divf %9, %10 : vector<512x96xf32>
    %12 = vector.extract_strided_slice %5 {offsets = [0, 96], sizes = [512, 32], strides = [1, 1]} : vector<512x128xf32> to vector<512x32xf32>
    %13 = math.tanh %12 : vector<512x32xf32>
    %14 = vector.extract_strided_slice %11 {offsets = [0, 0], sizes = [512, 32], strides = [1, 1]} : vector<512x96xf32> to vector<512x32xf32>
    %15 = vector.extract_strided_slice %11 {offsets = [0, 32], sizes = [512, 32], strides = [1, 1]} : vector<512x96xf32> to vector<512x32xf32>
    %16 = vector.extract_strided_slice %11 {offsets = [0, 64], sizes = [512, 32], strides = [1, 1]} : vector<512x96xf32> to vector<512x32xf32>
    %c0_6 = arith.constant 0 : index
    %c0_7 = arith.constant 0 : index
    %17 = vector.load %arg4[%c0_6, %c0_7] : memref<512x32xf32, #tpu.memory_space<vmem>>, vector<512x32xf32>
    %18 = arith.mulf %15, %17 : vector<512x32xf32>
    %19 = arith.mulf %14, %13 : vector<512x32xf32>
    %20 = arith.addf %18, %19 : vector<512x32xf32>
    %21 = math.tanh %20 : vector<512x32xf32>
    %22 = arith.mulf %16, %21 : vector<512x32xf32>
    %c0_8 = arith.constant 0 : index
    %c0_9 = arith.constant 0 : index
    %23 = vector.load %arg5[%c0_8, %c0_9] : memref<512x64xf32, #tpu.memory_space<vmem>>, vector<512x32xf32>
    tpu.vector_store %arg5[%c0_8, %c0_9], %22 {strides = array<i32>} : memref<512x64xf32, #tpu.memory_space<vmem>>, vector<512x32xf32>,
    %c0_10 = arith.constant 0 : index
    %c32 = arith.constant 32 : index
    %24 = vector.load %arg5[%c0_10, %c32] : memref<512x64xf32, #tpu.memory_space<vmem>>, vector<512x32xf32>
    tpu.vector_store %arg5[%c0_10, %c32], %20 {strides = array<i32>} : memref<512x64xf32, #tpu.memory_space<vmem>>, vector<512x32xf32>,
    return
  }
  func.func @transform_0(%arg0: i32) -> (i32, i32) {
    %c0_i32 = arith.constant 0 : i32
    %c0_i32_0 = arith.constant 0 : i32
    return %arg0, %c0_i32 : i32, i32
  }
  func.func @transform_1(%arg0: i32) -> (i32, i32) {
    %c0_i32 = arith.constant 0 : i32
    %c0_i32_0 = arith.constant 0 : i32
    %c0_i32_1 = arith.constant 0 : i32
    return %c0_i32, %c0_i32_0 : i32, i32
  }
  func.func @transform_2(%arg0: i32) -> (i32, i32) {
    %c0_i32 = arith.constant 0 : i32
    %c0_i32_0 = arith.constant 0 : i32
    %c0_i32_1 = arith.constant 0 : i32
    return %c0_i32, %c0_i32_0 : i32, i32
  }
  func.func @transform_3(%arg0: i32) -> (i32, i32) {
    %c0_i32 = arith.constant 0 : i32
    %c0_i32_0 = arith.constant 0 : i32
    return %arg0, %c0_i32 : i32, i32
  }
  func.func @transform_4(%arg0: i32) -> (i32, i32) {
    %c0_i32 = arith.constant 0 : i32
    %c0_i32_0 = arith.constant 0 : i32
    return %arg0, %c0_i32 : i32, i32
  }
}

</mosaic_0001>

<bundles_post_ra>
// kernel: tpu_custom_call.1
= control target key start
LH: loop header
LB: loop body
LE: loop exit
PB: predicated region body
PF: predicated region fallthrough
CT: control target
= control target key end

     0   :  { %9 = vsyncpa [#allocation3], 0  ;;  %s5690_s18 = smov [#allocation2]   ;;  %s5691_s20 = smov 192   ;;  %s9823_s0 = inlined_call_operand.hbm [shape: bf16[512,384], index: 0, kind: input, shape index: {}]   ;;  %s9824_s1 = inlined_call_operand.vmem [shape: bf16[384,128], index: 1, kind: input, shape index: {}]   ;;  %s9825_s2 = inlined_call_operand.vmem [shape: f32[1,128], index: 2, kind: input, shape index: {}]   ;;  %s9826_s3 = inlined_call_operand.vmem [shape: f32[512,32], index: 3, kind: input, shape index: {}]   ;;  %s9827_s4 = inlined_call_operand.vmem [shape: f32[512,64], index: 4, kind: output, shape index: {}]  }
   0x1   :  { %s14_s17 = sshll.u32 %s9823_s0, 4  ;;  %s16_s19 = sshll.u32 %s5690_s18, 4  ;;  %s15_s17 = int_to_ptr.hbm [resolvable:$true] %s14_s17  ;;  %s17_s19 = int_to_ptr.vmem [resolvable:$true] %s16_s19 }
   0x2   :  { %s5692_s21 = smov 12  }
   0x3   :  { %22 = dma.hbm_to_vmem [thread:$0]  %s15_s17, 12288, %s17_s19, [#allocation3], %s5691_s20, %s5691_s20, %s5692_s21  }
   0x4   :  { %5688 = dma.done.wait [#allocation3], 12288  }
   0x5   :  { %5689 = vsyncadd [#allocation3], 4294955008  ;;  %v5102_v0 = vld [vmem:[%s9824_s1 + $0x38] sm:$0xff]  ;;  %v2658_v3 = vld [vmem:[%s9826_s3 + $0x10] sm:$0xff]  ;;  %s5693_s11 = smov 32  }
   0x6   :  { %v5729_v1 = vld [vmem:[%s9824_s1 + $0x78] sm:$0xff]  ;;  %869 = vmatpush.bf16.msra.mxu0 %v5102_v0  ;;  %5119 = vmatpush.bf16.msra.mxu3 %v5102_v0  ;;  %v5101_v4 = vld [vmem:[%s9824_s1 + $0x30] sm:$0xff]  ;;  %v2660_v7 = vld [vmem:[%s9826_s3 + $0x20] sm:$0xff] }
   0x7   :  { %v5734_v2 = vld [vmem:[%s9824_s1 + $0xb8] sm:$0xff]  ;;  %1038 = vmatpush.bf16.msra.mxu1 %v5729_v1  ;;  %v5747_v5 = vld [vmem:[%s9824_s1 + $0x70] sm:$0xff]  ;;  %2788 = vrot.lane.b32.xlu1 %v2658_v3, %s5693_s11  ;;  %v2656_v8 = vld [vmem:[%s9826_s3] sm:$0xff] }
   0x8   :  { %1207 = vmatpush.bf16.msra.mxu2 %v5734_v2  ;;  %v5752_v6 = vld [vmem:[%s9824_s1 + $0xb0] sm:$0xff]  ;;  %2792 = vrot.lane.b32.xlu2 %v2660_v7, %s5693_s11  ;;  %v5100_v9 = vld [vmem:[%s9824_s1 + $0x28] sm:$0xff]  ;;  %v2659_v12 = vld [vmem:[%s9826_s3 + $0x18] sm:$0xff] }
   0x9   :  { %2784 = vrot.lane.b32.xlu0 %v2656_v8, %s5693_s11  ;;  %v5771_v10 = vld [vmem:[%s9824_s1 + $0x68] sm:$0xff]  ;;  %v5099_v14 = vld [vmem:[%s9824_s1 + $0x20] sm:$0xff]  ;;  %v5098_v18 = vld [vmem:[%s9824_s1 + $0x18] sm:$0xff] }
   0xa   :  { %870 = vmatpush.bf16.msra.mxu0 %v5101_v4  ;;  %5120 = vmatpush.bf16.msra.mxu3 %v5101_v4  ;;  %v5776_v11 = vld [vmem:[%s9824_s1 + $0xa8] sm:$0xff]  ;;  %v5795_v16 = vld [vmem:[%s9824_s1 + $0x60] sm:$0xff]  ;;  %v5813_v19 = vld [vmem:[%s9824_s1 + $0x58] sm:$0xff] }
   0xb   :  { %1039 = vmatpush.bf16.msra.mxu1 %v5747_v5  ;;  %v2661_v13 = vld [vmem:[%s9826_s3 + $0x28] sm:$0xff]  ;;  %v5800_v17 = vld [vmem:[%s9824_s1 + $0xa0] sm:$0xff]  ;;  %v5818_v20 = vld [vmem:[%s9824_s1 + $0x98] sm:$0xff] }
   0xc   :  { %1208 = vmatpush.bf16.msra.mxu2 %v5752_v6  ;;  %v2657_v15 = vld [vmem:[%s9826_s3 + $0x8] sm:$0xff]  ;;  %v2663_v21 = vld [vmem:[%s9826_s3 + $0x38] sm:$0xff]  ;;  %v2664_v22 = vld [vmem:[%s9826_s3 + $0x40] sm:$0xff] }
   0xd   :  { %v5097_v23 = vld [vmem:[%s9824_s1 + $0x10] sm:$0xff]  ;;  %v5096_v27 = vld [vmem:[%s9824_s1 + $0x8] sm:$0xff]  ;;  %v5095_v31 = vld [vmem:[%s9824_s1] sm:$0xff] }
   0xe   :  { %871 = vmatpush.bf16.msra.mxu0 %v5100_v9  ;;  %5121 = vmatpush.bf16.msra.mxu3 %v5100_v9  ;;  %v2662_v24 = vld [vmem:[%s9826_s3 + $0x30] sm:$0xff]  ;;  %v5855_v28 = vld [vmem:[%s9824_s1 + $0x48] sm:$0xff]  ;;  %v4457_v32 = vld [vmem:[#allocation2] sm:$0xf] }
   0xf   :  { %1040 = vmatpush.bf16.msra.mxu1 %v5771_v10  ;;  %2790 = vrot.lane.b32.xlu1 %v2659_v12, %s5693_s11  ;;  %v5837_v25 = vld [vmem:[%s9824_s1 + $0x50] sm:$0xff]  ;;  %v5860_v29 = vld [vmem:[%s9824_s1 + $0x88] sm:$0xff]  ;;  %v5871_v33 = vld [vmem:[%s9824_s1 + $0x40] sm:$0xff] }
  0x10   :  { %1209 = vmatpush.bf16.msra.mxu2 %v5776_v11  ;;  %2794 = vrot.lane.b32.xlu2 %v2661_v13, %s5693_s11  ;;  %v5842_v26 = vld [vmem:[%s9824_s1 + $0x90] sm:$0xff]  ;;  %v5876_v34 = vld [vmem:[%s9824_s1 + $0x80] sm:$0xff]  ;;  %v5000_v35 = vld [vmem:[#allocation2 + $0x8] sm:$0xf0] }
  0x11   :  { %2786 = vrot.lane.b32.xlu0 %v2657_v15, %s5693_s11  ;;  %v2666_v30 = vld [vmem:[%s9826_s3 + $0x50] sm:$0xff]  ;;  %v4745_v36 = vld [vmem:[#allocation2 + $0x240] sm:$0xf]  ;;  %v2667_v37 = vld [vmem:[%s9826_s3 + $0x58] sm:$0xff]  ;;  %v4458_v44 = vor.u32 %v5000_v35, %v4457_v32 }
  0x12   :  { %872 = vmatpush.bf16.msra.mxu0 %v5099_v14  ;;  %5122 = vmatpush.bf16.msra.mxu3 %v5099_v14  ;;  %v5072_v38 = vld [vmem:[#allocation2 + $0x248] sm:$0xf0]  ;;  %v4999_v39 = vld [vmem:[#allocation2 + $0x4] sm:$0xf]  ;;  %v4459_v41 = vld [vmem:[#allocation2 + $0xc] sm:$0xf0] }
  0x13   :  { %1041 = vmatpush.bf16.msra.mxu1 %v5795_v16  ;;  %v2665_v40 = vld [vmem:[%s9826_s3 + $0x48] sm:$0xff]  ;;  %v5001_v43 = vld [vmem:[#allocation2 + $0x10] sm:$0xf0]  ;;  %v4746_v45 = vor.u32 %v5072_v38, %v4745_v36  ;;  %v4462_v46 = vor.u32 %v4999_v39, %v4459_v41  ;;  %v2668_v50 = vld [vmem:[%s9826_s3 + $0x60] sm:$0xff] }
  0x14   :  { %1210 = vmatpush.bf16.msra.mxu2 %v5800_v17  ;;  %v4465_v42 = vld [vmem:[#allocation2 + $0x8] sm:$0xf]  ;;  %v2670_v49 = vld [vmem:[%s9826_s3 + $0x70] sm:$0xff]  ;;  %v2672_v51 = vld [vmem:[%s9826_s3 + $0x80] sm:$0xff] }
  0x15   :  { %v4466_v47 = vor.u32 %v5001_v43, %v4465_v42  ;;  %v2669_v48 = vld [vmem:[%s9826_s3 + $0x68] sm:$0xff]  ;;  %v4469_v52 = vld [vmem:[#allocation2 + $0x18] sm:$0xf]  ;;  %v5003_v53 = vld [vmem:[#allocation2 + $0x20] sm:$0xf0] }
  0x16   :  { %873 = vmatpush.bf16.msra.mxu0 %v5098_v18  ;;  %5123 = vmatpush.bf16.msra.mxu3 %v5098_v18  ;;  %v4757_v54 = vld [vmem:[#allocation2 + $0x258] sm:$0xf]  ;;  %v2673_v55 = vld [vmem:[%s9826_s3 + $0x88] sm:$0xff]  ;;  %v5075_v56 = vld [vmem:[#allocation2 + $0x260] sm:$0xf0]  ;;  %v4470_v62 = vor.u32 %v5003_v53, %v4469_v52 }
  0x17   :  { %1042 = vmatpush.bf16.msra.mxu1 %v5813_v19  ;;  %2798 = vrot.lane.b32.xlu1 %v2663_v21, %s5693_s11  ;;  %v5002_v57 = vld [vmem:[#allocation2 + $0x1c] sm:$0xf]  ;;  %v4471_v59 = vld [vmem:[#allocation2 + $0x24] sm:$0xf0]  ;;  %v4477_v60 = vld [vmem:[#allocation2 + $0x20] sm:$0xf]  ;;  %v4758_v63 = vor.u32 %v5075_v56, %v4757_v54 }
  0x18   :  { %1211 = vmatpush.bf16.msra.mxu2 %v5818_v20  ;;  %2800 = vrot.lane.b32.xlu2 %v2664_v22, %s5693_s11  ;;  %v2671_v58 = vld [vmem:[%s9826_s3 + $0x78] sm:$0xff]  ;;  %v5004_v61 = vld [vmem:[#allocation2 + $0x28] sm:$0xf0]  ;;  %v4474_v0 = vor.u32 %v5002_v57, %v4471_v59  ;;  %v2676_v4 = vld [vmem:[%s9826_s3 + $0xa0] sm:$0xff] }
  0x19   :  { %2796 = vrot.lane.b32.xlu0 %v2662_v24, %s5693_s11  ;;  %v2675_v3 = vld [vmem:[%s9826_s3 + $0x98] sm:$0xff]  ;;  %v2678_v7 = vld [vmem:[%s9826_s3 + $0xb0] sm:$0xff]  ;;  %v2677_v15 = vld [vmem:[%s9826_s3 + $0xa8] sm:$0xff] }
  0x1a   :  { %874 = vmatpush.bf16.msra.mxu0 %v5097_v23  ;;  %5124 = vmatpush.bf16.msra.mxu3 %v5097_v23  ;;  %v4481_v8 = vld [vmem:[#allocation2 + $0x30] sm:$0xf]  ;;  %v5006_v9 = vld [vmem:[#allocation2 + $0x38] sm:$0xf0]  ;;  %v5005_v14 = vld [vmem:[#allocation2 + $0x34] sm:$0xf] }
  0x1b   :  { %1043 = vmatpush.bf16.msra.mxu1 %v5837_v25  ;;  %v2679_v12 = vld [vmem:[%s9826_s3 + $0xb8] sm:$0xff]  ;;  %v4482_v21 = vor.u32 %v5006_v9, %v4481_v8  ;;  %v4781_v32 = vld [vmem:[#allocation2 + $0x288] sm:$0xf]  ;;  %v5081_v35 = vld [vmem:[#allocation2 + $0x290] sm:$0xf0] }
  0x1c   :  { %1212 = vmatpush.bf16.msra.mxu2 %v5842_v26  ;;  %v5078_v13 = vld [vmem:[#allocation2 + $0x278] sm:$0xf0]  ;;  %v4489_v18 = vld [vmem:[#allocation2 + $0x38] sm:$0xf]  ;;  %v5008_v36 = vld [vmem:[#allocation2 + $0x4c] sm:$0xf]  ;;  %v4782_v41 = vor.u32 %v5081_v35, %v4781_v32 }
  0x1d   :  { %v4501_v38 = vld [vmem:[#allocation2 + $0x50] sm:$0xf]  ;;  %v5010_v39 = vld [vmem:[#allocation2 + $0x58] sm:$0xf0]  ;;  %v4513_v53 = vld [vmem:[#allocation2 + $0x68] sm:$0xf] }
  0x1e   :  { %875 = vmatpush.bf16.msra.mxu0 %v5096_v27  ;;  %5125 = vmatpush.bf16.msra.mxu3 %v5096_v27  ;;  %v2682_v27 = vld [vmem:[%s9826_s3 + $0xd0] sm:$0xff]  ;;  %v4502_v42 = vor.u32 %v5010_v39, %v4501_v38  ;;  %v2687_v43 = vld [vmem:[%s9826_s3 + $0xf8] sm:$0xff]  ;;  %v4525_v8 = vld [vmem:[#allocation2 + $0x80] sm:$0xf] }
  0x1f   :  { %1044 = vmatpush.bf16.msra.mxu1 %v5855_v28  ;;  %2804 = vrot.lane.b32.xlu1 %v2666_v30, %s5693_s11  ;;  %v4493_v30 = vld [vmem:[#allocation2 + $0x48] sm:$0xf]  ;;  %v4507_v52 = vld [vmem:[#allocation2 + $0x6c] sm:$0xf0]  ;;  %v5016_v9 = vld [vmem:[#allocation2 + $0x88] sm:$0xf0] }
  0x20   :  { %1213 = vmatpush.bf16.msra.mxu2 %v5860_v29  ;;  %2806 = vrot.lane.b32.xlu2 %v2667_v37, %s5693_s11  ;;  %v2683_v37 = vld [vmem:[%s9826_s3 + $0xd8] sm:$0xff]  ;;  %v2694_v59 = vld [vmem:[%s9826_s3 + $0x130] sm:$0xff]  ;;  %v2701_v32 = vld [vmem:[%s9826_s3 + $0x168] sm:$0xff] }
  0x21   :  { %2802 = vrot.lane.b32.xlu0 %v2665_v40, %s5693_s11  ;;  %v4537_v35 = vld [vmem:[#allocation2 + $0x98] sm:$0xf] }
  0x22   :  { %876 = vmatpush.bf16.msra.mxu0 %v5095_v31  ;;  %5126 = vmatpush.bf16.msra.mxu3 %v5095_v31  ;;  %v5009_v31 = vld [vmem:[#allocation2 + $0x50] sm:$0xf0] }
  0x23   :  { %1045 = vmatpush.bf16.msra.mxu1 %v5871_v33  ;;  %v4494_v40 = vor.u32 %v5009_v31, %v4493_v30  ;;  %v5090_v30 = vld [vmem:[#allocation2 + $0x2d8] sm:$0xf0]  ;;  %v5017_v31 = vld [vmem:[#allocation2 + $0x94] sm:$0xf] }
  0x24   :  { %1214 = vmatpush.bf16.msra.mxu2 %v5876_v34 }
  0x25   :  { %877 = vmatmul.bf16.vlgmr.msra.gmra.mxu0 %v4458_v44  ;;  %997 = vmatmul.bf16.vlgmr.msra.gmra.mxu3 %v4746_v45  ;;  %v2688_v44 = vld [vmem:[%s9826_s3 + $0x100] sm:$0xff]  ;;  %v2686_v45 = vld [vmem:[%s9826_s3 + $0xf0] sm:$0xff] }
  0x26   :  { %5127 = vmatpush.bf16.msrb.mxu3 %v5729_v1  ;;  %1046 = vmatmul.bf16.vlgmr.msra.gmra.mxu1 %v4462_v46  ;;  %v4478_v1 = vor.u32 %v5004_v61, %v4477_v60  ;;  %v4505_v46 = vld [vmem:[#allocation2 + $0x60] sm:$0xf] }
  0x27   :  { %1215 = vmatmul.bf16.vlgmr.msra.gmra.mxu2 %v4466_v47  ;;  %2810 = vrot.lane.b32.xlu1 %v2669_v48, %s5693_s11  ;;  %v5012_v47 = vld [vmem:[#allocation2 + $0x68] sm:$0xf0]  ;;  %v4793_v48 = vld [vmem:[#allocation2 + $0x2a0] sm:$0xf] }
  0x28   :  { %2812 = vrot.lane.b32.xlu2 %v2670_v49, %s5693_s11  ;;  %v2691_v49 = vld [vmem:[%s9826_s3 + $0x118] sm:$0xff]  ;;  %v4506_v54 = vor.u32 %v5012_v47, %v4505_v46  ;;  %v2692_v60 = vld [vmem:[%s9826_s3 + $0x120] sm:$0xff] }
  0x29   :  { %2808 = vrot.lane.b32.xlu0 %v2668_v50, %s5693_s11  ;;  %v5011_v50 = vld [vmem:[#allocation2 + $0x64] sm:$0xf] }
  0x2a   :  { %5128 = vmatpush.bf16.msrb.mxu3 %v5747_v5  ;;  %v2674_v5 = vld [vmem:[%s9826_s3 + $0x90] sm:$0xff]  ;;  %v4510_v56 = vor.u32 %v5011_v50, %v4507_v52  ;;  %v2696_v61 = vld [vmem:[%s9826_s3 + $0x140] sm:$0xff]  ;;  %v2709_v50 = vld [vmem:[%s9826_s3 + $0x1a8] sm:$0xff] }
  0x2b   :  { %v2708_v47 = vld [vmem:[%s9826_s3 + $0x1a0] sm:$0xff]  ;;  %v5020_v52 = vld [vmem:[#allocation2 + $0xac] sm:$0xf] }
  0x2e   :  { %5129 = vmatpush.bf16.msrb.mxu3 %v5771_v10  ;;  %v4769_v10 = vld [vmem:[#allocation2 + $0x270] sm:$0xf] }
  0x2f   :  { %2816 = vrot.lane.b32.xlu1 %v2672_v51, %s5693_s11  ;;  %v4770_v22 = vor.u32 %v5078_v13, %v4769_v10  ;;  %v2689_v51 = vld [vmem:[%s9826_s3 + $0x108] sm:$0xff] }
  0x30   :  { %2818 = vrot.lane.b32.xlu2 %v2673_v55, %s5693_s11 }
  0x31   :  { %2814 = vrot.lane.b32.xlu0 %v2671_v58, %s5693_s11 }
  0x32   :  { %5130 = vmatpush.bf16.msrb.mxu3 %v5795_v16  ;;  %v4483_v16 = vld [vmem:[#allocation2 + $0x3c] sm:$0xf0] }
  0x33   :  { %v4486_v23 = vor.u32 %v5005_v14, %v4483_v16  ;;  %v4526_v14 = vor.u32 %v5016_v9, %v4525_v8  ;;  %v2699_v16 = vld [vmem:[%s9826_s3 + $0x158] sm:$0xff]  ;;  %v4553_v8 = vld [vmem:[#allocation2 + $0xc0] sm:$0xf] }
  0x34   :  { %v6129_v9 = vld [vmem:[%s9825_s2] ss:$0 sm:$0xff] }
  0x35   :  { %882 = vmatmul.bf16.gmra.mxu0 %v4470_v62  ;;  %1002 = vmatmul.bf16.gmra.mxu3 %v4758_v63  ;;  %v4517_v62 = vld [vmem:[#allocation2 + $0x78] sm:$0xf]  ;;  %v5015_v63 = vld [vmem:[#allocation2 + $0x80] sm:$0xf0] }
  0x36   :  { %1051 = vmatmul.bf16.gmra.mxu1 %v4474_v0  ;;  %5131 = vmatpush.bf16.msrb.mxu3 %v5813_v19  ;;  %v5007_v19 = vld [vmem:[#allocation2 + $0x40] sm:$0xf0]  ;;  %v4805_v0 = vld [vmem:[#allocation2 + $0x2b8] sm:$0xf]  ;;  %v4518_v10 = vor.u32 %v5015_v63, %v4517_v62 }
  0x37   :  { %1220 = vmatmul.bf16.gmra.mxu2 %v4478_v1  ;;  %2822 = vrot.lane.b32.xlu1 %v2675_v3, %s5693_s11  ;;  %v4490_v24 = vor.u32 %v5007_v19, %v4489_v18  ;;  %v2697_v1 = vld [vmem:[%s9826_s3 + $0x148] sm:$0xff]  ;;  %v5087_v3 = vld [vmem:[#allocation2 + $0x2c0] sm:$0xf0]  ;;  %v2698_v19 = vld [vmem:[%s9826_s3 + $0x150] sm:$0xff] }
  0x38   :  { %2824 = vrot.lane.b32.xlu2 %v2676_v4, %s5693_s11  ;;  %v5014_v4 = vld [vmem:[#allocation2 + $0x7c] sm:$0xf]  ;;  %v2700_v18 = vld [vmem:[%s9826_s3 + $0x160] sm:$0xff] }
  0x39   :  { %2820 = vrot.lane.b32.xlu0 %v2674_v5, %s5693_s11  ;;  %v2695_v5 = vld [vmem:[%s9826_s3 + $0x138] sm:$0xff] }
  0x3a   :  { %5132 = vmatpush.bf16.msrb.mxu3 %v5837_v25  ;;  %v2681_v25 = vld [vmem:[%s9826_s3 + $0xc8] sm:$0xff]  ;;  %v2711_v63 = vld [vmem:[%s9826_s3 + $0x1b8] sm:$0xff] }
  0x3e   :  { %5133 = vmatpush.bf16.msrb.mxu3 %v5855_v28  ;;  %v2680_v28 = vld [vmem:[%s9826_s3 + $0xc0] sm:$0xff] }
  0x3f   :  { %2828 = vrot.lane.b32.xlu1 %v2678_v7, %s5693_s11  ;;  %v4519_v7 = vld [vmem:[#allocation2 + $0x84] sm:$0xf0] }
  0x40   :  { %2830 = vrot.lane.b32.xlu2 %v2679_v12, %s5693_s11  ;;  %v4806_v12 = vor.u32 %v5087_v3, %v4805_v0  ;;  %v4522_v13 = vor.u32 %v5014_v4, %v4519_v7  ;;  %v2712_v0 = vld [vmem:[%s9826_s3 + $0x1c0] sm:$0xff]  ;;  %v2714_v7 = vld [vmem:[%s9826_s3 + $0x1d0] sm:$0xff] }
  0x41   :  { %2826 = vrot.lane.b32.xlu0 %v2677_v15, %s5693_s11 }
  0x42   :  { %5134 = vmatpush.bf16.msrb.mxu3 %v5871_v33  ;;  %v2685_v33 = vld [vmem:[%s9826_s3 + $0xe8] sm:$0xff] }
  0x45   :  { %887 = vmatmul.bf16.gmra.mxu0 %v4482_v21  ;;  %1007 = vmatmul.bf16.gmra.mxu3 %v4770_v22 }
  0x46   :  { %5135 = vmatpush.bf16.msra.mxu3 %v5734_v2  ;;  %1056 = vmatmul.bf16.gmra.mxu1 %v4486_v23  ;;  %v2684_v2 = vld [vmem:[%s9826_s3 + $0xe0] sm:$0xff] }
  0x47   :  { %1225 = vmatmul.bf16.gmra.mxu2 %v4490_v24  ;;  %2834 = vrot.lane.b32.xlu1 %v2681_v25, %s5693_s11  ;;  %v2702_v24 = vld [vmem:[%s9826_s3 + $0x170] sm:$0xff] }
  0x48   :  { %2836 = vrot.lane.b32.xlu2 %v2682_v27, %s5693_s11  ;;  %v4529_v25 = vld [vmem:[#allocation2 + $0x90] sm:$0xf]  ;;  %v5018_v27 = vld [vmem:[#allocation2 + $0x98] sm:$0xf0] }
  0x49   :  { %2832 = vrot.lane.b32.xlu0 %v2680_v28, %s5693_s11  ;;  %v4817_v28 = vld [vmem:[#allocation2 + $0x2d0] sm:$0xf] }
  0x4a   :  { %5136 = vmatpush.bf16.msra.mxu3 %v5752_v6  ;;  %v4495_v6 = vld [vmem:[#allocation2 + $0x54] sm:$0xf0] }
  0x4e   :  { %5137 = vmatpush.bf16.msra.mxu3 %v5776_v11  ;;  %v4498_v11 = vor.u32 %v5008_v36, %v4495_v6  ;;  %v5019_v36 = vld [vmem:[#allocation2 + $0xa0] sm:$0xf0]  ;;  %v4818_v6 = vor.u32 %v5090_v30, %v4817_v28 }
  0x4f   :  { %2840 = vrot.lane.b32.xlu1 %v2684_v2, %s5693_s11  ;;  %v2703_v2 = vld [vmem:[%s9826_s3 + $0x178] sm:$0xff] }
  0x50   :  { %2842 = vrot.lane.b32.xlu2 %v2685_v33, %s5693_s11  ;;  %v4531_v33 = vld [vmem:[#allocation2 + $0x9c] sm:$0xf0] }
  0x51   :  { %2838 = vrot.lane.b32.xlu0 %v2683_v37, %s5693_s11  ;;  %v4530_v37 = vor.u32 %v5018_v27, %v4529_v25  ;;  %v4534_v39 = vor.u32 %v5017_v31, %v4531_v33  ;;  %v5025_v25 = vld [vmem:[#allocation2 + $0xd0] sm:$0xf0] }
  0x52   :  { %5138 = vmatpush.bf16.msra.mxu3 %v5800_v17  ;;  %v2690_v17 = vld [vmem:[%s9826_s3 + $0x110] sm:$0xff] }
  0x55   :  { %892 = vmatmul.bf16.gmra.mxu0 %v4494_v40  ;;  %1012 = vmatmul.bf16.gmra.mxu3 %v4782_v41  ;;  %v4538_v40 = vor.u32 %v5019_v36, %v4537_v35 }
  0x56   :  { %1061 = vmatmul.bf16.gmra.mxu1 %v4498_v11  ;;  %5139 = vmatpush.bf16.msra.mxu3 %v5818_v20  ;;  %v5084_v20 = vld [vmem:[#allocation2 + $0x2a8] sm:$0xf0] }
  0x57   :  { %1230 = vmatmul.bf16.gmra.mxu2 %v4502_v42  ;;  %2846 = vrot.lane.b32.xlu1 %v2687_v43, %s5693_s11  ;;  %v4794_v55 = vor.u32 %v5084_v20, %v4793_v48  ;;  %v2705_v42 = vld [vmem:[%s9826_s3 + $0x188] sm:$0xff]  ;;  %v2706_v43 = vld [vmem:[%s9826_s3 + $0x190] sm:$0xff] }
  0x58   :  { %2848 = vrot.lane.b32.xlu2 %v2688_v44, %s5693_s11  ;;  %v2704_v44 = vld [vmem:[%s9826_s3 + $0x180] sm:$0xff]  ;;  %v4541_v48 = vld [vmem:[#allocation2 + $0xa8] sm:$0xf] }
  0x59   :  { %2844 = vrot.lane.b32.xlu0 %v2686_v45, %s5693_s11  ;;  %v4829_v20 = vld [vmem:[#allocation2 + $0x2e8] sm:$0xf] }
  0x5a   :  { %5140 = vmatpush.bf16.msra.mxu3 %v5842_v26  ;;  %v5013_v26 = vld [vmem:[#allocation2 + $0x70] sm:$0xf0] }
  0x5b   :  { %v4514_v57 = vor.u32 %v5013_v26, %v4513_v53  ;;  %v2707_v53 = vld [vmem:[%s9826_s3 + $0x198] sm:$0xff] }
  0x5c   :  { %v4543_v26 = vld [vmem:[#allocation2 + $0xb4] sm:$0xf0] }
  0x5e   :  { %5141 = vmatpush.bf16.msra.mxu3 %v5860_v29  ;;  %v2693_v29 = vld [vmem:[%s9826_s3 + $0x128] sm:$0xff] }
  0x5f   :  { %2852 = vrot.lane.b32.xlu1 %v2690_v17, %s5693_s11 }
  0x60   :  { %2854 = vrot.lane.b32.xlu2 %v2691_v49, %s5693_s11  ;;  %v5021_v49 = vld [vmem:[#allocation2 + $0xb0] sm:$0xf0] }
  0x61   :  { %2850 = vrot.lane.b32.xlu0 %v2689_v51, %s5693_s11  ;;  %v5093_v51 = vld [vmem:[#allocation2 + $0x2f0] sm:$0xf0] }
  0x62   :  { %v6002_v58 = vpop.permute.xlu2 %2792  ;;  %5142 = vmatpush.bf16.msra.mxu3 %v5876_v34 }
  0x63   :  { %9949 = vst [vmem:[#allocation5_spill] sm:$0xff] %v6002_v58 }
  0x65   :  { %897 = vmatmul.bf16.gmra.mxu0 %v4506_v54  ;;  %1017 = vmatmul.bf16.gmra.mxu3 %v4794_v55  ;;  %v4549_v54 = vld [vmem:[#allocation2 + $0xb0] sm:$0xf]  ;;  %v5022_v55 = vld [vmem:[#allocation2 + $0xb8] sm:$0xf0] }
  0x66   :  { %1066 = vmatmul.bf16.gmra.mxu1 %v4510_v56  ;;  %v4542_v56 = vor.u32 %v5021_v49, %v4541_v48 }
  0x67   :  { %1235 = vmatmul.bf16.gmra.mxu2 %v4514_v57  ;;  %2858 = vrot.lane.b32.xlu1 %v2693_v29, %s5693_s11  ;;  %v4830_v57 = vor.u32 %v5093_v51, %v4829_v20 }
  0x68   :  { %2860 = vrot.lane.b32.xlu2 %v2694_v59, %s5693_s11  ;;  %v4546_v59 = vor.u32 %v5020_v52, %v4543_v26  ;;  %v5027_v26 = vld [vmem:[#allocation2 + $0xe0] sm:$0xf0] }
  0x69   :  { %2856 = vrot.lane.b32.xlu0 %v2692_v60, %s5693_s11  ;;  %v4550_v60 = vor.u32 %v5022_v55, %v4549_v54  ;;  %v5026_v54 = vld [vmem:[#allocation2 + $0xdc] sm:$0xf] }
  0x6a   :  { %v6017_v34 = vpop.permute.xlu2 %2794  ;;  %v5074_v55 = vld [vmem:[#allocation2 + $0x25c] sm:$0xf] }
  0x6b   :  { %9950 = vst [vmem:[#allocation6_spill] sm:$0xff] %v6017_v34 }
  0x6f   :  { %2864 = vrot.lane.b32.xlu1 %v2696_v61, %s5693_s11 }
  0x70   :  { %2866 = vrot.lane.b32.xlu2 %v2697_v1, %s5693_s11  ;;  %v2710_v1 = vld [vmem:[%s9826_s3 + $0x1b0] sm:$0xff] }
  0x71   :  { %2862 = vrot.lane.b32.xlu0 %v2695_v5, %s5693_s11 }
  0x72   :  { %v6031_v15 = vpop.permute.xlu2 %2800 }
  0x73   :  { %9951 = vst [vmem:[#allocation7_spill] sm:$0xff] %v6031_v15 }
  0x75   :  { %902 = vmatmul.bf16.gmra.mxu0 %v4518_v10  ;;  %1022 = vmatmul.bf16.gmra.mxu3 %v4806_v12  ;;  %v5024_v10 = vld [vmem:[#allocation2 + $0xc8] sm:$0xf0]  ;;  %v5023_v12 = vld [vmem:[#allocation2 + $0xc4] sm:$0xf] }
  0x76   :  { %1071 = vmatmul.bf16.gmra.mxu1 %v4522_v13  ;;  %v2715_v13 = vld [vmem:[%s9826_s3 + $0x1d8] sm:$0xff]  ;;  %v4554_v27 = vor.u32 %v5024_v10, %v4553_v8 }
  0x77   :  { %1240 = vmatmul.bf16.gmra.mxu2 %v4526_v14  ;;  %2870 = vrot.lane.b32.xlu1 %v2699_v16, %s5693_s11  ;;  %v5071_v14 = vld [vmem:[#allocation2 + $0x244] sm:$0xf]  ;;  %v4747_v16 = vld [vmem:[#allocation2 + $0x24c] sm:$0xf0] }
  0x78   :  { %2872 = vrot.lane.b32.xlu2 %v2700_v18, %s5693_s11  ;;  %v2713_v18 = vld [vmem:[%s9826_s3 + $0x1c8] sm:$0xff]  ;;  %v4750_v28 = vor.u32 %v5071_v14, %v4747_v16 }
  0x79   :  { %2868 = vrot.lane.b32.xlu0 %v2698_v19, %s5693_s11  ;;  %v6045_v21 = vpop.permute.xlu1 %2788  ;;  %v4555_v19 = vld [vmem:[#allocation2 + $0xcc] sm:$0xf0] }
  0x7a   :  { %9952 = vst [vmem:[#allocation8_spill] sm:$0xff] %v6045_v21  ;;  %v6047_v22 = vpop.permute.xlu2 %2806  ;;  %v4558_v31 = vor.u32 %v5023_v12, %v4555_v19 }
  0x7b   :  { %9953 = vst [vmem:[#allocation9_spill] sm:$0xff] %v6047_v22  ;;  %v6049_v23 = vpop.permute.xlu0 %2784 }
  0x7f   :  { %2876 = vrot.lane.b32.xlu1 %v2702_v24, %s5693_s11  ;;  %v4561_v24 = vld [vmem:[#allocation2 + $0xc8] sm:$0xf] }
  0x80   :  { %2878 = vrot.lane.b32.xlu2 %v2703_v2, %s5693_s11 }
  0x81   :  { %2874 = vrot.lane.b32.xlu0 %v2701_v32, %s5693_s11  ;;  %v6063_v38 = vpop.permute.xlu1 %2790  ;;  %v4562_v32 = vor.u32 %v5025_v25, %v4561_v24 }
  0x82   :  { %9954 = vst [vmem:[#allocation10_spill] sm:$0xff] %v6063_v38  ;;  %v6065_v41 = vpop.permute.xlu2 %2812 }
  0x83   :  { %9955 = vst [vmem:[#allocation11_spill] sm:$0xff] %v6065_v41  ;;  %v6067_v11 = vpop.permute.xlu0 %2786 }
  0x84   :  { %9956 = vst [vmem:[#allocation12_spill] sm:$0xff] %v6067_v11 }
  0x85   :  { %907 = vmatmul.bf16.gmra.mxu0 %v4530_v37  ;;  %1027 = vmatmul.bf16.gmra.mxu3 %v4818_v6  ;;  %v2717_v6 = vld [vmem:[%s9826_s3 + $0x1e8] sm:$0xff] }
  0x86   :  { %1076 = vmatmul.bf16.gmra.mxu1 %v4534_v39  ;;  %v2718_v39 = vld [vmem:[%s9826_s3 + $0x1f0] sm:$0xff] }
  0x87   :  { %1245 = vmatmul.bf16.gmra.mxu2 %v4538_v40  ;;  %2882 = vrot.lane.b32.xlu1 %v2705_v42, %s5693_s11  ;;  %v2716_v42 = vld [vmem:[%s9826_s3 + $0x1e0] sm:$0xff] }
  0x88   :  { %2884 = vrot.lane.b32.xlu2 %v2706_v43, %s5693_s11 }
  0x89   :  { %2880 = vrot.lane.b32.xlu0 %v2704_v44, %s5693_s11  ;;  %v6081_v45 = vpop.permute.xlu1 %2798 }
  0x8a   :  { %9957 = vst [vmem:[#allocation13_spill] sm:$0xff] %v6081_v45  ;;  %v6083_v17 = vpop.permute.xlu2 %2818 }
  0x8b   :  { %9958 = vst [vmem:[#allocation14_spill] sm:$0xff] %v6083_v17  ;;  %v6085_v46 = vpop.permute.xlu0 %2796 }
  0x8c   :  { %9959 = vst [vmem:[#allocation15_spill] sm:$0xff] %v6085_v46 }
  0x8f   :  { %2888 = vrot.lane.b32.xlu1 %v2708_v47, %s5693_s11 }
  0x90   :  { %2890 = vrot.lane.b32.xlu2 %v2709_v50, %s5693_s11 }
  0x91   :  { %2886 = vrot.lane.b32.xlu0 %v2707_v53, %s5693_s11  ;;  %v6099_v29 = vpop.permute.xlu1 %2804  ;;  %v4565_v53 = vld [vmem:[#allocation2 + $0xd8] sm:$0xf] }
  0x92   :  { %9960 = vst [vmem:[#allocation16_spill] sm:$0xff] %v6099_v29  ;;  %v6101_v61 = vpop.permute.xlu2 %2824  ;;  %v4566_v8 = vor.u32 %v5027_v26, %v4565_v53  ;;  %v5077_v53 = vld [vmem:[#allocation2 + $0x274] sm:$0xf]  ;;  %v4771_v26 = vld [vmem:[#allocation2 + $0x27c] sm:$0xf0] }
  0x93   :  { %9961 = vst [vmem:[#allocation17_spill] sm:$0xff] %v6101_v61  ;;  %v6103_v62 = vpop.permute.xlu0 %2802 }
  0x94   :  { %9962 = vst [vmem:[#allocation18_spill] sm:$0xff] %v6103_v62 }
  0x95   :  { %912 = vmatmul.bf16.gmra.mxu0 %v4542_v56  ;;  %1032 = vmatmul.bf16.gmra.mxu3 %v4830_v57  ;;  %v4759_v56 = vld [vmem:[#allocation2 + $0x264] sm:$0xf0]  ;;  %v2719_v57 = vld [vmem:[%s9826_s3 + $0x1f8] sm:$0xff] }
  0x96   :  { %1081 = vmatmul.bf16.gmra.mxu1 %v4546_v59  ;;  %v4567_v59 = vld [vmem:[#allocation2 + $0xe4] sm:$0xf0]  ;;  %v4762_v10 = vor.u32 %v5074_v55, %v4759_v56  ;;  %v4585_v55 = vld [vmem:[#allocation2 + $0xf8] sm:$0xf]  ;;  %v5031_v56 = vld [vmem:[#allocation2 + $0x100] sm:$0xf0] }
  0x97   :  { %1250 = vmatmul.bf16.gmra.mxu2 %v4550_v60  ;;  %2894 = vrot.lane.b32.xlu1 %v2711_v63, %s5693_s11  ;;  %v4573_v60 = vld [vmem:[#allocation2 + $0xe0] sm:$0xf]  ;;  %v5028_v63 = vld [vmem:[#allocation2 + $0xe8] sm:$0xf0] }
  0x98   :  { %2896 = vrot.lane.b32.xlu2 %v2712_v0, %s5693_s11  ;;  %v4574_v19 = vor.u32 %v5028_v63, %v4573_v60 }
  0x99   :  { %2892 = vrot.lane.b32.xlu0 %v2710_v1, %s5693_s11  ;;  %v6117_v3 = vpop.permute.xlu1 %2810 }
  0x9a   :  { %9963 = vst [vmem:[#allocation19_spill] sm:$0xff] %v6117_v3  ;;  %v6119_v4 = vpop.permute.xlu2 %2830 }
  0x9b   :  { %9964 = vst [vmem:[#allocation20_spill] sm:$0xff] %v6119_v4  ;;  %v6121_v5 = vpop.permute.xlu0 %2808 }
  0x9c   :  { %9965 = vst [vmem:[#allocation21_spill] sm:$0xff] %v6121_v5 }
  0x9f   :  { %2900 = vrot.lane.b32.xlu1 %v2714_v7, %s5693_s11 }
  0xa0   :  { %2902 = vrot.lane.b32.xlu2 %v2715_v13, %s5693_s11 }
  0xa1   :  { %2898 = vrot.lane.b32.xlu0 %v2713_v18, %s5693_s11  ;;  %v6140_v30 = vpop.permute.xlu1 %2816  ;;  %v4570_v18 = vor.u32 %v5026_v54, %v4567_v59  ;;  %v4579_v54 = vld [vmem:[#allocation2 + $0xfc] sm:$0xf0] }
  0xa2   :  { %v878_v2 = vpop.f32.mrf.mxu0  ;;  %9966 = vst [vmem:[#allocation22_spill] sm:$0xff] %v6140_v30  ;;  %v6143_v36 = vpop.permute.xlu2 %2836 }
  0xa3   :  { %v879_v33 = vadd.f32 %v6129_v9, %v878_v2  ;;  %v1047_v35 = vpop.f32.mrf.mxu1  ;;  %9967 = vst [vmem:[#allocation23_spill] sm:$0xff] %v6143_v36  ;;  %v6145_v37 = vpop.permute.xlu0 %2814 }
  0xa4   :  { %9968 = vst [vmem:[#allocation24_spill] sm:$0xff] %v6145_v37 }
  0xa5   :  { %917 = vmatmul.bf16.gmra.mxu0 %v4554_v27  ;;  %1166 = vmatmul.bf16.vlgmr.msrb.gmra.mxu3 %v4750_v28  ;;  %v1048_v40 = vadd.f32 %v1047_v35, %v879_v33 }
  0xa6   :  { %1086 = vmatmul.bf16.gmra.mxu1 %v4558_v31 }
  0xa7   :  { %1255 = vmatmul.bf16.gmra.mxu2 %v4562_v32  ;;  %2906 = vrot.lane.b32.xlu1 %v2717_v6, %s5693_s11 }
  0xa8   :  { %v6156_v43 = vpop.f32.mrf.mxu3  ;;  %2908 = vrot.lane.b32.xlu2 %v2718_v39, %s5693_s11 }
  0xa9   :  { %2904 = vrot.lane.b32.xlu0 %v2716_v42, %s5693_s11  ;;  %v6163_v49 = vpop.permute.xlu1 %2822 }
  0xaa   :  { %v1216_v44 = vpop.f32.mrf.mxu2  ;;  %v880_v48 = vpop.f32.mrf.mxu0  ;;  %9969 = vst [vmem:[#allocation25_spill] sm:$0xff] %v6163_v49 }
  0xab   :  { %v6161_v47 = vadd.f32 %v1216_v44, %v1048_v40  ;;  %v1049_v20 = vpop.f32.mrf.mxu1  ;;  %v881_v50 = vadd.f32 %v6129_v9, %v880_v48  ;;  %v6167_v51 = vpop.permute.xlu0 %2820  ;;  %v4577_v48 = vld [vmem:[#allocation2 + $0xf0] sm:$0xf] }
  0xac   :  { %9970 = vst [vmem:[#allocation26_spill] sm:$0xff] %v6167_v51  ;;  %v6169_v52 = vpop.permute.xlu2 %2842 }
  0xad   :  { %5149 = vtanh.f32 %v6161_v47  ;;  %9971 = vst [vmem:[#allocation27_spill] sm:$0xff] %v6169_v52  ;;  %v1050_v0 = vadd.f32 %v1049_v20, %v881_v50  ;;  %v5030_v20 = vld [vmem:[#allocation2 + $0xf8] sm:$0xf0]  ;;  %v5029_v50 = vld [vmem:[#allocation2 + $0xf4] sm:$0xf] }
  0xb0   :  { %v6174_v1 = vpop.f32.mrf.mxu3 }
  0xb1   :  { %2910 = vrot.lane.b32.xlu0 %v2719_v57, %s5693_s11  ;;  %v6179_v16 = vpop.permute.xlu1 %2828 }
  0xb2   :  { %v1218_v7 = vpop.f32.mrf.mxu2  ;;  %v883_v14 = vpop.f32.mrf.mxu0  ;;  %9972 = vst [vmem:[#allocation28_spill] sm:$0xff] %v6179_v16 }
  0xb3   :  { %v5150_v12 = vpop.eup %5149  ;;  %v6177_v13 = vadd.f32 %v1218_v7, %v1050_v0  ;;  %v884_v24 = vadd.f32 %v6129_v9, %v883_v14  ;;  %v1052_v25 = vpop.f32.mrf.mxu1  ;;  %v4578_v0 = vor.u32 %v5030_v20, %v4577_v48  ;;  %v4774_v7 = vor.u32 %v5077_v53, %v4771_v26 }
  0xb4   :  { %3104 = vrot.lane.b32.xlu1 %v5150_v12, %s5693_s11  ;;  %v6184_v27 = vpop.permute.xlu0 %2826  ;;  %v6186_v2 = vpop.permute.xlu2 %2848 }
  0xb5   :  { %5151 = vtanh.f32 %v6177_v13  ;;  %9973 = vst [vmem:[#allocation29_spill] sm:$0xff] %v6184_v27  ;;  %922 = vmatmul.bf16.gmra.mxu0 %v4566_v8  ;;  %1171 = vmatmul.bf16.gmra.mxu3 %v4762_v10  ;;  %v1053_v28 = vadd.f32 %v1052_v25, %v884_v24 }
  0xb6   :  { %1091 = vmatmul.bf16.gmra.mxu1 %v4570_v18  ;;  %9974 = vst [vmem:[#allocation30_spill] sm:$0xff] %v6186_v2  ;;  %v4582_v18 = vor.u32 %v5029_v50, %v4579_v54 }
  0xb7   :  { %1260 = vmatmul.bf16.gmra.mxu2 %v4574_v19  ;;  %v4586_v19 = vor.u32 %v5031_v56, %v4585_v55  ;;  %v4589_v55 = vld [vmem:[#allocation2 + $0x108] sm:$0xf]  ;;  %v5033_v56 = vld [vmem:[#allocation2 + $0x110] sm:$0xf0] }
  0xb8   :  { %v6188_v31 = vpop.f32.mrf.mxu3 }
  0xb9   :  { %v6192_v39 = vpop.permute.xlu1 %2834 }
  0xba   :  { %v1221_v32 = vpop.f32.mrf.mxu2  ;;  %v885_v6 = vpop.f32.mrf.mxu0  ;;  %9975 = vst [vmem:[#allocation31_spill] sm:$0xff] %v6192_v39 }
  0xbb   :  { %v5152_v33 = vpop.eup %5151  ;;  %v6190_v35 = vadd.f32 %v1221_v32, %v1053_v28  ;;  %v1054_v40 = vpop.f32.mrf.mxu1  ;;  %v886_v42 = vadd.f32 %v6129_v9, %v885_v6 }
  0xbc   :  { %3106 = vrot.lane.b32.xlu2 %v5152_v33, %s5693_s11  ;;  %v6197_v44 = vpop.permute.xlu0 %2832  ;;  %v6201_v63 = vpop.permute.xlu2 %2854 }
  0xbd   :  { %5153 = vtanh.f32 %v6190_v35  ;;  %9976 = vst [vmem:[#allocation32_spill] sm:$0xff] %v6197_v44  ;;  %v1055_v57 = vadd.f32 %v1054_v40, %v886_v42 }
  0xbe   :  { %9977 = vst [vmem:[#allocation33_spill] sm:$0xff] %v6201_v63 }
  0xc0   :  { %v6199_v59 = vpop.f32.mrf.mxu3 }
  0xc1   :  { %v6205_v14 = vpop.permute.xlu1 %2840 }
  0xc2   :  { %v1223_v60 = vpop.f32.mrf.mxu2  ;;  %v888_v12 = vpop.f32.mrf.mxu0  ;;  %9978 = vst [vmem:[#allocation34_spill] sm:$0xff] %v6205_v14 }
  0xc3   :  { %v5154_v8 = vpop.eup %5153  ;;  %v6203_v10 = vadd.f32 %v1223_v60, %v1055_v57  ;;  %v889_v24 = vadd.f32 %v6129_v9, %v888_v12  ;;  %v1057_v25 = vpop.f32.mrf.mxu1  ;;  %v5032_v57 = vld [vmem:[#allocation2 + $0x10c] sm:$0xf]  ;;  %v5034_v12 = vld [vmem:[#allocation2 + $0x118] sm:$0xf0] }
  0xc4   :  { %3108 = vrot.lane.b32.xlu0 %v5154_v8, %s5693_s11  ;;  %v6210_v28 = vpop.permute.xlu0 %2838  ;;  %v6219_v53 = vpop.permute.xlu2 %2860  ;;  %v5080_v60 = vld [vmem:[#allocation2 + $0x28c] sm:$0xf]  ;;  %v4597_v8 = vld [vmem:[#allocation2 + $0x110] sm:$0xf] }
  0xc5   :  { %5155 = vtanh.f32 %v6203_v10  ;;  %9979 = vst [vmem:[#allocation35_spill] sm:$0xff] %v6210_v28  ;;  %927 = vmatmul.bf16.gmra.mxu0 %v4578_v0  ;;  %1176 = vmatmul.bf16.gmra.mxu3 %v4774_v7  ;;  %v1058_v32 = vadd.f32 %v1057_v25, %v889_v24  ;;  %v4783_v0 = vld [vmem:[#allocation2 + $0x294] sm:$0xf0]  ;;  %v4590_v25 = vor.u32 %v5033_v56, %v4589_v55 }
  0xc6   :  { %1096 = vmatmul.bf16.gmra.mxu1 %v4582_v18  ;;  %9981 = vst [vmem:[#allocation37_spill] sm:$0xff] %v6219_v53  ;;  %v4591_v7 = vld [vmem:[#allocation2 + $0x114] sm:$0xf0]  ;;  %v4598_v2 = vor.u32 %v5034_v12, %v4597_v8 }
  0xc7   :  { %1265 = vmatmul.bf16.gmra.mxu2 %v4586_v19  ;;  %v4594_v63 = vor.u32 %v5032_v57, %v4591_v7 }
  0xc8   :  { %v6212_v33 = vpop.f32.mrf.mxu3 }
  0xc9   :  { %v6216_v20 = vpop.permute.xlu1 %2846 }
  0xca   :  { %v1226_v6 = vpop.f32.mrf.mxu2  ;;  %v890_v48 = vpop.f32.mrf.mxu0  ;;  %9980 = vst [vmem:[#allocation36_spill] sm:$0xff] %v6216_v20 }
  0xcb   :  { %v5156_v40 = vpop.eup %5155  ;;  %v6214_v42 = vadd.f32 %v1226_v6, %v1058_v32  ;;  %v1059_v50 = vpop.f32.mrf.mxu1  ;;  %v891_v26 = vadd.f32 %v6129_v9, %v890_v48  ;;  %v4786_v32 = vor.u32 %v5080_v60, %v4783_v0 }
  0xcc   :  { %3110 = vrot.lane.b32.xlu1 %v5156_v40, %s5693_s11  ;;  %v6223_v54 = vpop.permute.xlu0 %2844 }
  0xcd   :  { %5157 = vtanh.f32 %v6214_v42  ;;  %9982 = vst [vmem:[#allocation38_spill] sm:$0xff] %v6223_v54  ;;  %v1060_v18 = vadd.f32 %v1059_v50, %v891_v26  ;;  %v6236_v26 = vpop.permute.xlu2 %2866 }
  0xce   :  { %9985 = vst [vmem:[#allocation41_spill] sm:$0xff] %v6236_v26 }
  0xd0   :  { %v6225_v19 = vpop.f32.mrf.mxu3 }
  0xd1   :  { %v6229_v53 = vpop.permute.xlu1 %2852 }
  0xd2   :  { %v1228_v24 = vpop.f32.mrf.mxu2  ;;  %v893_v48 = vpop.f32.mrf.mxu0  ;;  %9983 = vst [vmem:[#allocation39_spill] sm:$0xff] %v6229_v53 }
  0xd3   :  { %v5158_v6 = vpop.eup %5157  ;;  %v6227_v40 = vadd.f32 %v1228_v24, %v1060_v18  ;;  %v894_v20 = vadd.f32 %v6129_v9, %v893_v48  ;;  %v1062_v54 = vpop.f32.mrf.mxu1  ;;  %v4609_v48 = vld [vmem:[#allocation2 + $0x128] sm:$0xf] }
  0xd4   :  { %3112 = vrot.lane.b32.xlu2 %v5158_v6, %s5693_s11  ;;  %v6234_v50 = vpop.permute.xlu0 %2850  ;;  %v4603_v6 = vld [vmem:[#allocation2 + $0x12c] sm:$0xf0] }
  0xd5   :  { %5159 = vtanh.f32 %v6227_v40  ;;  %9984 = vst [vmem:[#allocation40_spill] sm:$0xff] %v6234_v50  ;;  %932 = vmatmul.bf16.gmra.mxu0 %v4590_v25  ;;  %1181 = vmatmul.bf16.gmra.mxu3 %v4786_v32  ;;  %v1063_v55 = vadd.f32 %v1062_v54, %v894_v20  ;;  %v5035_v20 = vld [vmem:[#allocation2 + $0x124] sm:$0xf]  ;;  %v4795_v25 = vld [vmem:[#allocation2 + $0x2ac] sm:$0xf0]  ;;  %v6249_v32 = vpop.permute.xlu2 %2872 }
  0xd6   :  { %1101 = vmatmul.bf16.gmra.mxu1 %v4594_v63  ;;  %v4601_v63 = vld [vmem:[#allocation2 + $0x120] sm:$0xf]  ;;  %v5083_v54 = vld [vmem:[#allocation2 + $0x2a4] sm:$0xf]  ;;  %9988 = vst [vmem:[#allocation44_spill] sm:$0xff] %v6249_v32  ;;  %v4606_v14 = vor.u32 %v5035_v20, %v4603_v6 }
  0xd7   :  { %1270 = vmatmul.bf16.gmra.mxu2 %v4598_v2  ;;  %v5036_v2 = vld [vmem:[#allocation2 + $0x128] sm:$0xf0]  ;;  %v4798_v53 = vor.u32 %v5083_v54, %v4795_v25 }
  0xd8   :  { %v6238_v56 = vpop.f32.mrf.mxu3 }
  0xd9   :  { %v6242_v8 = vpop.permute.xlu1 %2858 }
  0xda   :  { %v1231_v57 = vpop.f32.mrf.mxu2  ;;  %v895_v7 = vpop.f32.mrf.mxu0  ;;  %9986 = vst [vmem:[#allocation42_spill] sm:$0xff] %v6242_v8  ;;  %v4602_v8 = vor.u32 %v5036_v2, %v4601_v63 }
  0xdb   :  { %v5160_v60 = vpop.eup %5159  ;;  %v6240_v0 = vadd.f32 %v1231_v57, %v1063_v55  ;;  %v1064_v12 = vpop.f32.mrf.mxu1  ;;  %v896_v18 = vadd.f32 %v6129_v9, %v895_v7  ;;  %v5037_v55 = vld [vmem:[#allocation2 + $0x130] sm:$0xf0] }
  0xdc   :  { %3114 = vrot.lane.b32.xlu0 %v5160_v60, %s5693_s11  ;;  %v6247_v24 = vpop.permute.xlu0 %2856  ;;  %v4610_v28 = vor.u32 %v5037_v55, %v4609_v48  ;;  %v4807_v48 = vld [vmem:[#allocation2 + $0x2c4] sm:$0xf0] }
  0xdd   :  { %5161 = vtanh.f32 %v6240_v0  ;;  %9987 = vst [vmem:[#allocation43_spill] sm:$0xff] %v6247_v24  ;;  %v1065_v57 = vadd.f32 %v1064_v12, %v896_v18  ;;  %v6264_v2 = vpop.permute.xlu2 %2878  ;;  %v4615_v55 = vld [vmem:[#allocation2 + $0x144] sm:$0xf0] }
  0xde   :  { %9991 = vst [vmem:[#allocation47_spill] sm:$0xff] %v6264_v2 }
  0xe0   :  { %v6251_v26 = vpop.f32.mrf.mxu3 }
  0xe1   :  { %v6255_v52 = vpop.permute.xlu1 %2864 }
  0xe2   :  { %v1233_v60 = vpop.f32.mrf.mxu2  ;;  %v898_v24 = vpop.f32.mrf.mxu0  ;;  %9989 = vst [vmem:[#allocation45_spill] sm:$0xff] %v6255_v52 }
  0xe3   :  { %v5162_v50 = vpop.eup %5161  ;;  %v6253_v7 = vadd.f32 %v1233_v60, %v1065_v57  ;;  %v899_v36 = vadd.f32 %v6129_v9, %v898_v24  ;;  %v1067_v32 = vpop.f32.mrf.mxu1  ;;  %v4621_v57 = vld [vmem:[#allocation2 + $0x140] sm:$0xf]  ;;  %v5040_v60 = vld [vmem:[#allocation2 + $0x148] sm:$0xf0] }
  0xe4   :  { %3116 = vrot.lane.b32.xlu1 %v5162_v50, %s5693_s11  ;;  %v6260_v12 = vpop.permute.xlu0 %2862  ;;  %v4622_v44 = vor.u32 %v5040_v60, %v4621_v57  ;;  %v4819_v60 = vld [vmem:[#allocation2 + $0x2dc] sm:$0xf0] }
  0xe5   :  { %5163 = vtanh.f32 %v6253_v7  ;;  %9990 = vst [vmem:[#allocation46_spill] sm:$0xff] %v6260_v12  ;;  %937 = vmatmul.bf16.gmra.mxu0 %v4602_v8  ;;  %1186 = vmatmul.bf16.gmra.mxu3 %v4798_v53  ;;  %v1068_v18 = vadd.f32 %v1067_v32, %v899_v36  ;;  %v5039_v53 = vld [vmem:[#allocation2 + $0x140] sm:$0xf0]  ;;  %v5038_v8 = vld [vmem:[#allocation2 + $0x13c] sm:$0xf]  ;;  %v6281_v4 = vpop.permute.xlu2 %2884 }
  0xe6   :  { %1106 = vmatmul.bf16.gmra.mxu1 %v4606_v14  ;;  %v5086_v32 = vld [vmem:[#allocation2 + $0x2bc] sm:$0xf]  ;;  %9995 = vst [vmem:[#allocation51_spill] sm:$0xff] %v6281_v4 }
  0xe7   :  { %1275 = vmatmul.bf16.gmra.mxu2 %v4610_v28  ;;  %v4613_v28 = vld [vmem:[#allocation2 + $0x138] sm:$0xf] }
  0xe8   :  { %v6262_v63 = vpop.f32.mrf.mxu3 }
  0xe9   :  { %v6268_v6 = vpop.permute.xlu1 %2870 }
  0xea   :  { %v1236_v20 = vpop.f32.mrf.mxu2  ;;  %v900_v24 = vpop.f32.mrf.mxu0  ;;  %9992 = vst [vmem:[#allocation48_spill] sm:$0xff] %v6268_v6  ;;  %v4614_v6 = vor.u32 %v5039_v53, %v4613_v28 }
  0xeb   :  { %v5164_v54 = vpop.eup %5163  ;;  %v6266_v25 = vadd.f32 %v1236_v20, %v1068_v18  ;;  %v1069_v50 = vpop.f32.mrf.mxu1  ;;  %v901_v36 = vadd.f32 %v6129_v9, %v900_v24 }
  0xec   :  { %3118 = vrot.lane.b32.xlu2 %v5164_v54, %s5693_s11  ;;  %v6273_v14 = vpop.permute.xlu0 %2868  ;;  %v4810_v54 = vor.u32 %v5086_v32, %v4807_v48  ;;  %v4936_v32 = vmul.f32 -1.442695, %v6177_v13  ;;  %v5041_v13 = vld [vmem:[#allocation2 + $0x154] sm:$0xf] }
  0xed   :  { %5165 = vtanh.f32 %v6266_v25  ;;  %9993 = vst [vmem:[#allocation49_spill] sm:$0xff] %v6273_v14  ;;  %v1070_v18 = vadd.f32 %v1069_v50, %v901_v36  ;;  %v4618_v14 = vor.u32 %v5038_v8, %v4615_v55  ;;  %v4935_v36 = vmul.f32 -1.442695, %v6161_v47 }
  0xf0   :  { %v6275_v20 = vpop.f32.mrf.mxu3 }
  0xf1   :  { %v6279_v39 = vpop.permute.xlu1 %2876 }
  0xf2   :  { %v1238_v2 = vpop.f32.mrf.mxu2  ;;  %v903_v24 = vpop.f32.mrf.mxu0  ;;  %9994 = vst [vmem:[#allocation50_spill] sm:$0xff] %v6279_v39 }
  0xf3   :  { %v5166_v52 = vpop.eup %5165  ;;  %v6277_v12 = vadd.f32 %v1238_v2, %v1070_v18  ;;  %v904_v16 = vadd.f32 %v6129_v9, %v903_v24  ;;  %v1072_v61 = vpop.f32.mrf.mxu1  ;;  %v4627_v18 = vld [vmem:[#allocation2 + $0x15c] sm:$0xf0]  ;;  %v5043_v24 = vld [vmem:[#allocation2 + $0x160] sm:$0xf0] }
  0xf4   :  { %3120 = vrot.lane.b32.xlu0 %v5166_v52, %s5693_s11  ;;  %v6286_v50 = vpop.permute.xlu0 %2874 }
  0xf5   :  { %5167 = vtanh.f32 %v6277_v12  ;;  %9996 = vst [vmem:[#allocation52_spill] sm:$0xff] %v6286_v50  ;;  %942 = vmatmul.bf16.gmra.mxu0 %v4614_v6  ;;  %1191 = vmatmul.bf16.gmra.mxu3 %v4810_v54  ;;  %v1073_v2 = vadd.f32 %v1072_v61, %v904_v16  ;;  %v6301_v16 = vpop.permute.xlu2 %2890  ;;  %v5042_v6 = vld [vmem:[#allocation2 + $0x158] sm:$0xf0]  ;;  %v4633_v54 = vld [vmem:[#allocation2 + $0x158] sm:$0xf] }
  0xf6   :  { %1111 = vmatmul.bf16.gmra.mxu1 %v4618_v14  ;;  %5169 = vpow2.f32 %v4935_v36  ;;  %9999 = vst [vmem:[#allocation55_spill] sm:$0xff] %v6301_v16  ;;  %v5089_v14 = vld [vmem:[#allocation2 + $0x2d4] sm:$0xf] }
  0xf7   :  { %1280 = vmatmul.bf16.gmra.mxu2 %v4622_v44  ;;  %v4625_v44 = vld [vmem:[#allocation2 + $0x150] sm:$0xf] }
  0xf8   :  { %v6289_v28 = vpop.f32.mrf.mxu3  ;;  %v4626_v39 = vor.u32 %v5042_v6, %v4625_v44  ;;  %v4937_v6 = vmul.f32 -1.442695, %v6190_v35 }
  0xf9   :  { %v6294_v55 = vpop.permute.xlu1 %2882 }
  0xfa   :  { %v1241_v53 = vpop.f32.mrf.mxu2  ;;  %v905_v52 = vpop.f32.mrf.mxu0  ;;  %9997 = vst [vmem:[#allocation53_spill] sm:$0xff] %v6294_v55 }
  0xfb   :  { %v5168_v8 = vpop.eup %5167  ;;  %v6292_v48 = vadd.f32 %v1241_v53, %v1073_v2  ;;  %v1074_v57 = vpop.f32.mrf.mxu1  ;;  %v906_v61 = vadd.f32 %v6129_v9, %v905_v52  ;;  %v4822_v52 = vor.u32 %v5089_v14, %v4819_v60 }
  0xfc   :  { %3122 = vrot.lane.b32.xlu1 %v5168_v8, %s5693_s11  ;;  %v6299_v47 = vpop.permute.xlu0 %2880  ;;  %v5170_v53 = vpop.eup %5169 }
  0xfd   :  { %5171 = vtanh.f32 %v6292_v48  ;;  %9998 = vst [vmem:[#allocation54_spill] sm:$0xff] %v6299_v47  ;;  %v1075_v2 = vadd.f32 %v1074_v57, %v906_v61  ;;  %v4634_v47 = vor.u32 %v5043_v24, %v4633_v54  ;;  %v6311_v61 = vadd.f32 1.0, %v5170_v53  ;;  %v4637_v53 = vld [vmem:[#allocation2 + $0x168] sm:$0xf] }
  0xfe   :  { %5173 = vpow2.f32 %v4936_v32  ;;  %v4630_v32 = vor.u32 %v5041_v13, %v4627_v18 }
  0xff   :  { %vm1637_vm1 = vweird.f32 %v6311_v61 }
 0x100   :  { %v6303_v36 = vpop.f32.mrf.mxu3 }
 0x101   :  { %v6307_v55 = vpop.permute.xlu1 %2888 }
 0x102   :  { %v1243_v8 = vpop.f32.mrf.mxu2  ;;  %v908_v16 = vpop.f32.mrf.mxu0  ;;  %10000 = vst [vmem:[#allocation56_spill] sm:$0xff] %v6307_v55 }
 0x103   :  { %v5172_v50 = vpop.eup %5171  ;;  %v6305_v4 = vadd.f32 %v1243_v8, %v1075_v2  ;;  %v909_v27 = vadd.f32 %v6129_v9, %v908_v16  ;;  %v1077_v49 = vpop.f32.mrf.mxu1  ;;  %v5045_v8 = vld [vmem:[#allocation2 + $0x170] sm:$0xf0] }
 0x104   :  { %3124 = vrot.lane.b32.xlu2 %v5172_v50, %s5693_s11  ;;  %v5174_v57 = vpop.eup %5173  ;;  %v6314_v44 = vpop.permute.xlu0 %2886 }
 0x105   :  { %5175 = vtanh.f32 %v6305_v4  ;;  %10001 = vst [vmem:[#allocation57_spill] sm:$0xff] %v6314_v44  ;;  %947 = vmatmul.bf16.gmra.mxu0 %v4626_v39  ;;  %1196 = vmatmul.bf16.gmra.mxu3 %v4822_v52  ;;  %v1078_v14 = vadd.f32 %v1077_v49, %v909_v27  ;;  %v6317_v13 = vadd.f32 1.0, %v5174_v57  ;;  %v6319_v16 = vpop.permute.xlu2 %2896  ;;  %v4938_v27 = vmul.f32 -1.442695, %v6203_v10  ;;  %v5092_v57 = vld [vmem:[#allocation2 + $0x2ec] sm:$0xf] }
 0x106   :  { %1116 = vmatmul.bf16.gmra.mxu1 %v4630_v32  ;;  %10002 = vst [vmem:[#allocation58_spill] sm:$0xff] %v6319_v16  ;;  %5177 = vrcp.f32 %v6311_v61  ;;  %v5044_v32 = vld [vmem:[#allocation2 + $0x16c] sm:$0xf] }
 0x107   :  { %1285 = vmatmul.bf16.gmra.mxu2 %v4634_v47  ;;  %5179 = vpow2.f32 %v4937_v6  ;;  %v4939_v47 = vmul.f32 -1.442695, %v6214_v42  ;;  %v4831_v6 = vld [vmem:[#allocation2 + $0x2f4] sm:$0xf0]  ;;  %vm1652_vm4 = vweird.f32 %v6317_v13 }
 0x108   :  { %v6322_v50 = vpop.f32.mrf.mxu3  ;;  %5181 = vrcp.f32 %v6317_v13  ;;  %v4834_v44 = vor.u32 %v5092_v57, %v4831_v6 }
 0x109   :  { %v6326_v24 = vpop.permute.xlu1 %2894 }
 0x10a   :  { %v1246_v60 = vpop.f32.mrf.mxu2  ;;  %v910_v39 = vpop.f32.mrf.mxu0  ;;  %10003 = vst [vmem:[#allocation59_spill] sm:$0xff] %v6326_v24 }
 0x10b   :  { %v5176_v18 = vpop.eup %5175  ;;  %v6324_v54 = vadd.f32 %v1246_v60, %v1078_v14  ;;  %v1079_v49 = vpop.f32.mrf.mxu1  ;;  %v911_v35 = vadd.f32 %v6129_v9, %v910_v39  ;;  %v4639_v14 = vld [vmem:[#allocation2 + $0x174] sm:$0xf0]  ;;  %v4645_v60 = vld [vmem:[#allocation2 + $0x170] sm:$0xf] }
 0x10c   :  { %3126 = vrot.lane.b32.xlu0 %v5176_v18, %s5693_s11  ;;  %v6334_v2 = vpop.permute.xlu0 %2892  ;;  %v6336_v52 = vpop.eup %5177  ;;  %v5046_v18 = vld [vmem:[#allocation2 + $0x178] sm:$0xf0] }
 0x10d   :  { %5183 = vtanh.f32 %v6324_v54  ;;  %10004 = vst [vmem:[#allocation60_spill] sm:$0xff] %v6334_v2  ;;  %v5180_v16 = vpop.eup %5179  ;;  %v1080_v10 = vadd.f32 %v1079_v49, %v911_v35  ;;  %v6342_v39 = vpop.permute.xlu2 %2902  ;;  %v4638_v2 = vor.u32 %v5045_v8, %v4637_v53  ;;  %v1633_v51 = vmul.f32 %v6336_v52, %v6311_v61 }
 0x10e   :  { %v6340_v55 = vpop.eup %5181  ;;  %10005 = vst [vmem:[#allocation61_spill] sm:$0xff] %v6342_v39  ;;  %5185 = vpow2.f32 %v4938_v27  ;;  %v4642_v49 = vor.u32 %v5044_v32, %v4639_v14  ;;  %v4646_v35 = vor.u32 %v5046_v18, %v4645_v60  ;;  %v6350_v3 = vadd.f32 1.0, %v5180_v16 }
 0x10f   :  { %5187 = vpow2.f32 %v4939_v47  ;;  %v1648_v27 = vmul.f32 %v6340_v55, %v6317_v13  ;;  %v1634_v53 = vsub.f32 1.0, %v1633_v51  ;;  %vm1638_vm0 = vweird.f32 %v6336_v52 }
 0x110   :  { %v6338_v24 = vpop.f32.mrf.mxu3  ;;  %vm1653_vm2 = vweird.f32 %v6340_v55  ;;  %vm6392_vm3 = vmor %vm1637_vm1, %vm1638_vm0  ;;  %vm1667_vm9 = vweird.f32 %v6350_v3 }
 0x111   :  { %v6348_v41 = vpop.permute.xlu1 %2900  ;;  %v1649_v57 = vsub.f32 1.0, %v1648_v27  ;;  %v1635_v14 = vmul.f32 %v6336_v52, %v1634_v53  ;;  %vm6413_vm5 = vmor %vm1652_vm4, %vm1653_vm2 }
 0x112   :  { %v1248_v42 = vpop.f32.mrf.mxu2  ;;  %v913_v37 = vpop.f32.mrf.mxu0  ;;  %10006 = vst [vmem:[#allocation62_spill] sm:$0xff] %v6348_v41  ;;  %v5049_v41 = vld [vmem:[#allocation2 + $0x190] sm:$0xf0] }
 0x113   :  { %v5184_v17 = vpop.eup %5183  ;;  %v6346_v30 = vadd.f32 %v1248_v42, %v1080_v10  ;;  %v914_v39 = vadd.f32 %v6129_v9, %v913_v37  ;;  %v1082_v5 = vpop.f32.mrf.mxu1  ;;  %v1641_v10 = vand.u32 2147483647, %v6311_v61 }
 0x114   :  { %3128 = vrot.lane.b32.xlu1 %v5184_v17, %s5693_s11  ;;  %v6358_v16 = vpop.permute.xlu0 %2898  ;;  %v5186_v47 = vpop.eup %5185  ;;  %v1643_v17 = vand.u32 2147483648, %v6311_v61 }
 0x115   :  { %5189 = vtanh.f32 %v6346_v30  ;;  %952 = vmatmul.bf16.gmra.mxu0 %v4638_v2  ;;  %1201 = vmatmul.bf16.gmra.mxu3 %v4834_v44  ;;  %v1083_v8 = vadd.f32 %v1082_v5, %v914_v39  ;;  %10007 = vst [vmem:[#allocation63_spill] sm:$0xff] %v6358_v16  ;;  %v5188_v32 = vpop.eup %5187  ;;  %v6366_v51 = vadd.f32 1.0, %v5186_v47  ;;  %v4940_v39 = vmul.f32 -1.442695, %v6227_v40  ;;  %v6373_v42 = vpop.permute.xlu2 %2908  ;;  %v5047_v40 = vld [vmem:[#allocation2 + $0x184] sm:$0xf] }
 0x116   :  { %1121 = vmatmul.bf16.gmra.mxu1 %v4642_v49  ;;  %5191 = vrcp.f32 %v6350_v3  ;;  %10009 = vst [vmem:[#allocation65_spill] sm:$0xff] %v6373_v42  ;;  %v6379_v53 = vadd.f32 1.0, %v5188_v32  ;;  %v1636_v47 = vadd.f32 %v6336_v52, %v1635_v14  ;;  %v5073_v42 = vld [vmem:[#allocation2 + $0x250] sm:$0xf0]  ;;  %v1658_v32 = vand.u32 2147483648, %v6317_v13 }
 0x117   :  { %1290 = vmatmul.bf16.gmra.mxu2 %v4646_v35  ;;  %v1644_v35 = vor.u32 1.1754944e-38, %v1643_v17  ;;  %v4651_v17 = vld [vmem:[#allocation2 + $0x18c] sm:$0xf0]  ;;  %vm1642_vm6 = vcmp.eq.f32.partialorder %v1641_v10, 8.507059e+37  ;;  %v4941_v16 = vmul.f32 -1.442695, %v6240_v0  ;;  %vm1682_vm13 = vweird.f32 %v6366_v51 }
 0x118   :  { %v6360_v37 = vpop.f32.mrf.mxu3  ;;  %v4654_v58 = vor.u32 %v5047_v40, %v4651_v17  ;;  %vm1697_vm1 = vweird.f32 %v6379_v53 }
 0x119   :  { %v6369_v18 = vpop.permute.xlu1 %2906 }
 0x11a   :  { %v1251_v6 = vpop.f32.mrf.mxu2  ;;  %v915_v5 = vpop.f32.mrf.mxu0  ;;  %10008 = vst [vmem:[#allocation64_spill] sm:$0xff] %v6369_v18  ;;  %v4753_v18 = vld [vmem:[#allocation2 + $0x248] sm:$0xf] }
 0x11b   :  { %v5190_v2 = vpop.eup %5189  ;;  %v6364_v44 = vadd.f32 %v1251_v6, %v1083_v8  ;;  %v1084_v60 = vpop.f32.mrf.mxu1  ;;  %v916_v49 = vadd.f32 %v6129_v9, %v915_v5  ;;  %v1650_v8 = vmul.f32 %v6340_v55, %v1649_v57  ;;  %v4649_v6 = vld [vmem:[#allocation2 + $0x180] sm:$0xf]  ;;  %v4657_v5 = vld [vmem:[#allocation2 + $0x188] sm:$0xf]  ;;  %v4754_v15 = vor.u32 %v5073_v42, %v4753_v18 }
 0x11c   :  { %3130 = vrot.lane.b32.xlu2 %v5190_v2, %s5693_s11  ;;  %v6377_v27 = vpop.eup %5191  ;;  %v5048_v2 = vld [vmem:[#allocation2 + $0x188] sm:$0xf0]  ;;  %v6399_v62 = vpop.permute.xlu0 %2904  ;;  %v4658_v38 = vor.u32 %v5049_v41, %v4657_v5 }
 0x11d   :  { %5193 = vtanh.f32 %v6364_v44  ;;  %v1085_v57 = vadd.f32 %v1084_v60, %v916_v49  ;;  %v1663_v22 = vmul.f32 %v6377_v27, %v6350_v3  ;;  %v1651_v61 = vadd.f32 %v6340_v55, %v1650_v8  ;;  %10013 = vst [vmem:[#allocation67_spill] sm:$0xff] %v6399_v62  ;;  %v3107_v18 = vpop.permute.xlu2 %3106 }
 0x11e   :  { %5195 = vrcp.f32 %v6366_v51  ;;  %v1640_v60 = vsel %vm6392_vm3, %v6336_v52, %v1636_v47  ;;  %v4650_v49 = vor.u32 %v5048_v2, %v4649_v6  ;;  %v1656_v8 = vand.u32 2147483647, %v6317_v13  ;;  %v4669_v52 = vld [vmem:[#allocation2 + $0x1a0] sm:$0xf] }
 0x11f   :  { %5197 = vpow2.f32 %v4940_v39  ;;  %v1664_v41 = vsub.f32 1.0, %v1663_v22  ;;  %v1659_v39 = vor.u32 1.1754944e-38, %v1658_v32  ;;  %v999_v22 = vadd.f32 %v6129_v9, %v6156_v43 }
 0x120   :  { %v6388_v14 = vpop.f32.mrf.mxu3  ;;  %5199 = vrcp.f32 %v6379_v53  ;;  %vm1657_vm7 = vcmp.eq.f32.partialorder %v1656_v8, 8.507059e+37  ;;  %v4942_v6 = vmul.f32 -1.442695, %v6253_v7  ;;  %vm1668_vm8 = vweird.f32 %v6377_v27 }
 0x121   :  { %10010 = vst [vmem:[#allocation66_spill] sm:$0xff] %v6388_v14  ;;  %vm6456_vm10 = vmor %vm1667_vm9, %vm1668_vm8  ;;  %v1673_v8 = vand.u32 2147483648, %v6350_v3 }
 0x122   :  { %v1253_v29 = vpop.f32.mrf.mxu2  ;;  %v918_v34 = vpop.f32.mrf.mxu0 }
 0x123   :  { %v5194_v45 = vpop.eup %5193  ;;  %v6404_v46 = vadd.f32 %v1253_v29, %v1085_v57  ;;  %v919_v62 = vadd.f32 %v6129_v9, %v918_v34  ;;  %v1087_v21 = vpop.f32.mrf.mxu1  ;;  %v1655_v34 = vsel %vm6413_vm5, %v6340_v55, %v1651_v61 }
 0x124   :  { %3132 = vrot.lane.b32.xlu0 %v5194_v45, %s5693_s11  ;;  %v6418_v29 = vpop.eup %5195  ;;  %v6424_v45 = vsel %vm1642_vm6, %v1644_v35, %v1640_v60  ;;  %v6429_v10 = vsel %vm1657_vm7, %v1659_v39, %v1655_v34  ;;  %v1665_v35 = vmul.f32 %v6377_v27, %v1664_v41  ;;  %v6448_v32 = vpop.permute.xlu0 %2910  ;;  %v4765_v41 = vld [vmem:[#allocation2 + $0x260] sm:$0xf]  ;;  %v4661_v34 = vld [vmem:[#allocation2 + $0x198] sm:$0xf]  ;;  %v1001_v39 = vadd.f32 %v6129_v9, %v6174_v1 }
 0x125   :  { %5201 = vtanh.f32 %v6404_v46  ;;  %957 = vmatmul.bf16.gmra.mxu0 %v4650_v49  ;;  %1335 = vmatmul.bf16.vlgmr.msra.gmra.mxu3 %v4754_v15  ;;  %v1088_v42 = vadd.f32 %v1087_v21, %v919_v62  ;;  %v5198_v0 = vpop.eup %5197  ;;  %v1678_v15 = vmul.f32 %v6418_v29, %v6366_v51  ;;  %10017 = vst [vmem:[#allocation69_spill] sm:$0xff] %v6448_v32  ;;  %v1688_v49 = vand.u32 2147483648, %v6366_v51 }
 0x126   :  { %v3105_v13 = vpop.permute.xlu1 %3104  ;;  %1126 = vmatmul.bf16.gmra.mxu1 %v4654_v58  ;;  %v6435_v21 = vpop.eup %5199  ;;  %5203 = vpow2.f32 %v4941_v16  ;;  %v3297_v58 = vmul.f32 %v3107_v18, %v6429_v10  ;;  %v6444_v17 = vadd.f32 1.0, %v5198_v0  ;;  %v1666_v57 = vadd.f32 %v6377_v27, %v1665_v35  ;;  %v5076_v16 = vld [vmem:[#allocation2 + $0x268] sm:$0xf0] }
 0x127   :  { %v3296_v47 = vmul.f32 %v3105_v13, %v6424_v45  ;;  %1295 = vmatmul.bf16.gmra.mxu2 %v4658_v38  ;;  %v1679_v61 = vsub.f32 1.0, %v1678_v15  ;;  %v1693_v60 = vmul.f32 %v6435_v21, %v6379_v53  ;;  %v5051_v13 = vld [vmem:[#allocation2 + $0x1a0] sm:$0xf0]  ;;  %v1671_v15 = vand.u32 2147483647, %v6350_v3 }
 0x128   :  { %v1167_v55 = vpop.f32.mrf.mxu3  ;;  %v1670_v35 = vsel %vm6456_vm10, %v6377_v27, %v1666_v57  ;;  %v4766_v1 = vor.u32 %v5076_v16, %v4765_v41  ;;  %v1674_v3 = vor.u32 1.1754944e-38, %v1673_v8  ;;  %vm1683_vm12 = vweird.f32 %v6418_v29 }
 0x129   :  { %3424 = vrot.lane.b32.xlu2 %v3296_v47, %s5693_s11  ;;  %v6438_v38 = vadd.f32 %v1167_v55, %v999_v22  ;;  %v5050_v47 = vld [vmem:[#allocation2 + $0x19c] sm:$0xf]  ;;  %v4663_v22 = vld [vmem:[#allocation2 + $0x1a4] sm:$0xf0]  ;;  %vm1672_vm11 = vcmp.eq.f32.partialorder %v1671_v15, 8.507059e+37  ;;  %vm1698_vm14 = vweird.f32 %v6435_v21  ;;  %vm6506_vm15 = vmor %vm1682_vm13, %vm1683_vm12  ;;  %vm1712_vm5 = vweird.f32 %v6444_v17 }
 0x12a   :  { %v1256_v62 = vpop.f32.mrf.mxu2  ;;  %v920_v40 = vpop.f32.mrf.mxu0  ;;  %v4666_v11 = vor.u32 %v5050_v47, %v4663_v22  ;;  %v4943_v8 = vmul.f32 -1.442695, %v6266_v25  ;;  %v1701_v47 = vand.u32 2147483647, %v6379_v53  ;;  %v1703_v22 = vand.u32 2147483648, %v6379_v53  ;;  %vm6531_vm3 = vmor %vm1697_vm1, %vm1698_vm14 }
 0x12b   :  { %10016 = vst [vmem:[#allocation68_spill] sm:$0xff] %v6438_v38  ;;  %v5202_v43 = vpop.eup %5201  ;;  %v6441_v2 = vadd.f32 %v1256_v62, %v1088_v42  ;;  %v1089_v5 = vpop.f32.mrf.mxu1  ;;  %v921_v7 = vadd.f32 %v6129_v9, %v920_v40  ;;  %v5052_v42 = vld [vmem:[#allocation2 + $0x1a8] sm:$0xf0]  ;;  %v1694_v62 = vsub.f32 1.0, %v1693_v60  ;;  %v4662_v40 = vor.u32 %v5051_v13, %v4661_v34  ;;  %v6539_v53 = vld [vmem:[%s9825_s2] ss:$0 sm:$0xff] }
 0x12c   :  { %3426 = vrot.lane.b32.xlu0 %v3297_v58, %s5693_s11  ;;  %3134 = vrot.lane.b32.xlu1 %v5202_v43, %s5693_s11  ;;  %v5204_v18 = vpop.eup %5203  ;;  %v1680_v58 = vmul.f32 %v6418_v29, %v1679_v61  ;;  %v1686_v60 = vand.u32 2147483647, %v6366_v51  ;;  %v6483_v34 = vsel %vm1672_vm11, %v1674_v3, %v1670_v35  ;;  %vm6521_vm2 = vcmp.eq.f32.partialorder %v1701_v47, 8.507059e+37  ;;  %v5055_v47 = vld [vmem:[#allocation2 + $0x1c0] sm:$0xf0] }
 0x12d   :  { %5205 = vtanh.f32 %v6441_v2  ;;  %v1090_v0 = vadd.f32 %v1089_v5, %v921_v7  ;;  %v6471_v38 = vadd.f32 1.0, %v5204_v18  ;;  %v4670_v7 = vor.u32 %v5052_v42, %v4669_v52 }
 0x12e   :  { %5207 = vpow2.f32 %v4942_v6  ;;  %v1695_v16 = vmul.f32 %v6435_v21, %v1694_v62  ;;  %vm6510_vm0 = vcmp.eq.f32.partialorder %v1686_v60, 8.507059e+37 }
 0x12f   :  { %5209 = vrcp.f32 %v6444_v17  ;;  %vm1727_vm9 = vweird.f32 %v6471_v38 }
 0x130   :  { %v1169_v55 = vpop.f32.mrf.mxu3 }
 0x131   :  { %v6469_v43 = vadd.f32 %v1169_v55, %v1001_v39  ;;  %v1004_v39 = vadd.f32 %v6129_v9, %v6188_v31  ;;  %v1696_v55 = vadd.f32 %v6435_v21, %v1695_v16  ;;  %v4681_v16 = vld [vmem:[#allocation2 + $0x1b8] sm:$0xf] }
 0x132   :  { %v1258_v6 = vpop.f32.mrf.mxu2  ;;  %v923_v5 = vpop.f32.mrf.mxu0 }
 0x133   :  { %v5206_v32 = vpop.eup %5205  ;;  %v6473_v14 = vadd.f32 %v1258_v6, %v1090_v0  ;;  %v924_v27 = vadd.f32 %v6129_v9, %v923_v5  ;;  %v1092_v57 = vpop.f32.mrf.mxu1  ;;  %v1689_v6 = vor.u32 1.1754944e-38, %v1688_v49 }
 0x134   :  { %3136 = vrot.lane.b32.xlu2 %v5206_v32, %s5693_s11  ;;  %v5208_v61 = vpop.eup %5207  ;;  %v1681_v32 = vadd.f32 %v6418_v29, %v1680_v58 }
 0x135   :  { %5211 = vtanh.f32 %v6473_v14  ;;  %v6480_v41 = vpop.eup %5209  ;;  %1340 = vmatmul.bf16.gmra.mxu3 %v4766_v1  ;;  %962 = vmatmul.bf16.gmra.mxu0 %v4662_v40  ;;  %v1093_v13 = vadd.f32 %v1092_v57, %v924_v27  ;;  %v6492_v42 = vadd.f32 1.0, %v5208_v61  ;;  %v1704_v40 = vor.u32 1.1754944e-38, %v1703_v22  ;;  %v5053_v22 = vld [vmem:[#allocation2 + $0x1b4] sm:$0xf] }
 0x136   :  { %v3109_v52 = vpop.permute.xlu0 %3108  ;;  %5213 = vrcp.f32 %v6471_v38  ;;  %1131 = vmatmul.bf16.gmra.mxu1 %v4666_v11  ;;  %v1708_v25 = vmul.f32 %v6480_v41, %v6444_v17  ;;  %v1685_v62 = vsel %vm6506_vm15, %v6418_v29, %v1681_v32  ;;  %v4944_v27 = vmul.f32 -1.442695, %v6277_v12  ;;  %v3113_v32 = vpop.permute.xlu2 %3112 }
 0x137   :  { %v3298_v18 = vmul.f32 %v3109_v52, %v6483_v34  ;;  %1300 = vmatmul.bf16.gmra.mxu2 %v4670_v7  ;;  %5215 = vpow2.f32 %v4943_v8  ;;  %v4945_v61 = vmul.f32 -1.442695, %v6292_v48  ;;  %v1700_v12 = vsel %vm6531_vm3, %v6435_v21, %v1696_v55  ;;  %v4777_v52 = vld [vmem:[#allocation2 + $0x278] sm:$0xf] }
 0x138   :  { %v1172_v0 = vpop.f32.mrf.mxu3  ;;  %5217 = vrcp.f32 %v6492_v42  ;;  %v1709_v3 = vsub.f32 1.0, %v1708_v25  ;;  %v6548_v60 = vsel %vm6510_vm0, %v1689_v6, %v1685_v62  ;;  %v1006_v48 = vadd.f32 %v6539_v53, %v6199_v59 }
 0x139   :  { %3428 = vrot.lane.b32.xlu1 %v3298_v18, %s5693_s11  ;;  %v6502_v11 = vadd.f32 %v1172_v0, %v1004_v39  ;;  %v4673_v18 = vld [vmem:[#allocation2 + $0x1b0] sm:$0xf]  ;;  %v5054_v39 = vld [vmem:[#allocation2 + $0x1b8] sm:$0xf0]  ;;  %v4675_v0 = vld [vmem:[#allocation2 + $0x1bc] sm:$0xf0]  ;;  %v6557_v55 = vsel %vm6521_vm2, %v1704_v40, %v1700_v12  ;;  %vm1713_vm4 = vweird.f32 %v6480_v41  ;;  %vm1742_vm12 = vweird.f32 %v6492_v42 }
 0x13a   :  { %v1261_v9 = vpop.f32.mrf.mxu2  ;;  %v925_v58 = vpop.f32.mrf.mxu0  ;;  %10028 = vst [vmem:[#allocation70_spill] sm:$0xff] %v6557_v55  ;;  %v1710_v35 = vmul.f32 %v6480_v41, %v1709_v3  ;;  %v3300_v59 = vmul.f32 %v3113_v32, %v6557_v55  ;;  %v4674_v29 = vor.u32 %v5054_v39, %v4673_v18  ;;  %v1009_v18 = vadd.f32 %v6539_v53, %v6212_v33  ;;  %vm6588_vm6 = vmor %vm1712_vm5, %vm1713_vm4 }
 0x13b   :  { %v5212_v51 = vpop.eup %5211  ;;  %v6514_v15 = vadd.f32 %v1261_v9, %v1093_v13  ;;  %v1094_v5 = vpop.f32.mrf.mxu1  ;;  %v926_v57 = vadd.f32 %v6539_v53, %v925_v58  ;;  %v5079_v13 = vld [vmem:[#allocation2 + $0x280] sm:$0xf0] }
 0x13c   :  { %3138 = vrot.lane.b32.xlu0 %v5212_v51, %s5693_s11  ;;  %v6526_v7 = vpop.eup %5213  ;;  %v4778_v6 = vor.u32 %v5079_v13, %v4777_v52  ;;  %v1718_v13 = vand.u32 2147483648, %v6444_v17 }
 0x13d   :  { %5219 = vtanh.f32 %v6514_v15  ;;  %v1723_v21 = vmul.f32 %v6526_v7, %v6471_v38  ;;  %v5216_v25 = vpop.eup %5215  ;;  %v1095_v9 = vadd.f32 %v1094_v5, %v926_v57  ;;  %v4682_v5 = vor.u32 %v5055_v47, %v4681_v16 }
 0x13e   :  { %v3111_v49 = vpop.permute.xlu1 %3110  ;;  %v6561_v51 = vpop.eup %5217  ;;  %5221 = vpow2.f32 %v4944_v27  ;;  %v4678_v57 = vor.u32 %v5053_v22, %v4675_v0  ;;  %v6568_v12 = vadd.f32 1.0, %v5216_v25  ;;  %v1716_v16 = vand.u32 2147483647, %v6444_v17 }
 0x13f   :  { %v3299_v8 = vmul.f32 %v3111_v49, %v6548_v60  ;;  %5223 = vpow2.f32 %v4945_v61  ;;  %v1724_v32 = vsub.f32 1.0, %v1723_v21  ;;  %v1738_v27 = vmul.f32 %v6561_v51, %v6492_v42 }
 0x140   :  { %v1174_v31 = vpop.f32.mrf.mxu3  ;;  %v1711_v61 = vadd.f32 %v6480_v41, %v1710_v35  ;;  %vm6592_vm7 = vcmp.eq.f32.partialorder %v1716_v16, 8.507059e+37  ;;  %vm1728_vm8 = vweird.f32 %v6526_v7  ;;  %v1748_v16 = vand.u32 2147483648, %v6492_v42 }
 0x141   :  { %3430 = vrot.lane.b32.xlu2 %v3299_v8, %s5693_s11  ;;  %v6564_v58 = vadd.f32 %v1174_v31, %v1006_v48  ;;  %v1725_v39 = vmul.f32 %v6526_v7, %v1724_v32  ;;  %v1733_v48 = vand.u32 2147483648, %v6471_v38  ;;  %v1739_v21 = vsub.f32 1.0, %v1738_v27  ;;  %vm6623_vm10 = vmor %vm1727_vm9, %vm1728_vm8 }
 0x142   :  { %v1263_v62 = vpop.f32.mrf.mxu2  ;;  %v928_v40 = vpop.f32.mrf.mxu0  ;;  %v1715_v17 = vsel %vm6588_vm6, %v6480_v41, %v1711_v61  ;;  %v4693_v61 = vld [vmem:[#allocation2 + $0x1d0] sm:$0xf]  ;;  %vm1743_vm11 = vweird.f32 %v6561_v51  ;;  %vm1757_vm1 = vweird.f32 %v6568_v12 }
 0x143   :  { %10029 = vst [vmem:[#allocation71_spill] sm:$0xff] %v6564_v58  ;;  %v5220_v49 = vpop.eup %5219  ;;  %v6566_v1 = vadd.f32 %v1263_v62, %v1095_v9  ;;  %v929_v3 = vadd.f32 %v6539_v53, %v928_v40  ;;  %v1097_v8 = vpop.f32.mrf.mxu1  ;;  %v1731_v40 = vand.u32 2147483647, %v6471_v38  ;;  %v1740_v27 = vmul.f32 %v6561_v51, %v1739_v21  ;;  %v5056_v21 = vld [vmem:[#allocation2 + $0x1cc] sm:$0xf]  ;;  %vm6650_vm13 = vmor %vm1742_vm12, %vm1743_vm11 }
 0x144   :  { %3432 = vrot.lane.b32.xlu0 %v3300_v59, %s5693_s11  ;;  %3140 = vrot.lane.b32.xlu1 %v5220_v49, %s5693_s11  ;;  %v5222_v47 = vpop.eup %5221  ;;  %v1726_v49 = vadd.f32 %v6526_v7, %v1725_v39  ;;  %v5082_v39 = vld [vmem:[#allocation2 + $0x298] sm:$0xf0] }
 0x145   :  { %5225 = vtanh.f32 %v6566_v1  ;;  %1345 = vmatmul.bf16.gmra.mxu3 %v4778_v6  ;;  %967 = vmatmul.bf16.gmra.mxu0 %v4674_v29  ;;  %v1098_v52 = vadd.f32 %v1097_v8, %v929_v3  ;;  %v5224_v0 = vpop.eup %5223  ;;  %v1719_v6 = vor.u32 1.1754944e-38, %v1718_v13  ;;  %v4946_v3 = vmul.f32 -1.442695, %v6305_v4  ;;  %v4789_v13 = vld [vmem:[#allocation2 + $0x290] sm:$0xf] }
 0x146   :  { %1136 = vmatmul.bf16.gmra.mxu1 %v4678_v57  ;;  %5227 = vrcp.f32 %v6568_v12  ;;  %v6606_v57 = vadd.f32 1.0, %v5222_v47  ;;  %v6613_v32 = vadd.f32 1.0, %v5224_v0  ;;  %v5057_v47 = vld [vmem:[#allocation2 + $0x1d0] sm:$0xf0]  ;;  %v5058_v0 = vld [vmem:[#allocation2 + $0x1d8] sm:$0xf0] }
 0x147   :  { %1305 = vmatmul.bf16.gmra.mxu2 %v4682_v5  ;;  %v1734_v5 = vor.u32 1.1754944e-38, %v1733_v48  ;;  %v6619_v38 = vsel %vm6592_vm7, %v1719_v6, %v1715_v17  ;;  %v4685_v48 = vld [vmem:[#allocation2 + $0x1c8] sm:$0xf]  ;;  %vm1732_vm14 = vcmp.eq.f32.partialorder %v1731_v40, 8.507059e+37  ;;  %v1014_v40 = vadd.f32 %v6539_v53, %v6238_v56 }
 0x148   :  { %v1177_v22 = vpop.f32.mrf.mxu3  ;;  %10035 = vst [vmem:[#allocation73_spill] sm:$0xff] %v6619_v38  ;;  %vm1772_vm5 = vweird.f32 %v6606_v57  ;;  %vm1787_vm9 = vweird.f32 %v6613_v32 }
 0x149   :  { %v6586_v25 = vadd.f32 %v1177_v22, %v1009_v18  ;;  %v1011_v22 = vadd.f32 %v6539_v53, %v6225_v19  ;;  %v1741_v19 = vadd.f32 %v6561_v51, %v1740_v27 }
 0x14a   :  { %v1266_v9 = vpop.f32.mrf.mxu2  ;;  %v930_v62 = vpop.f32.mrf.mxu0 }
 0x14b   :  { %10030 = vst [vmem:[#allocation72_spill] sm:$0xff] %v6586_v25  ;;  %v5226_v35 = vpop.eup %5225  ;;  %v6596_v59 = vadd.f32 %v1266_v9, %v1098_v52  ;;  %v1099_v29 = vpop.f32.mrf.mxu1  ;;  %v931_v41 = vadd.f32 %v6539_v53, %v930_v62  ;;  %v4687_v9 = vld [vmem:[#allocation2 + $0x1d4] sm:$0xf0]  ;;  %v4686_v25 = vor.u32 %v5057_v47, %v4685_v48 }
 0x14c   :  { %3142 = vrot.lane.b32.xlu2 %v5226_v35, %s5693_s11  ;;  %v6611_v8 = vpop.eup %5227  ;;  %v1730_v35 = vsel %vm6623_vm10, %v6526_v7, %v1726_v49  ;;  %v1746_v7 = vand.u32 2147483647, %v6492_v42  ;;  %v3119_v48 = vpop.permute.xlu2 %3118 }
 0x14d   :  { %5229 = vtanh.f32 %v6596_v59  ;;  %v1100_v31 = vadd.f32 %v1099_v29, %v931_v41  ;;  %v1753_v62 = vmul.f32 %v6611_v8, %v6568_v12  ;;  %v6658_v42 = vsel %vm1732_vm14, %v1734_v5, %v1730_v35 }
 0x14e   :  { %v3115_v52 = vpop.permute.xlu0 %3114  ;;  %5231 = vrcp.f32 %v6606_v57  ;;  %10041 = vst [vmem:[#allocation75_spill] sm:$0xff] %v6658_v42  ;;  %vm1747_vm15 = vcmp.eq.f32.partialorder %v1746_v7, 8.507059e+37  ;;  %vm1758_vm0 = vweird.f32 %v6611_v8  ;;  %v1763_v7 = vand.u32 2147483648, %v6568_v12 }
 0x14f   :  { %v3301_v18 = vmul.f32 %v3115_v52, %v6619_v38  ;;  %v4790_v52 = vor.u32 %v5082_v39, %v4789_v13  ;;  %5233 = vpow2.f32 %v4946_v3  ;;  %v4690_v38 = vor.u32 %v5056_v21, %v4687_v9  ;;  %vm6691_vm2 = vmor %vm1757_vm1, %vm1758_vm0 }
 0x150   :  { %v1179_v33 = vpop.f32.mrf.mxu3  ;;  %5235 = vrcp.f32 %v6613_v32  ;;  %v1754_v4 = vsub.f32 1.0, %v1753_v62  ;;  %v1749_v39 = vor.u32 1.1754944e-38, %v1748_v16 }
 0x151   :  { %3434 = vrot.lane.b32.xlu1 %v3301_v18, %s5693_s11  ;;  %v6639_v17 = vadd.f32 %v1179_v33, %v1011_v22  ;;  %v4694_v18 = vor.u32 %v5058_v0, %v4693_v61  ;;  %v1745_v61 = vsel %vm6650_vm13, %v6561_v51, %v1741_v19  ;;  %v4947_v0 = vmul.f32 -1.442695, %v6324_v54 }
 0x152   :  { %v1268_v6 = vpop.f32.mrf.mxu2  ;;  %v933_v41 = vpop.f32.mrf.mxu0  ;;  %v6666_v5 = vsel %vm1747_vm15, %v1749_v39, %v1745_v61  ;;  %v1755_v16 = vmul.f32 %v6611_v8, %v1754_v4  ;;  %v4948_v33 = vmul.f32 -1.442695, %v6346_v30  ;;  %v5085_v4 = vld [vmem:[#allocation2 + $0x2b0] sm:$0xf0]  ;;  %v4697_v61 = vld [vmem:[#allocation2 + $0x1e0] sm:$0xf]  ;;  %v1016_v39 = vadd.f32 %v6539_v53, %v6251_v26 }
 0x153   :  { %10038 = vst [vmem:[#allocation74_spill] sm:$0xff] %v6639_v17  ;;  %v5230_v58 = vpop.eup %5229  ;;  %v6641_v29 = vadd.f32 %v1268_v6, %v1100_v31  ;;  %v934_v49 = vadd.f32 %v6539_v53, %v933_v41  ;;  %v1102_v27 = vpop.f32.mrf.mxu1  ;;  %v3303_v9 = vmul.f32 %v3119_v48, %v6666_v5  ;;  %v5061_v48 = vld [vmem:[#allocation2 + $0x1f0] sm:$0xf0] }
 0x154   :  { %3144 = vrot.lane.b32.xlu0 %v5230_v58, %s5693_s11  ;;  %v6660_v58 = vpop.eup %5231  ;;  %10042 = vst [vmem:[#allocation76_spill] sm:$0xff] %v6666_v5  ;;  %v1756_v41 = vadd.f32 %v6611_v8, %v1755_v16 }
 0x155   :  { %5237 = vtanh.f32 %v6641_v29  ;;  %1350 = vmatmul.bf16.gmra.mxu3 %v4790_v52  ;;  %972 = vmatmul.bf16.gmra.mxu0 %v4686_v25  ;;  %v1103_v47 = vadd.f32 %v1102_v27, %v934_v49  ;;  %v5234_v51 = vpop.eup %5233  ;;  %v1768_v56 = vmul.f32 %v6660_v58, %v6606_v57  ;;  %v4705_v49 = vld [vmem:[#allocation2 + $0x1e8] sm:$0xf]  ;;  %vm1773_vm4 = vweird.f32 %v6660_v58 }
 0x156   :  { %v3117_v13 = vpop.permute.xlu1 %3116  ;;  %1141 = vmatmul.bf16.gmra.mxu1 %v4690_v38  ;;  %v6670_v21 = vpop.eup %5235  ;;  %v6681_v19 = vadd.f32 1.0, %v5234_v51  ;;  %5239 = vpow2.f32 %v4947_v0  ;;  %v4801_v27 = vld [vmem:[#allocation2 + $0x2a8] sm:$0xf]  ;;  %v1760_v51 = vsel %vm6691_vm2, %v6611_v8, %v1756_v41  ;;  %v4706_v17 = vor.u32 %v5061_v48, %v4705_v49  ;;  %vm6741_vm7 = vmor %vm1772_vm5, %vm1773_vm4 }
 0x157   :  { %v3302_v22 = vmul.f32 %v3117_v13, %v6658_v42  ;;  %1310 = vmatmul.bf16.gmra.mxu2 %v4694_v18  ;;  %v1783_v30 = vmul.f32 %v6670_v21, %v6613_v32  ;;  %v1769_v3 = vsub.f32 1.0, %v1768_v56  ;;  %v5060_v13 = vld [vmem:[#allocation2 + $0x1e8] sm:$0xf0]  ;;  %v1019_v48 = vadd.f32 %v6539_v53, %v6262_v63 }
 0x158   :  { %v1182_v25 = vpop.f32.mrf.mxu3  ;;  %v4698_v26 = vor.u32 %v5060_v13, %v4697_v61  ;;  %vm1788_vm6 = vweird.f32 %v6670_v21  ;;  %vm1802_vm13 = vweird.f32 %v6681_v19 }
 0x159   :  { %3436 = vrot.lane.b32.xlu2 %v3302_v22, %s5693_s11  ;;  %v6673_v31 = vadd.f32 %v1182_v25, %v1014_v40  ;;  %v4699_v22 = vld [vmem:[#allocation2 + $0x1ec] sm:$0xf0]  ;;  %v1761_v25 = vand.u32 2147483647, %v6568_v12  ;;  %v1764_v12 = vor.u32 1.1754944e-38, %v1763_v7  ;;  %vm6759_vm11 = vmor %vm1787_vm9, %vm1788_vm6 }
 0x15a   :  { %v1271_v38 = vpop.f32.mrf.mxu2  ;;  %v935_v62 = vpop.f32.mrf.mxu0 }
 0x15b   :  { %10043 = vst [vmem:[#allocation77_spill] sm:$0xff] %v6673_v31  ;;  %v5238_v54 = vpop.eup %5237  ;;  %v6678_v35 = vadd.f32 %v1271_v38, %v1103_v47  ;;  %v1104_v6 = vpop.f32.mrf.mxu1  ;;  %v936_v52 = vadd.f32 %v6539_v53, %v935_v62  ;;  %v5059_v47 = vld [vmem:[#allocation2 + $0x1e4] sm:$0xf]  ;;  %vm1762_vm3 = vcmp.eq.f32.partialorder %v1761_v25, 8.507059e+37 }
 0x15c   :  { %3438 = vrot.lane.b32.xlu0 %v3303_v9, %s5693_s11  ;;  %3146 = vrot.lane.b32.xlu1 %v5238_v54, %s5693_s11  ;;  %v5240_v16 = vpop.eup %5239  ;;  %v1784_v9 = vsub.f32 1.0, %v1783_v30  ;;  %v4802_v54 = vor.u32 %v5085_v4, %v4801_v27  ;;  %v1776_v30 = vand.u32 2147483647, %v6606_v57  ;;  %v6717_v61 = vsel %vm1762_vm3, %v1764_v12, %v1760_v51 }
 0x15d   :  { %5241 = vtanh.f32 %v6678_v35  ;;  %v1105_v40 = vadd.f32 %v1104_v6, %v936_v52  ;;  %v4702_v6 = vor.u32 %v5059_v47, %v4699_v22  ;;  %v1770_v52 = vmul.f32 %v6660_v58, %v1769_v3  ;;  %10046 = vst [vmem:[#allocation78_spill] sm:$0xff] %v6717_v61 }
 0x15e   :  { %5243 = vpow2.f32 %v4948_v33  ;;  %v6714_v4 = vadd.f32 1.0, %v5240_v16  ;;  %v1785_v49 = vmul.f32 %v6670_v21, %v1784_v9  ;;  %v1791_v22 = vand.u32 2147483647, %v6613_v32 }
 0x15f   :  { %5245 = vrcp.f32 %v6681_v19  ;;  %vm1777_vm8 = vcmp.eq.f32.partialorder %v1776_v30, 8.507059e+37 }
 0x160   :  { %v1184_v0 = vpop.f32.mrf.mxu3  ;;  %v1786_v63 = vadd.f32 %v6670_v21, %v1785_v49  ;;  %vm6752_vm10 = vcmp.eq.f32.partialorder %v1791_v22, 8.507059e+37  ;;  %v4717_v49 = vld [vmem:[#allocation2 + $0x200] sm:$0xf]  ;;  %vm1817_vm1 = vweird.f32 %v6714_v4 }
 0x161   :  { %v6703_v38 = vadd.f32 %v1184_v0, %v1016_v39  ;;  %v1771_v39 = vadd.f32 %v6660_v58, %v1770_v52  ;;  %v1793_v0 = vand.u32 2147483648, %v6613_v32 }
 0x162   :  { %v1273_v56 = vpop.f32.mrf.mxu2  ;;  %v938_v31 = vpop.f32.mrf.mxu0  ;;  %v1790_v12 = vsel %vm6759_vm11, %v6670_v21, %v1786_v63 }
 0x163   :  { %v5242_v33 = vpop.eup %5241  ;;  %v6705_v62 = vadd.f32 %v1273_v56, %v1105_v40  ;;  %v939_v18 = vadd.f32 %v6539_v53, %v938_v31  ;;  %v1107_v8 = vpop.f32.mrf.mxu1  ;;  %v4949_v31 = vmul.f32 -1.442695, %v6364_v44  ;;  %v1778_v40 = vand.u32 2147483648, %v6606_v57 }
 0x164   :  { %3148 = vrot.lane.b32.xlu2 %v5242_v33, %s5693_s11  ;;  %v5244_v41 = vpop.eup %5243 }
 0x165   :  { %5247 = vtanh.f32 %v6705_v62  ;;  %v6712_v27 = vpop.eup %5245  ;;  %1355 = vmatmul.bf16.gmra.mxu3 %v4802_v54  ;;  %977 = vmatmul.bf16.gmra.mxu0 %v4698_v26  ;;  %v1108_v7 = vadd.f32 %v1107_v8, %v939_v18  ;;  %v6725_v47 = vadd.f32 1.0, %v5244_v41  ;;  %v1775_v54 = vsel %vm6741_vm7, %v6660_v58, %v1771_v39  ;;  %v4709_v39 = vld [vmem:[#allocation2 + $0x1f8] sm:$0xf] }
 0x166   :  { %v3121_v3 = vpop.permute.xlu0 %3120  ;;  %1146 = vmatmul.bf16.gmra.mxu1 %v4702_v6  ;;  %5249 = vrcp.f32 %v6714_v4  ;;  %v1779_v6 = vor.u32 1.1754944e-38, %v1778_v40  ;;  %v1794_v58 = vor.u32 1.1754944e-38, %v1793_v0  ;;  %v4950_v8 = vmul.f32 -1.442695, %v6404_v46  ;;  %v5064_v40 = vld [vmem:[#allocation2 + $0x208] sm:$0xf0] }
 0x167   :  { %v3304_v13 = vmul.f32 %v3121_v3, %v6717_v61  ;;  %1315 = vmatmul.bf16.gmra.mxu2 %v4706_v17  ;;  %v1798_v17 = vmul.f32 %v6712_v27, %v6681_v19  ;;  %5251 = vpow2.f32 %v4949_v31  ;;  %v4813_v3 = vld [vmem:[#allocation2 + $0x2c0] sm:$0xf]  ;;  %v3125_v31 = vpop.permute.xlu2 %3124  ;;  %v1021_v46 = vadd.f32 %v6539_v53, %v6275_v20  ;;  %v5062_v0 = vld [vmem:[#allocation2 + $0x1fc] sm:$0xf] }
 0x168   :  { %v1187_v44 = vpop.f32.mrf.mxu3  ;;  %5253 = vrcp.f32 %v6725_v47  ;;  %v6769_v41 = vsel %vm1777_vm8, %v1779_v6, %v1775_v54  ;;  %vm1803_vm12 = vweird.f32 %v6712_v27  ;;  %vm1832_vm4 = vweird.f32 %v6725_v47 }
 0x169   :  { %3440 = vrot.lane.b32.xlu1 %v3304_v13, %s5693_s11  ;;  %v6737_v51 = vadd.f32 %v1187_v44, %v1019_v48  ;;  %v1799_v32 = vsub.f32 1.0, %v1798_v17  ;;  %10054 = vst [vmem:[#allocation80_spill] sm:$0xff] %v6769_v41  ;;  %v5088_v13 = vld [vmem:[#allocation2 + $0x2c8] sm:$0xf0]  ;;  %v5063_v48 = vld [vmem:[#allocation2 + $0x200] sm:$0xf0]  ;;  %v6778_v17 = vsel %vm6752_vm10, %v1794_v58, %v1790_v12  ;;  %v4718_v58 = vor.u32 %v5064_v40, %v4717_v49  ;;  %vm6810_vm14 = vmor %vm1802_vm13, %vm1803_vm12 }
 0x16a   :  { %v1276_v25 = vpop.f32.mrf.mxu2  ;;  %v940_v56 = vpop.f32.mrf.mxu0  ;;  %v4711_v44 = vld [vmem:[#allocation2 + $0x204] sm:$0xf0]  ;;  %10055 = vst [vmem:[#allocation81_spill] sm:$0xff] %v6778_v17  ;;  %v4814_v6 = vor.u32 %v5088_v13, %v4813_v3  ;;  %v4710_v52 = vor.u32 %v5063_v48, %v4709_v39  ;;  %v1024_v3 = vadd.f32 %v6539_v53, %v6289_v28  ;;  %v1806_v39 = vand.u32 2147483647, %v6681_v19 }
 0x16b   :  { %10047 = vst [vmem:[#allocation79_spill] sm:$0xff] %v6737_v51  ;;  %v5248_v9 = vpop.eup %5247  ;;  %v6745_v57 = vadd.f32 %v1276_v25, %v1108_v7  ;;  %v1109_v33 = vpop.f32.mrf.mxu1  ;;  %v941_v18 = vadd.f32 %v6539_v53, %v940_v56  ;;  %v1800_v16 = vmul.f32 %v6712_v27, %v1799_v32  ;;  %v3306_v56 = vmul.f32 %v3125_v31, %v6778_v17 }
 0x16c   :  { %3150 = vrot.lane.b32.xlu0 %v5248_v9, %s5693_s11  ;;  %v6772_v22 = vpop.eup %5249  ;;  %v1808_v48 = vand.u32 2147483648, %v6681_v19  ;;  %v1823_v28 = vand.u32 2147483648, %v6714_v4  ;;  %vm1807_vm15 = vcmp.eq.f32.partialorder %v1806_v39, 8.507059e+37 }
 0x16d   :  { %5255 = vtanh.f32 %v6745_v57  ;;  %v5252_v21 = vpop.eup %5251  ;;  %v1110_v63 = vadd.f32 %v1109_v33, %v941_v18  ;;  %v4714_v33 = vor.u32 %v5062_v0, %v4711_v44  ;;  %v1813_v18 = vmul.f32 %v6772_v22, %v6714_v4 }
 0x16e   :  { %v3123_v30 = vpop.permute.xlu1 %3122  ;;  %v6782_v9 = vpop.eup %5253  ;;  %v6791_v12 = vadd.f32 1.0, %v5252_v21  ;;  %5257 = vpow2.f32 %v4950_v8  ;;  %v1801_v8 = vadd.f32 %v6712_v27, %v1800_v16  ;;  %v4951_v16 = vmul.f32 -1.442695, %v6441_v2 }
 0x16f   :  { %v3305_v7 = vmul.f32 %v3123_v30, %v6769_v41  ;;  %v1828_v49 = vmul.f32 %v6782_v9, %v6725_v47  ;;  %v1814_v13 = vsub.f32 1.0, %v1813_v18  ;;  %v1838_v2 = vand.u32 2147483648, %v6725_v47 }
 0x170   :  { %v1189_v25 = vpop.f32.mrf.mxu3  ;;  %vm1818_vm0 = vweird.f32 %v6772_v22  ;;  %vm1833_vm2 = vweird.f32 %v6782_v9  ;;  %vm1847_vm9 = vweird.f32 %v6791_v12 }
 0x171   :  { %3442 = vrot.lane.b32.xlu2 %v3305_v7, %s5693_s11  ;;  %v6785_v54 = vadd.f32 %v1189_v25, %v1021_v46  ;;  %v1829_v0 = vsub.f32 1.0, %v1828_v49  ;;  %v1815_v19 = vmul.f32 %v6772_v22, %v1814_v13  ;;  %vm6850_vm3 = vmor %vm1817_vm1, %vm1818_vm0 }
 0x172   :  { %v1278_v20 = vpop.f32.mrf.mxu2  ;;  %v943_v26 = vpop.f32.mrf.mxu0  ;;  %vm6865_vm5 = vmor %vm1832_vm4, %vm1833_vm2 }
 0x173   :  { %v5256_v30 = vpop.eup %5255  ;;  %v6787_v51 = vadd.f32 %v1278_v20, %v1110_v63  ;;  %v944_v32 = vadd.f32 %v6539_v53, %v943_v26  ;;  %v1112_v31 = vpop.f32.mrf.mxu1  ;;  %v1821_v26 = vand.u32 2147483647, %v6714_v4  ;;  %v1816_v39 = vadd.f32 %v6772_v22, %v1815_v19 }
 0x174   :  { %3444 = vrot.lane.b32.xlu0 %v3306_v56, %s5693_s11  ;;  %3152 = vrot.lane.b32.xlu1 %v5256_v30, %s5693_s11  ;;  %v5258_v40 = vpop.eup %5257  ;;  %v1809_v30 = vor.u32 1.1754944e-38, %v1808_v48  ;;  %v5091_v48 = vld [vmem:[#allocation2 + $0x2e0] sm:$0xf0] }
 0x175   :  { %5259 = vtanh.f32 %v6787_v51  ;;  %1360 = vmatmul.bf16.gmra.mxu3 %v4814_v6  ;;  %982 = vmatmul.bf16.gmra.mxu0 %v4710_v52  ;;  %v1113_v7 = vadd.f32 %v1112_v31, %v944_v32  ;;  %v1805_v6 = vsel %vm6810_vm14, %v6712_v27, %v1801_v8  ;;  %v4952_v27 = vmul.f32 -1.442695, %v6473_v14  ;;  %v4825_v8 = vld [vmem:[#allocation2 + $0x2d8] sm:$0xf] }
 0x176   :  { %1151 = vmatmul.bf16.gmra.mxu1 %v4714_v33  ;;  %5261 = vrcp.f32 %v6791_v12  ;;  %v6823_v33 = vadd.f32 1.0, %v5258_v40  ;;  %v1830_v31 = vmul.f32 %v6782_v9, %v1829_v0  ;;  %v1026_v14 = vadd.f32 %v6539_v53, %v6303_v36  ;;  %v5067_v40 = vld [vmem:[#allocation2 + $0x220] sm:$0xf0]  ;;  %v5065_v0 = vld [vmem:[#allocation2 + $0x214] sm:$0xf] }
 0x177   :  { %1320 = vmatmul.bf16.gmra.mxu2 %v4718_v58  ;;  %v1824_v58 = vor.u32 1.1754944e-38, %v1823_v28  ;;  %v4721_v28 = vld [vmem:[#allocation2 + $0x210] sm:$0xf]  ;;  %v4826_v19 = vor.u32 %v5091_v48, %v4825_v8  ;;  %vm1822_vm6 = vcmp.eq.f32.partialorder %v1821_v26, 8.507059e+37  ;;  %v1029_v26 = vadd.f32 %v6539_v53, %v6322_v50 }
 0x178   :  { %v1192_v46 = vpop.f32.mrf.mxu3  ;;  %vm1862_vm13 = vweird.f32 %v6823_v33 }
 0x179   :  { %v6808_v44 = vadd.f32 %v1192_v46, %v1024_v3  ;;  %v6832_v3 = vsel %vm1807_vm15, %v1809_v30, %v1805_v6  ;;  %v5066_v46 = vld [vmem:[#allocation2 + $0x218] sm:$0xf0] }
 0x17a   :  { %v1281_v21 = vpop.f32.mrf.mxu2  ;;  %v945_v20 = vpop.f32.mrf.mxu0  ;;  %10059 = vst [vmem:[#allocation83_spill] sm:$0xff] %v6832_v3  ;;  %v4722_v30 = vor.u32 %v5066_v46, %v4721_v28  ;;  %v1839_v28 = vor.u32 1.1754944e-38, %v1838_v2 }
 0x17b   :  { %10056 = vst [vmem:[#allocation82_spill] sm:$0xff] %v6808_v44  ;;  %v5260_v25 = vpop.eup %5259  ;;  %v6815_v56 = vadd.f32 %v1281_v21, %v1113_v7  ;;  %v1114_v52 = vpop.f32.mrf.mxu1  ;;  %v946_v18 = vadd.f32 %v6539_v53, %v945_v20  ;;  %v4729_v7 = vld [vmem:[#allocation2 + $0x218] sm:$0xf]  ;;  %v4723_v21 = vld [vmem:[#allocation2 + $0x21c] sm:$0xf0]  ;;  %v1831_v20 = vadd.f32 %v6782_v9, %v1830_v31 }
 0x17c   :  { %3154 = vrot.lane.b32.xlu2 %v5260_v25, %s5693_s11  ;;  %v6828_v32 = vpop.eup %5261  ;;  %v4730_v31 = vor.u32 %v5067_v40, %v4729_v7  ;;  %v3131_v46 = vpop.permute.xlu2 %3130 }
 0x17d   :  { %5263 = vtanh.f32 %v6815_v56  ;;  %v1115_v63 = vadd.f32 %v1114_v52, %v946_v18  ;;  %vm1848_vm8 = vweird.f32 %v6828_v32 }
 0x17e   :  { %v3127_v49 = vpop.permute.xlu0 %3126  ;;  %5265 = vpow2.f32 %v4951_v16  ;;  %v1843_v16 = vmul.f32 %v6828_v32, %v6791_v12  ;;  %vm6905_vm10 = vmor %vm1847_vm9, %vm1848_vm8 }
 0x17f   :  { %v3307_v13 = vmul.f32 %v3127_v49, %v6832_v3  ;;  %5267 = vrcp.f32 %v6823_v33 }
 0x180   :  { %v1194_v25 = vpop.f32.mrf.mxu3  ;;  %5269 = vpow2.f32 %v4952_v27 }
 0x181   :  { %3446 = vrot.lane.b32.xlu1 %v3307_v13, %s5693_s11  ;;  %v6846_v6 = vadd.f32 %v1194_v25, %v1026_v14  ;;  %v1820_v13 = vsel %vm6850_vm3, %v6772_v22, %v1816_v39  ;;  %v4726_v14 = vor.u32 %v5065_v0, %v4723_v21  ;;  %v1836_v25 = vand.u32 2147483647, %v6725_v47 }
 0x182   :  { %v1283_v36 = vpop.f32.mrf.mxu2  ;;  %v948_v49 = vpop.f32.mrf.mxu0  ;;  %v1844_v22 = vsub.f32 1.0, %v1843_v16  ;;  %v1835_v47 = vsel %vm6865_vm5, %v6782_v9, %v1831_v20  ;;  %v6873_v27 = vsel %vm1822_vm6, %v1824_v58, %v1820_v13 }
 0x183   :  { %10060 = vst [vmem:[#allocation84_spill] sm:$0xff] %v6846_v6  ;;  %v5264_v52 = vpop.eup %5263  ;;  %v6854_v18 = vadd.f32 %v1283_v36, %v1115_v63  ;;  %v949_v6 = vadd.f32 %v6539_v53, %v948_v49  ;;  %v1117_v44 = vpop.f32.mrf.mxu1  ;;  %vm1837_vm7 = vcmp.eq.f32.partialorder %v1836_v25, 8.507059e+37  ;;  %v4741_v25 = vld [vmem:[#allocation2 + $0x230] sm:$0xf] }
 0x184   :  { %3156 = vrot.lane.b32.xlu0 %v5264_v52, %s5693_s11  ;;  %v5266_v8 = vpop.eup %5265  ;;  %10065 = vst [vmem:[#allocation85_spill] sm:$0xff] %v6873_v27  ;;  %v6882_v9 = vsel %vm1837_vm7, %v1839_v28, %v1835_v47  ;;  %v1845_v63 = vmul.f32 %v6828_v32, %v1844_v22  ;;  %v4953_v52 = vmul.f32 -1.442695, %v6514_v15  ;;  %v5094_v22 = vld [vmem:[#allocation2 + $0x2f8] sm:$0xf0]  ;;  %v1031_v15 = vadd.f32 %v6539_v53, %v6338_v24 }
 0x185   :  { %5271 = vtanh.f32 %v6854_v18  ;;  %1365 = vmatmul.bf16.gmra.mxu3 %v4826_v19  ;;  %987 = vmatmul.bf16.gmra.mxu0 %v4722_v30  ;;  %v6875_v39 = vpop.eup %5267  ;;  %v1118_v40 = vadd.f32 %v1117_v44, %v949_v6  ;;  %v6880_v21 = vadd.f32 1.0, %v5266_v8  ;;  %10066 = vst [vmem:[#allocation86_spill] sm:$0xff] %v6882_v9  ;;  %v3309_v44 = vmul.f32 %v3131_v46, %v6882_v9  ;;  %v4837_v8 = vld [vmem:[#allocation2 + $0x2f0] sm:$0xf]  ;;  %v4733_v47 = vld [vmem:[#allocation2 + $0x228] sm:$0xf] }
 0x186   :  { %v3129_v7 = vpop.permute.xlu1 %3128  ;;  %1156 = vmatmul.bf16.gmra.mxu1 %v4726_v14  ;;  %v5270_v2 = vpop.eup %5269  ;;  %v1858_v6 = vmul.f32 %v6875_v39, %v6823_v33  ;;  %v1853_v30 = vand.u32 2147483648, %v6791_v12  ;;  %v1846_v13 = vadd.f32 %v6828_v32, %v1845_v63  ;;  %v5070_v28 = vld [vmem:[#allocation2 + $0x238] sm:$0xf0]  ;;  %v5068_v46 = vld [vmem:[#allocation2 + $0x22c] sm:$0xf]  ;;  %vm1863_vm12 = vweird.f32 %v6875_v39 }
 0x187   :  { %v3308_v0 = vmul.f32 %v3129_v7, %v6873_v27  ;;  %1325 = vmatmul.bf16.gmra.mxu2 %v4730_v31  ;;  %5273 = vrcp.f32 %v6880_v21  ;;  %v6903_v31 = vadd.f32 1.0, %v5270_v2  ;;  %v5069_v7 = vld [vmem:[#allocation2 + $0x230] sm:$0xf0]  ;;  %v1851_v63 = vand.u32 2147483647, %v6791_v12  ;;  %vm6948_vm14 = vmor %vm1862_vm13, %vm1863_vm12 }
 0x188   :  { %v1197_v58 = vpop.f32.mrf.mxu3  ;;  %v1859_v48 = vsub.f32 1.0, %v1858_v6  ;;  %v4838_v6 = vor.u32 %v5094_v22, %v4837_v8  ;;  %v4954_v14 = vmul.f32 -1.442695, %v6566_v1  ;;  %v3425_v8 = vpop.permute.xlu2 %3424  ;;  %vm1877_vm1 = vweird.f32 %v6880_v21 }
 0x189   :  { %3448 = vrot.lane.b32.xlu2 %v3308_v0, %s5693_s11  ;;  %v6887_v16 = vadd.f32 %v1197_v58, %v1029_v26  ;;  %v1850_v58 = vsel %vm6905_vm10, %v6828_v32, %v1846_v13  ;;  %v1854_v13 = vor.u32 1.1754944e-38, %v1853_v30  ;;  %vm1852_vm11 = vcmp.eq.f32.partialorder %v1851_v63, 8.507059e+37 }
 0x18a   :  { %v1286_v20 = vpop.f32.mrf.mxu2  ;;  %v950_v4 = vpop.f32.mrf.mxu0  ;;  %v1860_v24 = vmul.f32 %v6875_v39, %v1859_v48  ;;  %vm1892_vm5 = vweird.f32 %v6903_v31 }
 0x18b   :  { %10067 = vst [vmem:[#allocation87_spill] sm:$0xff] %v6887_v16  ;;  %v5272_v50 = vpop.eup %5271  ;;  %v6891_v36 = vadd.f32 %v1286_v20, %v1118_v40  ;;  %v1119_v19 = vpop.f32.mrf.mxu1  ;;  %v951_v49 = vadd.f32 %v6539_v53, %v950_v4  ;;  %v4735_v40 = vld [vmem:[#allocation2 + $0x234] sm:$0xf0]  ;;  %v6931_v48 = vsel %vm1852_vm11, %v1854_v13, %v1850_v58 }
 0x18c   :  { %3450 = vrot.lane.b32.xlu0 %v3309_v44, %s5693_s11  ;;  %3158 = vrot.lane.b32.xlu1 %v5272_v50, %s5693_s11  ;;  %v4734_v50 = vor.u32 %v5069_v7, %v4733_v47  ;;  %v4738_v9 = vor.u32 %v5068_v46, %v4735_v40  ;;  %10070 = vst [vmem:[#allocation88_spill] sm:$0xff] %v6931_v48 }
 0x18d   :  { %5275 = vtanh.f32 %v6891_v36  ;;  %v1120_v0 = vadd.f32 %v1119_v19, %v951_v49  ;;  %v6915_v2 = vpop.eup %5273  ;;  %v4742_v49 = vor.u32 %v5070_v28, %v4741_v25  ;;  %v1861_v1 = vadd.f32 %v6875_v39, %v1860_v24 }
 0x18e   :  { %5277 = vpow2.f32 %v4953_v52  ;;  %v2976_v52 = vmul.f32 %v6049_v23, %v6424_v45  ;;  %v1873_v25 = vmul.f32 %v6915_v2, %v6880_v21  ;;  %v1034_v23 = vadd.f32 %v6539_v53, %v6360_v37 }
 0x18f   :  { %5279 = vrcp.f32 %v6903_v31  ;;  %vm1878_vm0 = vweird.f32 %v6915_v2 }
 0x190   :  { %v1199_v26 = vpop.f32.mrf.mxu3  ;;  %v6938_v7 = vadd.f32 %v3425_v8, %v2976_v52  ;;  %v1874_v63 = vsub.f32 1.0, %v1873_v25  ;;  %vm1879_vm2 = vmor %vm1877_vm1, %vm1878_vm0 }
 0x191   :  { %v6917_v44 = vadd.f32 %v1199_v26, %v1031_v15  ;;  %v1868_v15 = vand.u32 2147483648, %v6823_v33 }
 0x192   :  { %v1288_v20 = vpop.f32.mrf.mxu2  ;;  %v953_v19 = vpop.f32.mrf.mxu0  ;;  %10071 = vst [vmem:[#allocation89_spill] sm:$0xff] %v6938_v7  ;;  %v1875_v52 = vmul.f32 %v6915_v2, %v1874_v63 }
 0x193   :  { %v5276_v4 = vpop.eup %5275  ;;  %v6920_v16 = vadd.f32 %v1288_v20, %v1120_v0  ;;  %v954_v12 = vadd.f32 %v6539_v53, %v953_v19  ;;  %v1122_v32 = vpop.f32.mrf.mxu1  ;;  %v1869_v24 = vor.u32 1.1754944e-38, %v1868_v15 }
 0x194   :  { %3160 = vrot.lane.b32.xlu2 %v5276_v4, %s5693_s11  ;;  %v5278_v28 = vpop.eup %5277 }
 0x195   :  { %5281 = vtanh.f32 %v6920_v16  ;;  %1370 = vmatmul.bf16.gmra.mxu3 %v4838_v6  ;;  %992 = vmatmul.bf16.gmra.mxu0 %v4734_v50  ;;  %v1123_v47 = vadd.f32 %v1122_v32, %v954_v12  ;;  %v6944_v40 = vpop.eup %5279  ;;  %v1865_v50 = vsel %vm6948_vm14, %v6875_v39, %v1861_v1  ;;  %v6959_v4 = vadd.f32 1.0, %v5278_v28  ;;  %v10074_v12 = vld [vmem:[#allocation12_spill] sm:$0xff] }
 0x196   :  { %v3133_v22 = vpop.permute.xlu0 %3132  ;;  %1161 = vmatmul.bf16.gmra.mxu1 %v4738_v9  ;;  %5283 = vpow2.f32 %v4954_v14  ;;  %v1866_v9 = vand.u32 2147483647, %v6823_v33  ;;  %v2977_v32 = vmul.f32 %v10074_v12, %v6429_v10  ;;  %v1888_v14 = vmul.f32 %v6944_v40, %v6903_v31 }
 0x197   :  { %v3310_v30 = vmul.f32 %v3133_v22, %v6931_v48  ;;  %1330 = vmatmul.bf16.gmra.mxu2 %v4742_v49  ;;  %5285 = vtanh.f32 %v6938_v7  ;;  %v10076_v22 = vld [vmem:[#allocation66_spill] sm:$0xff]  ;;  %vm1893_vm4 = vweird.f32 %v6944_v40  ;;  %vm1907_vm9 = vweird.f32 %v6959_v4 }
 0x198   :  { %v1202_v46 = vpop.f32.mrf.mxu3  ;;  %vm1867_vm15 = vcmp.eq.f32.partialorder %v1866_v9, 8.507059e+37  ;;  %vm1894_vm6 = vmor %vm1892_vm5, %vm1893_vm4 }
 0x199   :  { %3452 = vrot.lane.b32.xlu1 %v3310_v30, %s5693_s11  ;;  %v6946_v0 = vadd.f32 %v1202_v46, %v1034_v23  ;;  %v6965_v13 = vsel %vm1867_vm15, %v1869_v24, %v1865_v50  ;;  %v1883_v50 = vand.u32 2147483648, %v6880_v21 }
 0x19a   :  { %v1291_v26 = vpop.f32.mrf.mxu2  ;;  %v955_v6 = vpop.f32.mrf.mxu0  ;;  %10075 = vst [vmem:[#allocation12_spill] sm:$0xff] %v6965_v13 }
 0x19b   :  { %v5282_v58 = vpop.eup %5281  ;;  %v6952_v20 = vadd.f32 %v1291_v26, %v1123_v47  ;;  %v1124_v33 = vpop.f32.mrf.mxu1  ;;  %v956_v19 = vadd.f32 %v6539_v53, %v955_v6  ;;  %v1036_v47 = vadd.f32 %v6539_v53, %v10076_v22  ;;  %v1889_v26 = vsub.f32 1.0, %v1888_v14 }
 0x19c   :  { %3162 = vrot.lane.b32.xlu0 %v5282_v58, %s5693_s11  ;;  %v5284_v8 = vpop.eup %5283  ;;  %v4955_v58 = vmul.f32 -1.442695, %v6596_v59  ;;  %v1876_v53 = vadd.f32 %v6915_v2, %v1875_v52  ;;  %v1881_v59 = vand.u32 2147483647, %v6880_v21 }
 0x19d   :  { %5287 = vtanh.f32 %v6952_v20  ;;  %v1125_v1 = vadd.f32 %v1124_v33, %v956_v19  ;;  %v5286_v15 = vpop.eup %5285  ;;  %v6977_v28 = vadd.f32 1.0, %v5284_v8  ;;  %v6991_v33 = vld [vmem:[%s9825_s2] ss:$0 sm:$0xff]  ;;  %v1884_v8 = vor.u32 1.1754944e-38, %v1883_v50 }
 0x19e   :  { %v3427_v49 = vpop.permute.xlu0 %3426  ;;  %v3135_v39 = vpop.permute.xlu1 %3134  ;;  %5289 = vrcp.f32 %v6959_v4  ;;  %vm1882_vm3 = vcmp.eq.f32.partialorder %v1881_v59, 8.507059e+37 }
 0x19f   :  { %v3311_v25 = vmul.f32 %v3135_v39, %v6965_v13  ;;  %v6973_v30 = vadd.f32 %v3427_v49, %v2977_v32  ;;  %v1890_v49 = vmul.f32 %v6944_v40, %v1889_v26  ;;  %v1880_v32 = vsel %vm1879_vm2, %v6915_v2, %v1876_v53  ;;  %v3137_v39 = vpop.permute.xlu2 %3136 }
 0x1a0   :  { %v1204_v23 = vpop.f32.mrf.mxu3  ;;  %vm1922_vm13 = vweird.f32 %v6977_v28 }
 0x1a1   :  { %10077 = vst [vmem:[#allocation66_spill] sm:$0xff] %v6973_v30  ;;  %3454 = vrot.lane.b32.xlu2 %v3311_v25, %s5693_s11  ;;  %v6979_v46 = vadd.f32 %v1204_v23, %v1036_v47  ;;  %5291 = vtanh.f32 %v6973_v30  ;;  %v7004_v25 = vsel %vm1882_vm3, %v1884_v8, %v1880_v32  ;;  %v1891_v22 = vadd.f32 %v6944_v40, %v1890_v49 }
 0x1a2   :  { %v1293_v9 = vpop.f32.mrf.mxu2  ;;  %v958_v6 = vpop.f32.mrf.mxu0  ;;  %10078 = vst [vmem:[#allocation90_spill] sm:$0xff] %v7004_v25  ;;  %v3312_v23 = vmul.f32 %v3137_v39, %v7004_v25  ;;  %v4956_v32 = vmul.f32 -1.442695, %v6641_v29 }
 0x1a3   :  { %v5288_v37 = vpop.eup %5287  ;;  %v6984_v63 = vadd.f32 %v1293_v9, %v1125_v1  ;;  %v959_v24 = vadd.f32 %v6991_v33, %v958_v6  ;;  %v1127_v19 = vpop.f32.mrf.mxu1  ;;  %v10079_v9 = vld [vmem:[#allocation8_spill] sm:$0xff]  ;;  %v1896_v6 = vand.u32 2147483647, %v6903_v31 }
 0x1a4   :  { %3164 = vrot.lane.b32.xlu1 %v5288_v37, %s5693_s11  ;;  %3808 = vrot.lane.b32.xlu0 %v5286_v15, %s5693_s11  ;;  %v7001_v12 = vpop.eup %5289  ;;  %v2978_v26 = vmul.f32 %v10079_v9, %v6483_v34 }
 0x1a5   :  { %5293 = vtanh.f32 %v6984_v63  ;;  %v1128_v14 = vadd.f32 %v1127_v19, %v959_v24  ;;  %v1903_v47 = vmul.f32 %v7001_v12, %v6959_v4  ;;  %v1895_v19 = vsel %vm1894_vm6, %v6944_v40, %v1891_v22 }
 0x1a6   :  { %5295 = vrcp.f32 %v6977_v28  ;;  %vm1897_vm7 = vcmp.eq.f32.partialorder %v1896_v6, 8.507059e+37  ;;  %vm1908_vm8 = vweird.f32 %v7001_v12 }
 0x1a7   :  { %5297 = vpow2.f32 %v4955_v58  ;;  %v5292_v52 = vpop.eup %5291  ;;  %v1898_v58 = vand.u32 2147483648, %v6903_v31  ;;  %v1904_v49 = vsub.f32 1.0, %v1903_v47  ;;  %v3431_v39 = vpop.permute.xlu2 %3430  ;;  %vm7062_vm10 = vmor %vm1907_vm9, %vm1908_vm8 }
 0x1a8   :  { %v1336_v2 = vpop.f32.mrf.mxu3 }
 0x1aa   :  { %v1296_v21 = vpop.f32.mrf.mxu2  ;;  %v960_v59 = vpop.f32.mrf.mxu0 }
 0x1ab   :  { %v5294_v1 = vpop.eup %5293  ;;  %v7011_v15 = vadd.f32 %v1296_v21, %v1128_v14  ;;  %v3429_v37 = vpop.permute.xlu1 %3428  ;;  %v1899_v14 = vor.u32 1.1754944e-38, %v1898_v58  ;;  %v10081_v21 = vld [vmem:[#allocation10_spill] sm:$0xff]  ;;  %v4957_v58 = vmul.f32 -1.442695, %v6678_v35  ;;  %v961_v6 = vadd.f32 %v6991_v33, %v960_v59 }
 0x1ac   :  { %v7016_v53 = vpop.eup %5295  ;;  %3810 = vrot.lane.b32.xlu1 %v5292_v52, %s5693_s11  ;;  %3166 = vrot.lane.b32.xlu2 %v5294_v1, %s5693_s11  ;;  %v7023_v24 = vadd.f32 %v3429_v37, %v2978_v26  ;;  %v2979_v1 = vmul.f32 %v10081_v21, %v6548_v60  ;;  %v1129_v40 = vpop.f32.mrf.mxu1  ;;  %v1905_v26 = vmul.f32 %v7001_v12, %v1904_v49  ;;  %v1911_v35 = vand.u32 2147483647, %v6959_v4 }
 0x1ad   :  { %v5298_v50 = vpop.eup %5297  ;;  %5299 = vtanh.f32 %v7011_v15  ;;  %3456 = vrot.lane.b32.xlu0 %v3312_v23, %s5693_s11  ;;  %v1918_v31 = vmul.f32 %v7016_v53, %v6977_v28  ;;  %v10082_v23 = vld [vmem:[#allocation68_spill] sm:$0xff]  ;;  %v7040_v22 = vsel %vm1897_vm7, %v1899_v14, %v1895_v19  ;;  %v1913_v14 = vand.u32 2147483648, %v6959_v4 }
 0x1ae   :  { %10080 = vst [vmem:[#allocation8_spill] sm:$0xff] %v7023_v24  ;;  %v3139_v8 = vpop.permute.xlu0 %3138  ;;  %v7032_v52 = vadd.f32 1.0, %v5298_v50  ;;  %v7037_v9 = vadd.f32 %v1336_v2, %v10082_v23  ;;  %5301 = vtanh.f32 %v7023_v24  ;;  %v7042_v29 = vadd.f32 %v3431_v39, %v2979_v1  ;;  %v10090_v1 = vld [vmem:[#allocation5_spill] sm:$0xff] }
 0x1af   :  { %10083 = vst [vmem:[#allocation10_spill] sm:$0xff] %v7040_v22  ;;  %v3313_v47 = vmul.f32 %v3139_v8, %v7040_v22  ;;  %5303 = vpow2.f32 %v4956_v32  ;;  %v1919_v50 = vsub.f32 1.0, %v1918_v31  ;;  %v1906_v49 = vadd.f32 %v7001_v12, %v1905_v26 }
 0x1b0   :  { %10084 = vst [vmem:[#allocation68_spill] sm:$0xff] %v7042_v29  ;;  %5305 = vrcp.f32 %v7032_v52  ;;  %v1338_v19 = vpop.f32.mrf.mxu3  ;;  %v1130_v31 = vadd.f32 %v1129_v40, %v961_v6  ;;  %vm1923_vm11 = vweird.f32 %v7016_v53  ;;  %vm1912_vm12 = vcmp.eq.f32.partialorder %v1911_v35, 8.507059e+37 }
 0x1b1   :  { %5307 = vtanh.f32 %v7037_v9  ;;  %v1920_v32 = vmul.f32 %v7016_v53, %v1919_v50  ;;  %v1910_v40 = vsel %vm7062_vm10, %v7001_v12, %v1906_v49  ;;  %v1914_v4 = vor.u32 1.1754944e-38, %v1913_v14  ;;  %vm7089_vm14 = vmor %vm1922_vm13, %vm1923_vm11 }
 0x1b2   :  { %v1298_v2 = vpop.f32.mrf.mxu2  ;;  %v963_v39 = vpop.f32.mrf.mxu0  ;;  %5309 = vtanh.f32 %v7042_v29  ;;  %v7081_v49 = vadd.f32 %v1338_v19, %v6469_v43  ;;  %v4958_v19 = vmul.f32 -1.442695, %v6705_v62  ;;  %vm1937_vm1 = vweird.f32 %v7032_v52 }
 0x1b3   :  { %v5300_v37 = vpop.eup %5299  ;;  %5311 = vpow2.f32 %v4957_v58  ;;  %v7060_v21 = vadd.f32 %v1298_v2, %v1130_v31  ;;  %v1926_v2 = vand.u32 2147483647, %v6977_v28  ;;  %v964_v35 = vadd.f32 %v6991_v33, %v963_v39 }
 0x1b4   :  { %3458 = vrot.lane.b32.xlu1 %v3313_v47, %s5693_s11  ;;  %v5302_v59 = vpop.eup %5301  ;;  %v1132_v23 = vpop.f32.mrf.mxu1 }
 0x1b5   :  { %3168 = vrot.lane.b32.xlu0 %v5300_v37, %s5693_s11  ;;  %3812 = vrot.lane.b32.xlu2 %v5302_v59, %s5693_s11  ;;  %v5304_v8 = vpop.eup %5303  ;;  %v1921_v37 = vadd.f32 %v7016_v53, %v1920_v32  ;;  %v1928_v59 = vand.u32 2147483648, %v6977_v28  ;;  %5313 = vtanh.f32 %v7060_v21  ;;  %v7084_v32 = vsel %vm1912_vm12, %v1914_v4, %v1910_v40 }
 0x1b6   :  { %v7066_v47 = vpop.eup %5305  ;;  %v3141_v58 = vpop.permute.xlu1 %3140  ;;  %v7073_v6 = vadd.f32 1.0, %v5304_v8  ;;  %10087 = vst [vmem:[#allocation91_spill] sm:$0xff] %v7084_v32  ;;  %v2980_v40 = vmul.f32 %v10090_v1, %v6557_v55  ;;  %vm1927_vm15 = vcmp.eq.f32.partialorder %v1926_v2, 8.507059e+37  ;;  %v1133_v14 = vadd.f32 %v1132_v23, %v964_v35 }
 0x1b7   :  { %v5308_v26 = vpop.eup %5307  ;;  %v3433_v28 = vpop.permute.xlu0 %3432  ;;  %v3314_v8 = vmul.f32 %v3141_v58, %v7084_v32  ;;  %v1933_v43 = vmul.f32 %v7066_v47, %v7032_v52  ;;  %v1925_v39 = vsel %vm7089_vm14, %v7016_v53, %v1921_v37  ;;  %v1929_v29 = vor.u32 1.1754944e-38, %v1928_v59 }
 0x1b8   :  { %v5310_v50 = vpop.eup %5309  ;;  %5315 = vrcp.f32 %v7073_v6  ;;  %v3143_v58 = vpop.permute.xlu2 %3142  ;;  %v7107_v62 = vadd.f32 %v3433_v28, %v2980_v40  ;;  %vm1938_vm0 = vweird.f32 %v7066_v47  ;;  %vm1952_vm5 = vweird.f32 %v7073_v6 }
 0x1b9   :  { %v5312_v12 = vpop.eup %5311  ;;  %5317 = vtanh.f32 %v7081_v49  ;;  %v7109_v53 = vsel %vm1927_vm15, %v1929_v29, %v1925_v39  ;;  %v1934_v24 = vsub.f32 1.0, %v1933_v43  ;;  %vm7144_vm2 = vmor %vm1937_vm1, %vm1938_vm0 }
 0x1ba   :  { %v1301_v31 = vpop.f32.mrf.mxu2  ;;  %v965_v4 = vpop.f32.mrf.mxu0  ;;  %10091 = vst [vmem:[#allocation5_spill] sm:$0xff] %v7107_v62  ;;  %5319 = vpow2.f32 %v4958_v19  ;;  %v3315_v59 = vmul.f32 %v3143_v58, %v7109_v53 }
 0x1bb   :  { %10092 = vst [vmem:[#allocation92_spill] sm:$0xff] %v7109_v53  ;;  %v966_v1 = vadd.f32 %v6991_v33, %v965_v4  ;;  %v7119_v23 = vadd.f32 %v1301_v31, %v1133_v14  ;;  %v1935_v2 = vmul.f32 %v7066_v47, %v1934_v24  ;;  %v10094_v4 = vld [vmem:[#allocation6_spill] sm:$0xff]  ;;  %v10099_v53 = vld [vmem:[#allocation71_spill] sm:$0xff] }
 0x1bc   :  { %3200 = vrot.lane.b32.xlu1 %v5308_v26, %s5693_s11  ;;  %v1341_v26 = vpop.f32.mrf.mxu3  ;;  %v1134_v7 = vpop.f32.mrf.mxu1 }
 0x1bd   :  { %3814 = vrot.lane.b32.xlu0 %v5310_v50, %s5693_s11  ;;  %v7103_v50 = vadd.f32 1.0, %v5312_v12  ;;  %3460 = vrot.lane.b32.xlu2 %v3314_v8, %s5693_s11  ;;  %v7112_v37 = vadd.f32 %v1341_v26, %v6502_v11  ;;  %v5314_v12 = vpop.eup %5313  ;;  %v1135_v29 = vadd.f32 %v1134_v7, %v966_v1  ;;  %v1936_v39 = vadd.f32 %v7066_v47, %v1935_v2  ;;  %v10093_v26 = vld [vmem:[#allocation73_spill] sm:$0xff] }
 0x1be   :  { %v7122_v11 = vpop.eup %5315  ;;  %v2981_v58 = vmul.f32 %v10094_v4, %v10093_v26  ;;  %v1943_v1 = vand.u32 2147483648, %v7032_v52 }
 0x1bf   :  { %5321 = vrcp.f32 %v7103_v50  ;;  %v5318_v35 = vpop.eup %5317  ;;  %v1948_v7 = vmul.f32 %v7122_v11, %v7073_v6  ;;  %v1940_v4 = vsel %vm7144_vm2, %v7066_v47, %v1936_v39  ;;  %vm1953_vm4 = vweird.f32 %v7122_v11 }
 0x1c0   :  { %5323 = vtanh.f32 %v7107_v62  ;;  %v5320_v8 = vpop.eup %5319  ;;  %vm7187_vm6 = vmor %vm1952_vm5, %vm1953_vm4  ;;  %vm1967_vm9 = vweird.f32 %v7103_v50 }
 0x1c1   :  { %5325 = vtanh.f32 %v7112_v37  ;;  %v1949_v62 = vsub.f32 1.0, %v1948_v7  ;;  %v7156_v26 = vadd.f32 1.0, %v5320_v8 }
 0x1c2   :  { %5327 = vtanh.f32 %v7119_v23  ;;  %v1303_v28 = vpop.f32.mrf.mxu2  ;;  %v968_v14 = vpop.f32.mrf.mxu0 }
 0x1c3   :  { %v7130_v31 = vadd.f32 %v1303_v28, %v1135_v29  ;;  %v3435_v19 = vpop.permute.xlu1 %3434  ;;  %v3437_v28 = vpop.permute.xlu2 %3436  ;;  %v1950_v7 = vmul.f32 %v7122_v11, %v1949_v62  ;;  %vm1982_vm13 = vweird.f32 %v7156_v26 }
 0x1c4   :  { %3170 = vrot.lane.b32.xlu1 %v5314_v12, %s5693_s11  ;;  %v1343_v40 = vpop.f32.mrf.mxu3  ;;  %v7142_v2 = vadd.f32 %v3435_v19, %v2981_v58  ;;  %v1137_v30 = vpop.f32.mrf.mxu1 }
 0x1c5   :  { %3462 = vrot.lane.b32.xlu0 %v3315_v59, %s5693_s11  ;;  %3202 = vrot.lane.b32.xlu2 %v5318_v35, %s5693_s11  ;;  %v7128_v43 = vpop.eup %5321  ;;  %v1941_v59 = vand.u32 2147483647, %v7032_v52  ;;  %5329 = vtanh.f32 %v7130_v31  ;;  %v4959_v52 = vmul.f32 -1.442695, %v6745_v57  ;;  %v7162_v35 = vadd.f32 %v1343_v40, %v10099_v53 }
 0x1c6   :  { %v5324_v24 = vpop.eup %5323  ;;  %10095 = vst [vmem:[#allocation6_spill] sm:$0xff] %v7142_v2  ;;  %v1963_v19 = vmul.f32 %v7128_v43, %v7103_v50  ;;  %v3145_v58 = vpop.permute.xlu0 %3144  ;;  %5331 = vtanh.f32 %v7142_v2  ;;  %v969_v57 = vadd.f32 %v6991_v33, %v968_v14  ;;  %v1951_v62 = vadd.f32 %v7122_v11, %v1950_v7 }
 0x1c7   :  { %v5326_v12 = vpop.eup %5325  ;;  %vm1942_vm3 = vcmp.eq.f32.partialorder %v1941_v59, 8.507059e+37  ;;  %5333 = vpow2.f32 %v4959_v52  ;;  %vm1968_vm7 = vweird.f32 %v7128_v43 }
 0x1c8   :  { %v5328_v29 = vpop.eup %5327  ;;  %v1964_v59 = vsub.f32 1.0, %v1963_v19  ;;  %5335 = vrcp.f32 %v7156_v26  ;;  %v1138_v53 = vadd.f32 %v1137_v30, %v969_v57  ;;  %v1956_v30 = vand.u32 2147483647, %v7073_v6  ;;  %vm7213_vm10 = vmor %vm1967_vm9, %vm1968_vm7 }
 0x1c9   :  { %5337 = vtanh.f32 %v7162_v35 }
 0x1ca   :  { %v1965_v14 = vmul.f32 %v7128_v43, %v1964_v59  ;;  %vm1957_vm8 = vcmp.eq.f32.partialorder %v1956_v30, 8.507059e+37 }
 0x1cc   :  { %3816 = vrot.lane.b32.xlu1 %v5324_v24, %s5693_s11  ;;  %v1944_v24 = vor.u32 1.1754944e-38, %v1943_v1  ;;  %v4960_v1 = vmul.f32 -1.442695, %v6787_v51  ;;  %v1346_v40 = vpop.f32.mrf.mxu3 }
 0x1cd   :  { %3204 = vrot.lane.b32.xlu0 %v5326_v12, %s5693_s11  ;;  %v10098_v12 = vld [vmem:[#allocation15_spill] sm:$0xff]  ;;  %3172 = vrot.lane.b32.xlu2 %v5328_v29, %s5693_s11  ;;  %v1306_v29 = vpop.f32.mrf.mxu2 }
 0x1ce   :  { %v2982_v55 = vmul.f32 %v10098_v12, %v6658_v42  ;;  %v7166_v47 = vsel %vm1942_vm3, %v1944_v24, %v1940_v4  ;;  %v5330_v12 = vpop.eup %5329  ;;  %v3149_v4 = vpop.permute.xlu2 %3148  ;;  %v7185_v19 = vadd.f32 %v1306_v29, %v1138_v53  ;;  %v1973_v53 = vand.u32 2147483648, %v7103_v50 }
 0x1cf   :  { %10100 = vst [vmem:[#allocation15_spill] sm:$0xff] %v7166_v47  ;;  %v3316_v8 = vmul.f32 %v3145_v58, %v7166_v47  ;;  %v5332_v51 = vpop.eup %5331  ;;  %v1139_v58 = vpop.f32.mrf.mxu1 }
 0x1d0   :  { %v7168_v39 = vadd.f32 %v3437_v28, %v2982_v55  ;;  %v970_v55 = vpop.f32.mrf.mxu0  ;;  %v1958_v28 = vand.u32 2147483648, %v7073_v6  ;;  %v5334_v52 = vpop.eup %5333  ;;  %v1974_v42 = vor.u32 1.1754944e-38, %v1973_v53  ;;  %v4961_v53 = vmul.f32 -1.442695, %v6815_v56 }
 0x1d1   :  { %v7191_v57 = vpop.eup %5335  ;;  %v3147_v59 = vpop.permute.xlu1 %3146 }
 0x1d2   :  { %10101 = vst [vmem:[#allocation71_spill] sm:$0xff] %v7168_v39  ;;  %5339 = vtanh.f32 %v7168_v39  ;;  %v5338_v7 = vpop.eup %5337  ;;  %v1959_v6 = vor.u32 1.1754944e-38, %v1958_v28  ;;  %v3439_v30 = vpop.permute.xlu0 %3438  ;;  %vm1983_vm12 = vweird.f32 %v7191_v57 }
 0x1d3   :  { %5341 = vpow2.f32 %v4960_v1  ;;  %v1966_v1 = vadd.f32 %v7128_v43, %v1965_v14  ;;  %vm7276_vm14 = vmor %vm1982_vm13, %vm1983_vm12 }
 0x1d4   :  { %3464 = vrot.lane.b32.xlu1 %v3316_v8, %s5693_s11  ;;  %v1955_v8 = vsel %vm7187_vm6, %v7122_v11, %v1951_v62  ;;  %5343 = vtanh.f32 %v7185_v19  ;;  %v1971_v11 = vand.u32 2147483647, %v7103_v50  ;;  %v10104_v62 = vld [vmem:[#allocation72_spill] sm:$0xff]  ;;  %v1978_v50 = vmul.f32 %v7191_v57, %v7156_v26 }
 0x1d5   :  { %3174 = vrot.lane.b32.xlu0 %v5330_v12, %s5693_s11  ;;  %3818 = vrot.lane.b32.xlu2 %v5332_v51, %s5693_s11  ;;  %v7199_v12 = vadd.f32 1.0, %v5334_v52  ;;  %v7206_v14 = vadd.f32 %v1346_v40, %v10104_v62  ;;  %v7208_v24 = vsel %vm1957_vm8, %v1959_v6, %v1955_v8  ;;  %v1308_v28 = vpop.f32.mrf.mxu2  ;;  %v1970_v40 = vsel %vm7213_vm10, %v7128_v43, %v1966_v1  ;;  %v10108_v6 = vld [vmem:[#allocation13_spill] sm:$0xff]  ;;  %v1348_v62 = vpop.f32.mrf.mxu3  ;;  %v10111_v1 = vld [vmem:[#allocation74_spill] sm:$0xff] }
 0x1d6   :  { %10105 = vst [vmem:[#allocation72_spill] sm:$0xff] %v7208_v24  ;;  %v971_v8 = vadd.f32 %v6991_v33, %v970_v55  ;;  %vm1972_vm11 = vcmp.eq.f32.partialorder %v1971_v11, 8.507059e+37  ;;  %v7238_v52 = vadd.f32 %v1348_v62, %v10111_v1  ;;  %v10113_v62 = vld [vmem:[#allocation7_spill] sm:$0xff] }
 0x1d7   :  { %5345 = vrcp.f32 %v7199_v12  ;;  %v7235_v55 = vsel %vm1972_vm11, %v1974_v42, %v1970_v40  ;;  %v2984_v1 = vmul.f32 %v10113_v62, %v6717_v61  ;;  %v10117_v61 = vld [vmem:[#allocation18_spill] sm:$0xff]  ;;  %vm1997_vm1 = vweird.f32 %v7199_v12 }
 0x1d8   :  { %v5340_v29 = vpop.eup %5339  ;;  %v973_v39 = vpop.f32.mrf.mxu0  ;;  %5347 = vtanh.f32 %v7206_v14  ;;  %10110 = vst [vmem:[#allocation93_spill] sm:$0xff] %v7235_v55 }
 0x1d9   :  { %v5342_v51 = vpop.eup %5341 }
 0x1da   :  { %v7227_v2 = vadd.f32 1.0, %v5342_v51  ;;  %v5344_v47 = vpop.eup %5343  ;;  %v1979_v51 = vsub.f32 1.0, %v1978_v50 }
 0x1db   :  { %v3441_v50 = vpop.permute.xlu1 %3440 }
 0x1dc   :  { %3206 = vrot.lane.b32.xlu1 %v5338_v7, %s5693_s11  ;;  %v3317_v7 = vmul.f32 %v3147_v59, %v7208_v24  ;;  %v7229_v59 = vpop.permute.xlu2 %3442  ;;  %v1140_v24 = vadd.f32 %v1139_v58, %v971_v8  ;;  %5349 = vrcp.f32 %v7227_v2  ;;  %v1980_v11 = vmul.f32 %v7191_v57, %v1979_v51 }
 0x1dd   :  { %3820 = vrot.lane.b32.xlu0 %v5340_v29, %s5693_s11  ;;  %v2983_v29 = vmul.f32 %v10108_v6, %v6666_v5  ;;  %v974_v6 = vadd.f32 %v6991_v33, %v973_v39  ;;  %v3318_v5 = vmul.f32 %v3149_v4, %v7235_v55  ;;  %v7247_v42 = vpop.eup %5345  ;;  %v1311_v58 = vpop.f32.mrf.mxu2  ;;  %v2985_v55 = vmul.f32 %v10117_v61, %v6769_v41 }
 0x1de   :  { %3466 = vrot.lane.b32.xlu2 %v3317_v7, %s5693_s11  ;;  %v1142_v7 = vpop.f32.mrf.mxu1  ;;  %v5348_v56 = vpop.eup %5347  ;;  %v7251_v4 = vadd.f32 %v1308_v28, %v1140_v24  ;;  %v1981_v40 = vadd.f32 %v7191_v57, %v1980_v11  ;;  %v1993_v24 = vmul.f32 %v7247_v42, %v7199_v12  ;;  %vm1998_vm0 = vweird.f32 %v7247_v42 }
 0x1df   :  { %v7233_v43 = vadd.f32 %v3439_v30, %v2983_v29  ;;  %v1143_v39 = vadd.f32 %v1142_v7, %v974_v6  ;;  %v3151_v8 = vpop.permute.xlu0 %3150  ;;  %v1351_v29 = vpop.f32.mrf.mxu3  ;;  %v1988_v6 = vand.u32 2147483648, %v7156_v26  ;;  %vm7321_vm2 = vmor %vm1997_vm1, %vm1998_vm0  ;;  %vm2012_vm5 = vweird.f32 %v7227_v2 }
 0x1e0   :  { %v975_v11 = vpop.f32.mrf.mxu0  ;;  %v1994_v62 = vsub.f32 1.0, %v1993_v24  ;;  %v2016_v41 = vand.u32 2147483647, %v7227_v2 }
 0x1e1   :  { %10109 = vst [vmem:[#allocation13_spill] sm:$0xff] %v7233_v43  ;;  %5351 = vtanh.f32 %v7233_v43 }
 0x1e2   :  { %5353 = vtanh.f32 %v7238_v52  ;;  %v1995_v61 = vmul.f32 %v7247_v42, %v1994_v62  ;;  %vm2017_vm7 = vcmp.eq.f32.partialorder %v2016_v41, 8.507059e+37 }
 0x1e3   :  { %5355 = vpow2.f32 %v4961_v53  ;;  %v1986_v53 = vand.u32 2147483647, %v7156_v26 }
 0x1e4   :  { %3176 = vrot.lane.b32.xlu1 %v5344_v47, %s5693_s11  ;;  %v7253_v30 = vpop.permute.xlu2 %3154  ;;  %5357 = vtanh.f32 %v7251_v4  ;;  %v7257_v47 = vpop.eup %5349 }
 0x1e5   :  { %3468 = vrot.lane.b32.xlu0 %v3318_v5, %s5693_s11  ;;  %v7259_v5 = vadd.f32 %v1311_v58, %v1143_v39  ;;  %v7272_v39 = vadd.f32 %v3441_v50, %v2984_v1  ;;  %v1985_v58 = vsel %vm7276_vm14, %v7191_v57, %v1981_v40  ;;  %v2008_v50 = vmul.f32 %v7257_v47, %v7227_v2 }
 0x1e6   :  { %3208 = vrot.lane.b32.xlu2 %v5348_v56, %s5693_s11  ;;  %v1989_v1 = vor.u32 1.1754944e-38, %v1988_v6  ;;  %vm1987_vm15 = vcmp.eq.f32.partialorder %v1986_v53, 8.507059e+37  ;;  %v1144_v40 = vpop.f32.mrf.mxu1  ;;  %v7301_v6 = vadd.f32 %v7229_v59, %v2985_v55  ;;  %v4963_v53 = vmul.f32 -1.442695, %v6891_v36 }
 0x1e7   :  { %10112 = vst [vmem:[#allocation74_spill] sm:$0xff] %v7259_v5  ;;  %v5352_v28 = vpop.eup %5351  ;;  %5359 = vtanh.f32 %v7259_v5  ;;  %v2009_v56 = vsub.f32 1.0, %v2008_v50  ;;  %v1353_v59 = vpop.f32.mrf.mxu3  ;;  %v1996_v55 = vadd.f32 %v7247_v42, %v1995_v61  ;;  %v2003_v36 = vand.u32 2147483648, %v7199_v12 }
 0x1e8   :  { %v5354_v51 = vpop.eup %5353  ;;  %10114 = vst [vmem:[#allocation7_spill] sm:$0xff] %v7272_v39  ;;  %5361 = vtanh.f32 %v7272_v39  ;;  %v978_v50 = vpop.f32.mrf.mxu0  ;;  %vm2013_vm3 = vweird.f32 %v7257_v47 }
 0x1e9   :  { %v5356_v7 = vpop.eup %5355  ;;  %v2010_v62 = vmul.f32 %v7257_v47, %v2009_v56  ;;  %vm7352_vm6 = vmor %vm2012_vm5, %vm2013_vm3 }
 0x1ea   :  { %v5358_v26 = vpop.eup %5357  ;;  %v7287_v43 = vadd.f32 1.0, %v5356_v7 }
 0x1ec   :  { %3822 = vrot.lane.b32.xlu1 %v5352_v28, %s5693_s11  ;;  %v4962_v28 = vmul.f32 -1.442695, %v6854_v18  ;;  %v7291_v5 = vpop.permute.xlu2 %3448  ;;  %v7298_v18 = vsel %vm1987_vm15, %v1989_v1, %v1985_v58  ;;  %v1313_v58 = vpop.f32.mrf.mxu2  ;;  %v2001_v1 = vand.u32 2147483647, %v7199_v12  ;;  %vm2027_vm9 = vweird.f32 %v7287_v43 }
 0x1ed   :  { %3210 = vrot.lane.b32.xlu0 %v5354_v51, %s5693_s11  ;;  %v10118_v51 = vld [vmem:[#allocation77_spill] sm:$0xff]  ;;  %10119 = vst [vmem:[#allocation18_spill] sm:$0xff] %v7298_v18  ;;  %v5360_v24 = vpop.eup %5359  ;;  %v3319_v7 = vmul.f32 %v3151_v8, %v7298_v18  ;;  %v3153_v8 = vpop.permute.xlu1 %3152 }
 0x1ee   :  { %3178 = vrot.lane.b32.xlu2 %v5358_v26, %s5693_s11  ;;  %v7295_v57 = vadd.f32 %v1351_v29, %v10118_v51  ;;  %10120 = vst [vmem:[#allocation77_spill] sm:$0xff] %v7301_v6  ;;  %5363 = vpow2.f32 %v4962_v28  ;;  %v976_v29 = vadd.f32 %v6991_v33, %v975_v11  ;;  %v3445_v26 = vpop.permute.xlu0 %3444  ;;  %v5362_v11 = vpop.eup %5361  ;;  %vm2002_vm4 = vcmp.eq.f32.partialorder %v2001_v1, 8.507059e+37 }
 0x1ef   :  { %5365 = vrcp.f32 %v7287_v43 }
 0x1f0   :  { %5367 = vtanh.f32 %v7295_v57  ;;  %v1145_v28 = vadd.f32 %v1144_v40, %v976_v29  ;;  %v2000_v40 = vsel %vm7321_vm2, %v7247_v42, %v1996_v55  ;;  %v2011_v29 = vadd.f32 %v7257_v47, %v2010_v62 }
 0x1f1   :  { %5369 = vtanh.f32 %v7301_v6 }
 0x1f2   :  { %5371 = vpow2.f32 %v4963_v53  ;;  %v2004_v53 = vor.u32 1.1754944e-38, %v2003_v36  ;;  %v7332_v12 = vadd.f32 %v1313_v58, %v1145_v28  ;;  %v7344_v58 = vadd.f32 %v1353_v59, %v6703_v38 }
 0x1f3   :  { %v979_v36 = vadd.f32 %v6991_v33, %v978_v50  ;;  %v4964_v38 = vmul.f32 -1.442695, %v6920_v16  ;;  %v2015_v59 = vsel %vm7352_vm6, %v7257_v47, %v2011_v29  ;;  %v980_v29 = vpop.f32.mrf.mxu0 }
 0x1f4   :  { %3470 = vrot.lane.b32.xlu1 %v3319_v7, %s5693_s11  ;;  %v7318_v51 = vpop.permute.xlu2 %3160  ;;  %10123 = vst [vmem:[#allocation94_spill] sm:$0xff] %v7332_v12  ;;  %v2018_v7 = vand.u32 2147483648, %v7227_v2  ;;  %5373 = vtanh.f32 %v7332_v12  ;;  %v7347_v62 = vsel %vm2002_vm4, %v2004_v53, %v2000_v40  ;;  %v1316_v40 = vpop.f32.mrf.mxu2  ;;  %v981_v41 = vadd.f32 %v6991_v33, %v980_v29 }
 0x1f5   :  { %3180 = vrot.lane.b32.xlu0 %v5360_v24, %s5693_s11  ;;  %v5364_v24 = vpop.eup %5363  ;;  %10124 = vst [vmem:[#allocation95_spill] sm:$0xff] %v7347_v62  ;;  %v3320_v28 = vmul.f32 %v3153_v8, %v7347_v62  ;;  %v3447_v1 = vpop.permute.xlu1 %3446 }
 0x1f6   :  { %3824 = vrot.lane.b32.xlu2 %v5362_v11, %s5693_s11  ;;  %v7325_v61 = vpop.eup %5365  ;;  %v1147_v11 = vpop.f32.mrf.mxu1  ;;  %v7334_v39 = vadd.f32 1.0, %v5364_v24  ;;  %v2019_v8 = vor.u32 1.1754944e-38, %v2018_v7 }
 0x1f7   :  { %v5368_v56 = vpop.eup %5367  ;;  %v7339_v42 = vpop.permute.xlu0 %3156  ;;  %v2023_v24 = vmul.f32 %v7325_v61, %v7287_v43  ;;  %v1148_v47 = vadd.f32 %v1147_v11, %v979_v36  ;;  %vm2028_vm8 = vweird.f32 %v7325_v61 }
 0x1f8   :  { %v5370_v6 = vpop.eup %5369  ;;  %v1356_v53 = vpop.f32.mrf.mxu3  ;;  %5375 = vrcp.f32 %v7334_v39  ;;  %v7374_v2 = vsel %vm2017_vm7, %v2019_v8, %v2015_v59  ;;  %vm7416_vm10 = vmor %vm2027_vm9, %vm2028_vm8  ;;  %vm2042_vm13 = vweird.f32 %v7334_v39 }
 0x1f9   :  { %v5372_v55 = vpop.eup %5371  ;;  %5377 = vtanh.f32 %v7344_v58  ;;  %10129 = vst [vmem:[#allocation96_spill] sm:$0xff] %v7374_v2  ;;  %v2024_v18 = vsub.f32 1.0, %v2023_v24  ;;  %v3321_v7 = vmul.f32 %v7253_v30, %v7374_v2  ;;  %v2031_v2 = vand.u32 2147483647, %v7287_v43 }
 0x1fa   :  { %5379 = vpow2.f32 %v4964_v38 }
 0x1fb   :  { %vm2032_vm11 = vcmp.eq.f32.partialorder %v2031_v2, 8.507059e+37 }
 0x1fc   :  { %3212 = vrot.lane.b32.xlu1 %v5368_v56, %s5693_s11  ;;  %v7366_v56 = vadd.f32 1.0, %v5372_v55  ;;  %v7368_v62 = vpop.permute.xlu2 %3454  ;;  %v5374_v55 = vpop.eup %5373 }
 0x1fd   :  { %3826 = vrot.lane.b32.xlu0 %v5370_v6, %s5693_s11  ;;  %v10127_v6 = vld [vmem:[#allocation16_spill] sm:$0xff] }
 0x1fe   :  { %v2986_v50 = vmul.f32 %v10127_v6, %v6778_v17  ;;  %3472 = vrot.lane.b32.xlu2 %v3320_v28, %s5693_s11  ;;  %v10130_v6 = vld [vmem:[#allocation79_spill] sm:$0xff]  ;;  %5381 = vrcp.f32 %v7366_v56  ;;  %v1149_v11 = vpop.f32.mrf.mxu1  ;;  %v7388_v36 = vpop.eup %5375  ;;  %v2025_v28 = vmul.f32 %v7325_v61, %v2024_v18  ;;  %vm2057_vm1 = vweird.f32 %v7366_v56 }
 0x1ff   :  { %v7377_v17 = vadd.f32 %v1356_v53, %v10130_v6  ;;  %v7392_v30 = vpop.permute.xlu0 %3450  ;;  %v7394_v24 = vpop.permute.xlu1 %3158  ;;  %v1150_v59 = vadd.f32 %v1149_v11, %v981_v41  ;;  %v2038_v18 = vmul.f32 %v7388_v36, %v7334_v39  ;;  %v2033_v11 = vand.u32 2147483648, %v7287_v43 }
 0x200   :  { %v7372_v16 = vadd.f32 %v3445_v26, %v2986_v50  ;;  %v7385_v26 = vadd.f32 %v1316_v40, %v1148_v47  ;;  %v5378_v38 = vpop.eup %5377  ;;  %v1318_v53 = vpop.f32.mrf.mxu2  ;;  %v2026_v29 = vadd.f32 %v7325_v61, %v2025_v28  ;;  %vm2043_vm12 = vweird.f32 %v7388_v36 }
 0x201   :  { %10131 = vst [vmem:[#allocation79_spill] sm:$0xff] %v7377_v17  ;;  %v5380_v40 = vpop.eup %5379  ;;  %v1358_v47 = vpop.f32.mrf.mxu3  ;;  %vm7471_vm14 = vmor %vm2042_vm13, %vm2043_vm12 }
 0x202   :  { %10128 = vst [vmem:[#allocation16_spill] sm:$0xff] %v7372_v16  ;;  %5383 = vtanh.f32 %v7372_v16  ;;  %v983_v41 = vpop.f32.mrf.mxu0  ;;  %v7409_v16 = vadd.f32 %v1318_v53, %v1150_v59  ;;  %v2030_v59 = vsel %vm7416_vm10, %v7325_v61, %v2026_v29  ;;  %v2039_v53 = vsub.f32 1.0, %v2038_v18 }
 0x203   :  { %10132 = vst [vmem:[#allocation97_spill] sm:$0xff] %v7385_v26  ;;  %5385 = vtanh.f32 %v7377_v17  ;;  %v7432_v12 = vadd.f32 1.0, %v5380_v40  ;;  %v7438_v17 = vadd.f32 %v1358_v47, %v6785_v54  ;;  %v4966_v54 = vmul.f32 -1.442695, %v6984_v63 }
 0x204   :  { %3182 = vrot.lane.b32.xlu1 %v5374_v55, %s5693_s11  ;;  %5387 = vtanh.f32 %v7385_v26  ;;  %v7400_v8 = vpop.eup %5381  ;;  %v10133_v55 = vld [vmem:[#allocation9_spill] sm:$0xff]  ;;  %v2040_v18 = vmul.f32 %v7388_v36, %v2039_v53 }
 0x205   :  { %3474 = vrot.lane.b32.xlu0 %v3321_v7, %s5693_s11  ;;  %v2987_v7 = vmul.f32 %v10133_v55, %v6832_v3  ;;  %10134 = vst [vmem:[#allocation9_spill] sm:$0xff] %v7409_v16  ;;  %5389 = vtanh.f32 %v7409_v16  ;;  %vm2058_vm15 = vweird.f32 %v7400_v8  ;;  %vm2072_vm5 = vweird.f32 %v7432_v12 }
 0x206   :  { %3214 = vrot.lane.b32.xlu2 %v5378_v38, %s5693_s11  ;;  %v7398_v50 = vpop.permute.xlu2 %3166  ;;  %v1152_v3 = vpop.f32.mrf.mxu1  ;;  %vm7499_vm2 = vmor %vm2057_vm1, %vm2058_vm15 }
 0x207   :  { %v7414_v26 = vadd.f32 %v3447_v1, %v2987_v7  ;;  %v4965_v1 = vmul.f32 -1.442695, %v6952_v20  ;;  %v2034_v7 = vor.u32 1.1754944e-38, %v2033_v11  ;;  %v984_v20 = vadd.f32 %v6991_v33, %v983_v41 }
 0x208   :  { %v5384_v6 = vpop.eup %5383  ;;  %v1321_v11 = vpop.f32.mrf.mxu2 }
 0x209   :  { %v5386_v38 = vpop.eup %5385  ;;  %10135 = vst [vmem:[#allocation98_spill] sm:$0xff] %v7414_v26  ;;  %5391 = vtanh.f32 %v7414_v26  ;;  %v7442_v61 = vsel %vm2032_vm11, %v2034_v7, %v2030_v59  ;;  %v1361_v41 = vpop.f32.mrf.mxu3 }
 0x20a   :  { %v5388_v28 = vpop.eup %5387  ;;  %10140 = vst [vmem:[#allocation99_spill] sm:$0xff] %v7442_v61  ;;  %v3322_v40 = vmul.f32 %v7339_v42, %v7442_v61  ;;  %5393 = vpow2.f32 %v4965_v1  ;;  %v2041_v42 = vadd.f32 %v7388_v36, %v2040_v18 }
 0x20b   :  { %v7425_v55 = vpop.permute.xlu1 %3452  ;;  %5395 = vrcp.f32 %v7432_v12 }
 0x20c   :  { %3828 = vrot.lane.b32.xlu1 %v5384_v6, %s5693_s11  ;;  %v2053_v6 = vmul.f32 %v7400_v8, %v7366_v56  ;;  %5397 = vtanh.f32 %v7438_v17 }
 0x20d   :  { %3216 = vrot.lane.b32.xlu0 %v5386_v38, %s5693_s11  ;;  %v10138_v38 = vld [vmem:[#allocation21_spill] sm:$0xff] }
 0x20e   :  { %v7427_v43 = vpop.permute.xlu0 %3162  ;;  %v2988_v16 = vmul.f32 %v10138_v38, %v6873_v27  ;;  %3184 = vrot.lane.b32.xlu2 %v5388_v28, %s5693_s11  ;;  %10139 = vst [vmem:[#allocation21_spill] sm:$0xff] %v7438_v17  ;;  %v2054_v47 = vsub.f32 1.0, %v2053_v6  ;;  %v5390_v28 = vpop.eup %5389  ;;  %v2048_v6 = vand.u32 2147483648, %v7334_v39 }
 0x20f   :  { %v7450_v2 = vpop.permute.xlu2 %3812  ;;  %v5392_v53 = vpop.eup %5391 }
 0x210   :  { %v7445_v29 = vadd.f32 %v7291_v5, %v2988_v16  ;;  %v1153_v5 = vadd.f32 %v1152_v3, %v984_v20  ;;  %v985_v16 = vpop.f32.mrf.mxu0  ;;  %v2055_v1 = vmul.f32 %v7400_v8, %v2054_v47  ;;  %v2046_v3 = vand.u32 2147483647, %v7334_v39  ;;  %v5394_v7 = vpop.eup %5393 }
 0x211   :  { %v7475_v18 = vpop.eup %5395  ;;  %v1323_v27 = vpop.f32.mrf.mxu2 }
 0x212   :  { %10141 = vst [vmem:[#allocation100_spill] sm:$0xff] %v7445_v29  ;;  %5399 = vtanh.f32 %v7445_v29  ;;  %v7469_v38 = vadd.f32 %v1321_v11, %v1153_v5  ;;  %v2056_v39 = vadd.f32 %v7400_v8, %v2055_v1  ;;  %v2049_v11 = vor.u32 1.1754944e-38, %v2048_v6 }
 0x213   :  { %5401 = vpow2.f32 %v4966_v54  ;;  %v2045_v54 = vsel %vm7471_vm14, %v7388_v36, %v2041_v42  ;;  %v2063_v29 = vand.u32 2147483648, %v7366_v56  ;;  %vm2047_vm0 = vcmp.eq.f32.partialorder %v2046_v3, 8.507059e+37  ;;  %v10145_v42 = vld [vmem:[#allocation82_spill] sm:$0xff] }
 0x214   :  { %3476 = vrot.lane.b32.xlu1 %v3322_v40, %s5693_s11  ;;  %10142 = vst [vmem:[#allocation101_spill] sm:$0xff] %v7469_v38  ;;  %v1154_v40 = vpop.f32.mrf.mxu1  ;;  %5403 = vtanh.f32 %v7469_v38  ;;  %v2061_v36 = vand.u32 2147483647, %v7366_v56  ;;  %v7492_v1 = vadd.f32 %v1361_v41, %v10145_v42  ;;  %v7494_v26 = vsel %vm2047_vm0, %v2049_v11, %v2045_v54  ;;  %v10149_v11 = vld [vmem:[#allocation86_spill] sm:$0xff] }
 0x215   :  { %3186 = vrot.lane.b32.xlu0 %v5390_v28, %s5693_s11  ;;  %v5398_v28 = vpop.eup %5397  ;;  %10146 = vst [vmem:[#allocation82_spill] sm:$0xff] %v7494_v26  ;;  %v3323_v3 = vmul.f32 %v7394_v24, %v7494_v26  ;;  %v2068_v56 = vmul.f32 %v7475_v18, %v7432_v12  ;;  %v2060_v54 = vsel %vm7499_vm2, %v7400_v8, %v2056_v39  ;;  %v2064_v26 = vor.u32 1.1754944e-38, %v2063_v29 }
 0x216   :  { %v7460_v63 = vpop.permute.xlu1 %3164  ;;  %v7462_v59 = vpop.permute.xlu0 %3808  ;;  %3830 = vrot.lane.b32.xlu2 %v5392_v53, %s5693_s11  ;;  %v7485_v53 = vadd.f32 1.0, %v5394_v7  ;;  %vm2062_vm3 = vcmp.eq.f32.partialorder %v2061_v36, 8.507059e+37  ;;  %vm2073_vm4 = vweird.f32 %v7475_v18 }
 0x217   :  { %v7480_v47 = vpop.permute.xlu2 %3460  ;;  %v1363_v7 = vpop.f32.mrf.mxu3  ;;  %v2069_v6 = vsub.f32 1.0, %v2068_v56  ;;  %vm7577_vm6 = vmor %vm2072_vm5, %vm2073_vm4 }
 0x218   :  { %v5400_v5 = vpop.eup %5399  ;;  %v988_v61 = vpop.f32.mrf.mxu0  ;;  %5405 = vrcp.f32 %v7485_v53  ;;  %vm2087_vm9 = vweird.f32 %v7485_v53 }
 0x219   :  { %v5402_v20 = vpop.eup %5401  ;;  %5407 = vtanh.f32 %v7492_v1 }
 0x21a   :  { %v7518_v24 = vadd.f32 1.0, %v5402_v20  ;;  %v5404_v17 = vpop.eup %5403  ;;  %v7533_v20 = vld [vmem:[%s9825_s2] ss:$0 sm:$0xff]  ;;  %s5694_s2 = smov 64  }
 0x21b   :  { %v989_v29 = vadd.f32 %v7533_v20, %v988_v61 }
 0x21c   :  { %3218 = vrot.lane.b32.xlu1 %v5398_v28, %s5693_s11  ;;  %v986_v28 = vadd.f32 %v6991_v33, %v985_v16  ;;  %v7525_v33 = vsel %vm2062_vm3, %v2064_v26, %v2060_v54  ;;  %v10153_v16 = vld [vmem:[#allocation84_spill] sm:$0xff]  ;;  %5409 = vrcp.f32 %v7518_v24  ;;  %v1326_v54 = vpop.f32.mrf.mxu2  ;;  %vm2102_vm12 = vweird.f32 %v7518_v24 }
 0x21d   :  { %3832 = vrot.lane.b32.xlu0 %v5400_v5, %s5693_s11  ;;  %v10150_v5 = vld [vmem:[#allocation19_spill] sm:$0xff]  ;;  %10152 = vst [vmem:[#allocation102_spill] sm:$0xff] %v7525_v33  ;;  %v7528_v39 = vadd.f32 %v1363_v7, %v10153_v16  ;;  %v3324_v36 = vmul.f32 %v7318_v51, %v7525_v33  ;;  %v2070_v7 = vmul.f32 %v7475_v18, %v2069_v6 }
 0x21e   :  { %v7507_v41 = vpop.permute.xlu1 %3810  ;;  %v2989_v42 = vmul.f32 %v10150_v5, %v10149_v11  ;;  %3478 = vrot.lane.b32.xlu2 %v3323_v3, %s5693_s11  ;;  %v1157_v5 = vpop.f32.mrf.mxu1 }
 0x21f   :  { %v7515_v38 = vpop.permute.xlu0 %3456  ;;  %v7536_v3 = vpop.permute.xlu2 %3202  ;;  %v1158_v61 = vadd.f32 %v1157_v5, %v989_v29  ;;  %v2071_v16 = vadd.f32 %v7475_v18, %v2070_v7  ;;  %v2076_v7 = vand.u32 2147483647, %v7432_v12 }
 0x220   :  { %v7523_v8 = vadd.f32 %v7392_v30, %v2989_v42  ;;  %v1155_v30 = vadd.f32 %v1154_v40, %v986_v28  ;;  %v7544_v26 = vpop.eup %5405 }
 0x221   :  { %v5408_v51 = vpop.eup %5407  ;;  %v7558_v42 = vadd.f32 %v1326_v54, %v1158_v61  ;;  %v2083_v29 = vmul.f32 %v7544_v26, %v7485_v53  ;;  %v4967_v61 = vmul.f32 -1.442695, %v7011_v15  ;;  %v2075_v15 = vsel %vm7577_vm6, %v7475_v18, %v2071_v16  ;;  %v10161_v18 = vld [vmem:[#allocation87_spill] sm:$0xff] }
 0x222   :  { %10151 = vst [vmem:[#allocation19_spill] sm:$0xff] %v7523_v8  ;;  %5411 = vtanh.f32 %v7523_v8  ;;  %v7550_v40 = vadd.f32 %v1323_v27, %v1155_v30  ;;  %v10156_v30 = vld [vmem:[#allocation11_spill] sm:$0xff]  ;;  %vm2077_vm7 = vcmp.eq.f32.partialorder %v2076_v7, 8.507059e+37  ;;  %vm2088_vm8 = vweird.f32 %v7544_v26 }
 0x223   :  { %5413 = vtanh.f32 %v7528_v39  ;;  %10155 = vst [vmem:[#allocation103_spill] sm:$0xff] %v7558_v42  ;;  %v2990_v5 = vmul.f32 %v10156_v30, %v6931_v48  ;;  %v2084_v30 = vsub.f32 1.0, %v2083_v29  ;;  %vm7627_vm10 = vmor %vm2087_vm9, %vm2088_vm8 }
 0x224   :  { %3188 = vrot.lane.b32.xlu1 %v5404_v17, %s5693_s11  ;;  %10154 = vst [vmem:[#allocation84_spill] sm:$0xff] %v7550_v40  ;;  %5415 = vtanh.f32 %v7550_v40  ;;  %v7556_v17 = vpop.eup %5409 }
 0x225   :  { %3480 = vrot.lane.b32.xlu0 %v3324_v36, %s5693_s11  ;;  %v1366_v36 = vpop.f32.mrf.mxu3  ;;  %5417 = vtanh.f32 %v7558_v42  ;;  %v7575_v54 = vadd.f32 %v7425_v55, %v2990_v5  ;;  %v2098_v55 = vmul.f32 %v7556_v17, %v7518_v24  ;;  %v4984_v42 = vmul.f32 -1.442695, %v7081_v49 }
 0x226   :  { %v7548_v56 = vpop.permute.xlu1 %3458  ;;  %3220 = vrot.lane.b32.xlu2 %v5408_v51, %s5693_s11  ;;  %v2078_v51 = vand.u32 2147483648, %v7432_v12  ;;  %v4983_v12 = vmul.f32 -1.442695, %v7037_v9  ;;  %5419 = vpow2.f32 %v4967_v61  ;;  %v7597_v11 = vadd.f32 %v1366_v36, %v10161_v18  ;;  %v990_v36 = vpop.f32.mrf.mxu0 }
 0x227   :  { %v7552_v28 = vpop.permute.xlu0 %3168  ;;  %v7564_v27 = vpop.permute.xlu2 %3172  ;;  %10157 = vst [vmem:[#allocation11_spill] sm:$0xff] %v7575_v54  ;;  %5421 = vtanh.f32 %v7575_v54  ;;  %vm2103_vm11 = vweird.f32 %v7556_v17 }
 0x228   :  { %v5412_v6 = vpop.eup %5411  ;;  %5423 = vpow2.f32 %v4983_v12  ;;  %v1159_v18 = vpop.f32.mrf.mxu1  ;;  %vm7655_vm14 = vmor %vm2102_vm12, %vm2103_vm11 }
 0x229   :  { %v5414_v8 = vpop.eup %5413  ;;  %5425 = vpow2.f32 %v4984_v42 }
 0x22a   :  { %v5416_v33 = vpop.eup %5415  ;;  %5427 = vtanh.f32 %v7597_v11 }
 0x22b   :  { %v5418_v16 = vpop.eup %5417 }
 0x22c   :  { %3834 = vrot.lane.b32.xlu1 %v5412_v6, %s5693_s11  ;;  %v2079_v6 = vor.u32 1.1754944e-38, %v2078_v51  ;;  %v2085_v51 = vmul.f32 %v7544_v26, %v2084_v30  ;;  %v2093_v30 = vand.u32 2147483648, %v7485_v53 }
 0x22d   :  { %3222 = vrot.lane.b32.xlu0 %v5414_v8, %s5693_s11  ;;  %v10160_v8 = vld [vmem:[#allocation24_spill] sm:$0xff]  ;;  %v1368_v7 = vpop.f32.mrf.mxu3 }
 0x22e   :  { %v7585_v48 = vpop.permute.xlu1 %3200  ;;  %v2991_v40 = vmul.f32 %v10160_v8, %v6965_v13  ;;  %3190 = vrot.lane.b32.xlu2 %v5416_v33, %s5693_s11  ;;  %v7600_v9 = vsel %vm2077_vm7, %v2079_v6, %v2075_v15  ;;  %v2099_v33 = vsub.f32 1.0, %v2098_v55  ;;  %v2091_v55 = vand.u32 2147483647, %v7485_v53 }
 0x22f   :  { %v7590_v5 = vpop.permute.xlu0 %3814  ;;  %10162 = vst [vmem:[#allocation24_spill] sm:$0xff] %v7600_v9  ;;  %v3325_v49 = vmul.f32 %v7427_v43, %v7600_v9  ;;  %v7608_v61 = vpop.permute.xlu2 %3818  ;;  %v2086_v43 = vadd.f32 %v7544_v26, %v2085_v51  ;;  %v2108_v9 = vand.u32 2147483648, %v7518_v24 }
 0x230   :  { %v7603_v29 = vadd.f32 %v7368_v62, %v2991_v40  ;;  %v5420_v62 = vpop.eup %5419  ;;  %v2100_v42 = vmul.f32 %v7556_v17, %v2099_v33  ;;  %vm2092_vm13 = vcmp.eq.f32.partialorder %v2091_v55, 8.507059e+37 }
 0x231   :  { %v5422_v15 = vpop.eup %5421  ;;  %v7625_v8 = vadd.f32 1.0, %v5420_v62  ;;  %v2090_v51 = vsel %vm7627_vm10, %v7544_v26, %v2086_v43  ;;  %v991_v62 = vadd.f32 %v7533_v20, %v990_v36  ;;  %v2106_v26 = vand.u32 2147483647, %v7518_v24  ;;  %v1328_v43 = vpop.f32.mrf.mxu2 }
 0x232   :  { %10163 = vst [vmem:[#allocation87_spill] sm:$0xff] %v7603_v29  ;;  %5429 = vtanh.f32 %v7603_v29  ;;  %v5424_v6 = vpop.eup %5423  ;;  %v2101_v53 = vadd.f32 %v7556_v17, %v2100_v42  ;;  %v7647_v42 = vadd.f32 %v1368_v7, %v6917_v44 }
 0x233   :  { %v7639_v13 = vadd.f32 1.0, %v5424_v6  ;;  %5431 = vrcp.f32 %v7625_v8  ;;  %v1160_v7 = vadd.f32 %v1159_v18, %v991_v62  ;;  %vm2107_vm15 = vcmp.eq.f32.partialorder %v2106_v26, 8.507059e+37  ;;  %v1162_v62 = vpop.f32.mrf.mxu1 }
 0x234   :  { %3482 = vrot.lane.b32.xlu1 %v3325_v49, %s5693_s11  ;;  %v5426_v49 = vpop.eup %5425  ;;  %v4985_v26 = vmul.f32 -1.442695, %v7112_v37  ;;  %vm2117_vm1 = vweird.f32 %v7625_v8 }
 0x235   :  { %3192 = vrot.lane.b32.xlu0 %v5418_v16, %s5693_s11  ;;  %v5428_v29 = vpop.eup %5427  ;;  %v7663_v44 = vadd.f32 1.0, %v5426_v49  ;;  %5433 = vrcp.f32 %v7639_v13  ;;  %vm2357_vm5 = vweird.f32 %v7639_v13 }
 0x236   :  { %v7616_v40 = vpop.permute.xlu1 %3170  ;;  %3836 = vrot.lane.b32.xlu2 %v5422_v15, %s5693_s11  ;;  %v2094_v15 = vor.u32 1.1754944e-38, %v2093_v30  ;;  %v4968_v30 = vmul.f32 -1.442695, %v7060_v21  ;;  %v1371_v21 = vpop.f32.mrf.mxu3  ;;  %5435 = vtanh.f32 %v7647_v42 }
 0x237   :  { %v7620_v12 = vpop.permute.xlu0 %3462  ;;  %v7679_v18 = vadd.f32 %v1371_v21, %v6946_v0  ;;  %vm2372_vm7 = vweird.f32 %v7663_v44 }
 0x238   :  { %v7634_v33 = vpop.permute.xlu2 %3466  ;;  %v5430_v54 = vpop.eup %5429  ;;  %v7649_v36 = vsel %vm2092_vm13, %v2094_v15, %v2090_v51  ;;  %v4969_v51 = vmul.f32 -1.442695, %v7119_v23  ;;  %v2109_v15 = vor.u32 1.1754944e-38, %v2108_v9  ;;  %5437 = vpow2.f32 %v4968_v30  ;;  %v10171_v30 = vld [vmem:[#allocation22_spill] sm:$0xff] }
 0x239   :  { %10166 = vst [vmem:[#allocation104_spill] sm:$0xff] %v7649_v36  ;;  %v3326_v24 = vmul.f32 %v7460_v63, %v7649_v36  ;;  %5439 = vrcp.f32 %v7663_v44  ;;  %v7688_v9 = vadd.f32 %v1328_v43, %v1160_v7  ;;  %v1331_v37 = vpop.f32.mrf.mxu2  ;;  %v2992_v55 = vmul.f32 %v10171_v30, %v7004_v25 }
 0x23a   :  { %10170 = vst [vmem:[#allocation106_spill] sm:$0xff] %v7679_v18  ;;  %5441 = vpow2.f32 %v4969_v51 }
 0x23b   :  { %5443 = vtanh.f32 %v7688_v9  ;;  %v7710_v51 = vadd.f32 %v7515_v38, %v2992_v55  ;;  %v1164_v38 = vpop.f32.mrf.mxu1 }
 0x23c   :  { %3224 = vrot.lane.b32.xlu1 %v5428_v29, %s5693_s11  ;;  %v993_v29 = vpop.f32.mrf.mxu0  ;;  %5445 = vtanh.f32 %v7679_v18 }
 0x23d   :  { %3838 = vrot.lane.b32.xlu0 %v5430_v54, %s5693_s11  ;;  %v2105_v54 = vsel %vm7655_vm14, %v7556_v17, %v2101_v53  ;;  %v4000_v17 = vmul.f32 %v7462_v59, %v6424_v45  ;;  %v7683_v53 = vpop.eup %5431  ;;  %v994_v45 = vadd.f32 %v7533_v20, %v993_v29  ;;  %5447 = vpow2.f32 %v4985_v26  ;;  %10172 = vst [vmem:[#allocation22_spill] sm:$0xff] %v7710_v51 }
 0x23e   :  { %v7661_v6 = vpop.permute.xlu1 %3816  ;;  %3484 = vrot.lane.b32.xlu2 %v3326_v24, %s5693_s11  ;;  %v7674_v63 = vsel %vm2107_vm15, %v2109_v15, %v2105_v54  ;;  %v7695_v0 = vpop.eup %5433  ;;  %5449 = vtanh.f32 %v7710_v51  ;;  %vm2118_vm0 = vweird.f32 %v7683_v53 }
 0x23f   :  { %v7668_v16 = vpop.permute.xlu0 %3204  ;;  %10169 = vst [vmem:[#allocation105_spill] sm:$0xff] %v7674_v63  ;;  %v3327_v23 = vmul.f32 %v7398_v50, %v7674_v63  ;;  %v2113_v50 = vmul.f32 %v7683_v53, %v7625_v8  ;;  %v5436_v43 = vpop.eup %5435  ;;  %v1163_v7 = vadd.f32 %v1162_v62, %v994_v45  ;;  %vm7760_vm2 = vmor %vm2117_vm1, %vm2118_vm0  ;;  %vm2358_vm3 = vweird.f32 %v7695_v0 }
 0x240   :  { %v7681_v49 = vpop.permute.xlu2 %3208  ;;  %v5438_v54 = vpop.eup %5437  ;;  %vm7791_vm6 = vmor %vm2357_vm5, %vm2358_vm3 }
 0x241   :  { %v7707_v29 = vpop.eup %5439  ;;  %v7716_v36 = vadd.f32 1.0, %v5438_v54  ;;  %v7720_v62 = vadd.f32 %v1331_v37, %v1163_v7 }
 0x242   :  { %v5442_v15 = vpop.eup %5441  ;;  %v2368_v37 = vmul.f32 %v7707_v29, %v7663_v44  ;;  %vm2373_vm8 = vweird.f32 %v7707_v29 }
 0x243   :  { %v5444_v30 = vpop.eup %5443  ;;  %5451 = vtanh.f32 %v7720_v62  ;;  %vm7830_vm10 = vmor %vm2372_vm7, %vm2373_vm8  ;;  %vm2132_vm13 = vweird.f32 %v7716_v36 }
 0x244   :  { %4128 = vrot.lane.b32.xlu1 %v4000_v17, %s5694_s2  ;;  %v995_v21 = vpop.f32.mrf.mxu0  ;;  %v2114_v17 = vsub.f32 1.0, %v2113_v50  ;;  %v5446_v25 = vpop.eup %5445  ;;  %v4986_v50 = vmul.f32 -1.442695, %v7162_v35  ;;  %5453 = vrcp.f32 %v7716_v36 }
 0x245   :  { %3486 = vrot.lane.b32.xlu0 %v3327_v23, %s5693_s11  ;;  %v2353_v23 = vmul.f32 %v7695_v0, %v7639_v13  ;;  %v996_v26 = vadd.f32 %v7533_v20, %v995_v21  ;;  %v5448_v45 = vpop.eup %5447  ;;  %v7730_v20 = vadd.f32 1.0, %v5442_v15  ;;  %v1333_v35 = vpop.f32.mrf.mxu2 }
 0x246   :  { %v7700_v59 = vpop.permute.xlu1 %3464  ;;  %3226 = vrot.lane.b32.xlu2 %v5436_v43, %s5693_s11  ;;  %v4001_v43 = vmul.f32 %v7507_v41, %v6429_v10  ;;  %v2115_v55 = vmul.f32 %v7683_v53, %v2114_v17  ;;  %v7739_v10 = vadd.f32 1.0, %v5448_v45  ;;  %v2123_v41 = vand.u32 2147483648, %v7625_v8 }
 0x247   :  { %v7704_v24 = vpop.permute.xlu0 %3174  ;;  %v2354_v54 = vsub.f32 1.0, %v2353_v23  ;;  %5455 = vpow2.f32 %v4986_v50  ;;  %v5450_v23 = vpop.eup %5449  ;;  %v4970_v45 = vmul.f32 -1.442695, %v7130_v31  ;;  %vm2147_vm14 = vweird.f32 %v7730_v20 }
 0x248   :  { %v7714_v63 = vpop.permute.xlu2 %3178  ;;  %v2116_v21 = vadd.f32 %v7683_v53, %v2115_v55  ;;  %5457 = vrcp.f32 %v7730_v20  ;;  %v1373_v31 = vpop.f32.mrf.mxu3 }
 0x249   :  { %v2355_v15 = vmul.f32 %v7695_v0, %v2354_v54  ;;  %v5452_v55 = vpop.eup %5451  ;;  %5459 = vrcp.f32 %v7739_v10 }
 0x24c   :  { %3194 = vrot.lane.b32.xlu1 %v5444_v30, %s5693_s11  ;;  %v4987_v30 = vmul.f32 -1.442695, %v7206_v14 }
 0x24d   :  { %3228 = vrot.lane.b32.xlu0 %v5446_v25, %s5693_s11  ;;  %v1165_v25 = vadd.f32 %v1164_v38, %v996_v26  ;;  %v4002_v26 = vmul.f32 %v7450_v2, %v6483_v34  ;;  %v2369_v38 = vsub.f32 1.0, %v2368_v37  ;;  %v7765_v34 = vpop.eup %5453  ;;  %v2120_v2 = vsel %vm7760_vm2, %v7683_v53, %v2116_v21 }
 0x24e   :  { %v7728_v18 = vpop.permute.xlu1 %3206  ;;  %4130 = vrot.lane.b32.xlu2 %v4001_v43, %s5694_s2  ;;  %v2121_v43 = vand.u32 2147483647, %v7625_v8  ;;  %v2356_v8 = vadd.f32 %v7695_v0, %v2355_v15  ;;  %v2361_v53 = vand.u32 2147483647, %v7639_v13  ;;  %v7785_v15 = vadd.f32 %v1373_v31, %v6979_v46 }
 0x24f   :  { %v7735_v7 = vpop.permute.xlu0 %3820  ;;  %v7752_v50 = vadd.f32 %v1333_v35, %v1165_v25  ;;  %v2370_v37 = vmul.f32 %v7707_v29, %v2369_v38  ;;  %v2124_v25 = vor.u32 1.1754944e-38, %v2123_v41  ;;  %v2363_v35 = vand.u32 2147483648, %v7639_v13  ;;  %v10179_v13 = vld [vmem:[#allocation14_spill] sm:$0xff] }
 0x250   :  { %v7745_v17 = vpop.permute.xlu2 %3824  ;;  %vm2122_vm4 = vcmp.eq.f32.partialorder %v2121_v43, 8.507059e+37  ;;  %v2128_v38 = vmul.f32 %v7765_v34, %v7716_v36  ;;  %v2360_v43 = vsel %vm7791_vm6, %v7695_v0, %v2356_v8  ;;  %vm2362_vm9 = vcmp.eq.f32.partialorder %v2361_v53, 8.507059e+37 }
 0x251   :  { %10173 = vst [vmem:[#allocation107_spill] sm:$0xff] %v7752_v50  ;;  %5461 = vtanh.f32 %v7752_v50  ;;  %v2371_v31 = vadd.f32 %v7707_v29, %v2370_v37  ;;  %vm2133_vm12 = vweird.f32 %v7765_v34 }
 0x252   :  { %5463 = vpow2.f32 %v4987_v30  ;;  %v7787_v30 = vsel %vm2122_vm4, %v2124_v25, %v2120_v2  ;;  %v2376_v2 = vand.u32 2147483647, %v7663_v44  ;;  %v2364_v25 = vor.u32 1.1754944e-38, %v2363_v35  ;;  %vm7889_vm0 = vmor %vm2132_vm13, %vm2133_vm12 }
 0x253   :  { %5465 = vpow2.f32 %v4970_v45  ;;  %10176 = vst [vmem:[#allocation108_spill] sm:$0xff] %v7787_v30  ;;  %v2993_v45 = vmul.f32 %v10179_v13, %v7040_v22  ;;  %v3328_v46 = vmul.f32 %v7552_v28, %v7787_v30  ;;  %v2378_v28 = vand.u32 2147483648, %v7663_v44 }
 0x254   :  { %3840 = vrot.lane.b32.xlu1 %v5450_v23, %s5693_s11  ;;  %5467 = vtanh.f32 %v7785_v15  ;;  %v7822_v37 = vsel %vm2362_vm9, %v2364_v25, %v2360_v43  ;;  %v2129_v35 = vsub.f32 1.0, %v2128_v38  ;;  %v4971_v30 = vmul.f32 -1.442695, %v7185_v19  ;;  %v10184_v19 = vld [vmem:[#allocation26_spill] sm:$0xff] }
 0x255   :  { %4132 = vrot.lane.b32.xlu0 %v4002_v26, %s5694_s2  ;;  %v5456_v26 = vpop.eup %5455  ;;  %v7820_v8 = vadd.f32 %v7548_v56, %v2993_v45  ;;  %10181 = vst [vmem:[#allocation109_spill] sm:$0xff] %v7822_v37  ;;  %v3344_v56 = vmul.f32 %v7585_v48, %v7822_v37  ;;  %v2375_v44 = vsel %vm7830_vm10, %v7707_v29, %v2371_v31  ;;  %v2379_v48 = vor.u32 1.1754944e-38, %v2378_v28 }
 0x256   :  { %v7773_v54 = vpop.permute.xlu1 %3176  ;;  %3196 = vrot.lane.b32.xlu2 %v5452_v55, %s5693_s11  ;;  %v7782_v21 = vpop.eup %5457  ;;  %v7812_v13 = vadd.f32 1.0, %v5456_v26  ;;  %vm2377_vm11 = vcmp.eq.f32.partialorder %v2376_v2, 8.507059e+37  ;;  %vm2387_vm4 = vweird.f32 %v7739_v10 }
 0x257   :  { %v7777_v23 = vpop.permute.xlu0 %3468  ;;  %v7807_v14 = vpop.eup %5459  ;;  %v2143_v41 = vmul.f32 %v7782_v21, %v7730_v20  ;;  %10180 = vst [vmem:[#allocation14_spill] sm:$0xff] %v7820_v8  ;;  %v7859_v31 = vsel %vm2377_vm11, %v2379_v48, %v2375_v44  ;;  %vm2148_vm15 = vweird.f32 %v7782_v21  ;;  %v2136_v44 = vand.u32 2147483647, %v7716_v36 }
 0x258   :  { %v7805_v55 = vpop.permute.xlu2 %3472  ;;  %v5462_v51 = vpop.eup %5461  ;;  %v2383_v45 = vmul.f32 %v7807_v14, %v7739_v10  ;;  %5469 = vrcp.f32 %v7812_v13  ;;  %10186 = vst [vmem:[#allocation110_spill] sm:$0xff] %v7859_v31  ;;  %v3345_v2 = vmul.f32 %v7536_v3, %v7859_v31  ;;  %vm2388_vm1 = vweird.f32 %v7807_v14  ;;  %vm7917_vm2 = vmor %vm2147_vm14, %vm2148_vm15 }
 0x259   :  { %v5464_v0 = vpop.eup %5463  ;;  %v2144_v22 = vsub.f32 1.0, %v2143_v41  ;;  %5471 = vtanh.f32 %v7820_v8  ;;  %v4972_v41 = vmul.f32 -1.442695, %v7251_v4  ;;  %vm2137_vm3 = vcmp.eq.f32.partialorder %v2136_v44, 8.507059e+37  ;;  %vm7935_vm5 = vmor %vm2387_vm4, %vm2388_vm1 }
 0x25a   :  { %v5466_v26 = vpop.eup %5465  ;;  %v7849_v25 = vadd.f32 1.0, %v5464_v0  ;;  %5473 = vpow2.f32 %v4971_v30  ;;  %v2384_v53 = vsub.f32 1.0, %v2383_v45  ;;  %vm2402_vm10 = vweird.f32 %v7812_v13 }
 0x25b   :  { %v7852_v37 = vadd.f32 1.0, %v5466_v26  ;;  %v5468_v28 = vpop.eup %5467 }
 0x25c   :  { %3488 = vrot.lane.b32.xlu1 %v3328_v46, %s5693_s11  ;;  %v2994_v46 = vmul.f32 %v10184_v19, %v7084_v32  ;;  %v2385_v4 = vmul.f32 %v7807_v14, %v2384_v53  ;;  %vm2417_vm9 = vweird.f32 %v7849_v25 }
 0x25d   :  { %3198 = vrot.lane.b32.xlu0 %v5462_v51, %s5693_s11  ;;  %v4988_v51 = vmul.f32 -1.442695, %v7238_v52  ;;  %v2130_v52 = vmul.f32 %v7765_v34, %v2129_v35  ;;  %v2145_v35 = vmul.f32 %v7782_v21, %v2144_v22  ;;  %v2153_v22 = vand.u32 2147483648, %v7730_v20 }
 0x25e   :  { %v7838_v38 = vpop.permute.xlu1 %3822  ;;  %3520 = vrot.lane.b32.xlu2 %v3344_v56, %s5693_s11  ;;  %v7857_v29 = vadd.f32 %v7480_v47, %v2994_v46  ;;  %v7873_v30 = vpop.eup %5469  ;;  %v2138_v56 = vand.u32 2147483648, %v7716_v36  ;;  %vm2162_vm15 = vweird.f32 %v7852_v37 }
 0x25f   :  { %v7846_v43 = vpop.permute.xlu0 %3210  ;;  %5475 = vpow2.f32 %v4988_v51  ;;  %v2131_v47 = vadd.f32 %v7765_v34, %v2130_v52  ;;  %v5472_v26 = vpop.eup %5471  ;;  %v2146_v19 = vadd.f32 %v7782_v21, %v2145_v35  ;;  %v2151_v52 = vand.u32 2147483647, %v7730_v20 }
 0x260   :  { %10185 = vst [vmem:[#allocation26_spill] sm:$0xff] %v7857_v29  ;;  %v7861_v0 = vpop.permute.xlu2 %3214  ;;  %5477 = vrcp.f32 %v7849_v25  ;;  %v5474_v51 = vpop.eup %5473  ;;  %v2398_v36 = vmul.f32 %v7873_v30, %v7812_v13  ;;  %vm2403_vm8 = vweird.f32 %v7873_v30 }
 0x261   :  { %5479 = vrcp.f32 %v7852_v37  ;;  %v2135_v53 = vsel %vm7889_vm0, %v7765_v34, %v2131_v47  ;;  %v2393_v47 = vand.u32 2147483648, %v7739_v10  ;;  %v2150_v46 = vsel %vm7917_vm2, %v7782_v21, %v2146_v19  ;;  %v10195_v34 = vld [vmem:[#allocation92_spill] sm:$0xff]  ;;  %vm8009_vm12 = vmor %vm2402_vm10, %vm2403_vm8 }
 0x262   :  { %5481 = vtanh.f32 %v7857_v29  ;;  %v7911_v29 = vadd.f32 1.0, %v5474_v51  ;;  %v2391_v51 = vand.u32 2147483647, %v7739_v10  ;;  %v2399_v44 = vsub.f32 1.0, %v2398_v36 }
 0x263   :  { %5483 = vpow2.f32 %v4972_v41  ;;  %v4003_v41 = vmul.f32 %v7590_v5, %v6548_v60  ;;  %v2154_v60 = vor.u32 1.1754944e-38, %v2153_v22  ;;  %v2139_v5 = vor.u32 1.1754944e-38, %v2138_v56 }
 0x264   :  { %3230 = vrot.lane.b32.xlu1 %v5468_v28, %s5693_s11  ;;  %v4989_v22 = vmul.f32 -1.442695, %v7295_v57  ;;  %vm2152_vm6 = vcmp.eq.f32.partialorder %v2151_v52, 8.507059e+37  ;;  %5485 = vrcp.f32 %v7911_v29  ;;  %vm2392_vm7 = vcmp.eq.f32.partialorder %v2391_v51, 8.507059e+37  ;;  %v10200_v51 = vld [vmem:[#allocation70_spill] sm:$0xff] }
 0x265   :  { %3522 = vrot.lane.b32.xlu0 %v3345_v2, %s5693_s11  ;;  %v5476_v48 = vpop.eup %5475  ;;  %v2386_v2 = vadd.f32 %v7807_v14, %v2385_v4  ;;  %v7931_v56 = vsel %vm2137_vm3, %v2139_v5, %v2135_v53  ;;  %v10194_v53 = vld [vmem:[#allocation74_spill] sm:$0xff]  ;;  %v10196_v5 = vld [vmem:[#allocation25_spill] sm:$0xff]  ;;  %v7959_v32 = vsel %vm2152_vm6, %v2154_v60, %v2150_v46  ;;  %vm2177_vm4 = vweird.f32 %v7911_v29 }
 0x266   :  { %v7877_v3 = vpop.permute.xlu1 %3470  ;;  %3842 = vrot.lane.b32.xlu2 %v5472_v26, %s5693_s11  ;;  %v7899_v28 = vpop.eup %5477  ;;  %v7928_v8 = vadd.f32 1.0, %v5476_v48  ;;  %10191 = vst [vmem:[#allocation111_spill] sm:$0xff] %v7931_v56  ;;  %v3329_v10 = vmul.f32 %v7616_v40, %v7931_v56  ;;  %v2995_v31 = vmul.f32 %v10196_v5, %v10195_v34  ;;  %5487 = vpow2.f32 %v4989_v22 }
 0x267   :  { %v7882_v45 = vpop.permute.xlu0 %3180  ;;  %v7909_v26 = vpop.eup %5479  ;;  %v2413_v21 = vmul.f32 %v7899_v28, %v7849_v25  ;;  %v2390_v57 = vsel %vm7935_vm5, %v7807_v14, %v2386_v2  ;;  %10197 = vst [vmem:[#allocation74_spill] sm:$0xff] %v7959_v32  ;;  %v3330_v46 = vmul.f32 %v7564_v27, %v7959_v32  ;;  %v4004_v22 = vmul.f32 %v7661_v6, %v10200_v51  ;;  %v10208_v32 = vld [vmem:[#allocation73_spill] sm:$0xff] }
 0x268   :  { %v7907_v35 = vpop.permute.xlu2 %3184  ;;  %v5482_v4 = vpop.eup %5481  ;;  %v2158_v19 = vmul.f32 %v7909_v26, %v7852_v37  ;;  %v7963_v14 = vadd.f32 %v7620_v12, %v2995_v31  ;;  %5489 = vrcp.f32 %v7928_v8  ;;  %v4990_v12 = vmul.f32 -1.442695, %v7344_v58 }
 0x269   :  { %v5484_v20 = vpop.eup %5483  ;;  %v2414_v2 = vsub.f32 1.0, %v2413_v21  ;;  %vm2418_vm11 = vweird.f32 %v7899_v28  ;;  %v2423_v51 = vand.u32 2147483648, %v7849_v25  ;;  %vm2163_vm13 = vweird.f32 %v7909_v26 }
 0x26a   :  { %v7957_v40 = vadd.f32 1.0, %v5484_v20  ;;  %10198 = vst [vmem:[#allocation25_spill] sm:$0xff] %v7963_v14  ;;  %v2400_v20 = vmul.f32 %v7873_v30, %v2399_v44  ;;  %v4005_v34 = vmul.f32 %v7608_v61, %v10208_v32  ;;  %vm8034_vm14 = vmor %vm2417_vm9, %vm2418_vm11  ;;  %vm2432_vm11 = vweird.f32 %v7928_v8 }
 0x26b   :  { %v2415_v31 = vmul.f32 %v7899_v28, %v2414_v2  ;;  %v2424_v32 = vor.u32 1.1754944e-38, %v2423_v51  ;;  %vm8049_vm1 = vmor %vm2162_vm15, %vm2163_vm13 }
 0x26c   :  { %4134 = vrot.lane.b32.xlu1 %v4003_v41, %s5694_s2  ;;  %v4973_v41 = vmul.f32 -1.442695, %v10194_v53  ;;  %v2401_v27 = vadd.f32 %v7873_v30, %v2400_v20  ;;  %v10203_v53 = vld [vmem:[#allocation15_spill] sm:$0xff] }
 0x26d   :  { %3844 = vrot.lane.b32.xlu0 %v5482_v4, %s5693_s11  ;;  %v2394_v4 = vor.u32 1.1754944e-38, %v2393_v47  ;;  %v2159_v47 = vsub.f32 1.0, %v2158_v19  ;;  %v10202_v19 = vld [vmem:[#allocation29_spill] sm:$0xff]  ;;  %v2416_v20 = vadd.f32 %v7899_v28, %v2415_v31 }
 0x26e   :  { %v7949_v48 = vpop.permute.xlu1 %3212  ;;  %3490 = vrot.lane.b32.xlu2 %v3329_v10, %s5693_s11  ;;  %5491 = vpow2.f32 %v4973_v41  ;;  %v10204_v41 = vld [vmem:[#allocation17_spill] sm:$0xff]  ;;  %v2405_v31 = vsel %vm8009_vm12, %v7873_v30, %v2401_v27  ;;  %v2166_v27 = vand.u32 2147483647, %v7852_v37 }
 0x26f   :  { %v7954_v50 = vpop.permute.xlu0 %3826  ;;  %v7965_v52 = vsel %vm2392_vm7, %v2394_v4, %v2390_v57  ;;  %5493 = vrcp.f32 %v7957_v40  ;;  %v2160_v21 = vmul.f32 %v7909_v26, %v2159_v47  ;;  %v10201_v57 = vld [vmem:[#allocation72_spill] sm:$0xff]  ;;  %v2996_v5 = vmul.f32 %v10204_v41, %v10203_v53 }
 0x270   :  { %10199 = vst [vmem:[#allocation112_spill] sm:$0xff] %v7965_v52  ;;  %v3346_v36 = vmul.f32 %v7668_v16, %v7965_v52  ;;  %v7971_v60 = vpop.permute.xlu2 %3830  ;;  %5495 = vtanh.f32 %v7963_v14  ;;  %v7981_v16 = vpop.eup %5485  ;;  %v2997_v44 = vmul.f32 %v10202_v19, %v10201_v57  ;;  %v2408_v4 = vand.u32 2147483648, %v7812_v13  ;;  %v10207_v57 = vld [vmem:[#allocation94_spill] sm:$0xff] }
 0x271   :  { %v5488_v10 = vpop.eup %5487  ;;  %5497 = vpow2.f32 %v4990_v12  ;;  %v4974_v53 = vmul.f32 -1.442695, %v10207_v57  ;;  %v2168_v52 = vand.u32 2147483648, %v7852_v37  ;;  %v2420_v61 = vsel %vm8034_vm14, %v7899_v28, %v2416_v20 }
 0x272   :  { %v7997_v6 = vpop.eup %5489  ;;  %v8028_v56 = vadd.f32 1.0, %v5488_v10  ;;  %v8045_v10 = vadd.f32 %v7700_v59, %v2996_v5  ;;  %vm2167_vm3 = vcmp.eq.f32.partialorder %v2166_v27, 8.507059e+37  ;;  %vm2178_vm5 = vweird.f32 %v7981_v16 }
 0x273   :  { %v2428_v5 = vmul.f32 %v7997_v6, %v7928_v8  ;;  %5499 = vpow2.f32 %v4974_v53  ;;  %v2169_v20 = vor.u32 1.1754944e-38, %v2168_v52  ;;  %v8082_v53 = vadd.f32 %v7634_v33, %v2997_v44  ;;  %vm8112_vm6 = vmor %vm2177_vm4, %vm2178_vm5 }
 0x274   :  { %3524 = vrot.lane.b32.xlu1 %v3346_v36, %s5693_s11  ;;  %v2406_v36 = vand.u32 2147483647, %v7812_v13  ;;  %v5492_v47 = vpop.eup %5491  ;;  %v2161_v13 = vadd.f32 %v7909_v26, %v2160_v21  ;;  %v2409_v21 = vor.u32 1.1754944e-38, %v2408_v4  ;;  %10211 = vst [vmem:[#allocation70_spill] sm:$0xff] %v8045_v10  ;;  %5501 = vrcp.f32 %v8028_v56 }
 0x275   :  { %3492 = vrot.lane.b32.xlu0 %v3330_v46, %s5693_s11  ;;  %v2421_v46 = vand.u32 2147483647, %v7849_v25  ;;  %v8013_v19 = vpop.eup %5493  ;;  %5503 = vtanh.f32 %v8045_v10  ;;  %10216 = vst [vmem:[#allocation17_spill] sm:$0xff] %v8082_v53  ;;  %v2183_v44 = vand.u32 2147483648, %v7911_v29  ;;  %vm2192_vm7 = vweird.f32 %v7957_v40 }
 0x276   :  { %v7988_v58 = vpop.permute.xlu1 %3182  ;;  %4136 = vrot.lane.b32.xlu2 %v4004_v22, %s5694_s2  ;;  %v2173_v22 = vmul.f32 %v7981_v16, %v7911_v29  ;;  %v5496_v14 = vpop.eup %5495  ;;  %vm2407_vm0 = vcmp.eq.f32.partialorder %v2406_v36, 8.507059e+37  ;;  %v8065_v36 = vadd.f32 1.0, %v5492_v47  ;;  %vm2433_vm9 = vweird.f32 %v7997_v6 }
 0x277   :  { %v7995_v2 = vpop.permute.xlu0 %3474  ;;  %v8053_v57 = vsel %vm2407_vm0, %v2409_v21, %v2405_v31  ;;  %v5498_v37 = vpop.eup %5497  ;;  %vm2422_vm2 = vcmp.eq.f32.partialorder %v2421_v46, 8.507059e+37  ;;  %v2429_v46 = vsub.f32 1.0, %v2428_v5  ;;  %v10217_v21 = vld [vmem:[#allocation97_spill] sm:$0xff]  ;;  %vm2193_vm10 = vweird.f32 %v8013_v19  ;;  %vm8162_vm12 = vmor %vm2432_vm11, %vm2433_vm9 }
 0x278   :  { %v8022_v41 = vpop.permute.xlu2 %3478  ;;  %v3347_v28 = vmul.f32 %v7728_v18, %v8053_v57  ;;  %v2174_v59 = vsub.f32 1.0, %v2173_v22  ;;  %v8074_v18 = vadd.f32 1.0, %v5498_v37  ;;  %5505 = vrcp.f32 %v8065_v36  ;;  %vm8171_vm13 = vmor %vm2192_vm7, %vm2193_vm10 }
 0x279   :  { %v4975_v30 = vmul.f32 -1.442695, %v10217_v21  ;;  %v5500_v33 = vpop.eup %5499  ;;  %v2430_v25 = vmul.f32 %v7997_v6, %v2429_v46  ;;  %v10224_v21 = vld [vmem:[#allocation75_spill] sm:$0xff] }
 0x27a   :  { %v2175_v31 = vmul.f32 %v7981_v16, %v2174_v59  ;;  %v10226_v59 = vld [vmem:[#allocation9_spill] sm:$0xff]  ;;  %vm2462_vm7 = vweird.f32 %v8074_v18 }
 0x27c   :  { %3846 = vrot.lane.b32.xlu1 %v5496_v14, %s5693_s11  ;;  %v2165_v14 = vsel %vm8049_vm1, %v7909_v26, %v2161_v13  ;;  %v10214_v26 = vld [vmem:[#allocation79_spill] sm:$0xff]  ;;  %v8076_v13 = vsel %vm2422_vm2, %v2424_v32, %v2420_v61  ;;  %v8100_v32 = vpop.eup %5501  ;;  %vm2207_vm1 = vweird.f32 %v8065_v36 }
 0x27d   :  { %4138 = vrot.lane.b32.xlu0 %v4005_v34, %s5694_s2  ;;  %v2188_v34 = vmul.f32 %v8013_v19, %v7957_v40  ;;  %v4991_v12 = vmul.f32 -1.442695, %v10214_v26  ;;  %10215 = vst [vmem:[#allocation29_spill] sm:$0xff] %v8076_v13  ;;  %v8079_v52 = vsel %vm2167_vm3, %v2169_v20, %v2165_v14  ;;  %v3348_v27 = vmul.f32 %v7681_v49, %v8076_v13  ;;  %v5504_v14 = vpop.eup %5503  ;;  %v10221_v26 = vld [vmem:[#allocation28_spill] sm:$0xff] }
 0x27e   :  { %v8063_v4 = vpop.permute.xlu1 %3828  ;;  %3526 = vrot.lane.b32.xlu2 %v3347_v28, %s5693_s11  ;;  %v3331_v47 = vmul.f32 %v7704_v24, %v8079_v52  ;;  %v2181_v24 = vand.u32 2147483647, %v7911_v29  ;;  %v2176_v49 = vadd.f32 %v7981_v16, %v2175_v31  ;;  %v8118_v20 = vadd.f32 1.0, %v5500_v33 }
 0x27f   :  { %v8069_v51 = vpop.permute.xlu0 %3216  ;;  %v2189_v61 = vsub.f32 1.0, %v2188_v34  ;;  %5507 = vpow2.f32 %v4991_v12  ;;  %v10220_v34 = vld [vmem:[#allocation93_spill] sm:$0xff]  ;;  %v2184_v29 = vor.u32 1.1754944e-38, %v2183_v44  ;;  %v2443_v33 = vmul.f32 %v8100_v32, %v8028_v56 }
 0x280   :  { %v8087_v22 = vpop.permute.xlu2 %3220  ;;  %5509 = vrcp.f32 %v8074_v18  ;;  %v2998_v12 = vmul.f32 %v10221_v26, %v10220_v34  ;;  %vm8126_vm8 = vcmp.eq.f32.partialorder %v2181_v24, 8.507059e+37  ;;  %v10225_v44 = vld [vmem:[#allocation21_spill] sm:$0xff]  ;;  %vm2448_vm0 = vweird.f32 %v8100_v32 }
 0x281   :  { %5511 = vtanh.f32 %v8082_v53  ;;  %v2190_v28 = vmul.f32 %v8013_v19, %v2189_v61  ;;  %v2431_v61 = vadd.f32 %v7997_v6, %v2430_v25  ;;  %v4992_v26 = vmul.f32 -1.442695, %v10225_v44 }
 0x282   :  { %5513 = vpow2.f32 %v4975_v30  ;;  %v4006_v30 = vmul.f32 %v7735_v7, %v10224_v21  ;;  %v2438_v7 = vand.u32 2147483648, %v7928_v8  ;;  %v2436_v25 = vand.u32 2147483647, %v7928_v8  ;;  %v10236_v8 = vld [vmem:[#allocation20_spill] sm:$0xff] }
 0x283   :  { %v2191_v53 = vadd.f32 %v8013_v19, %v2190_v28  ;;  %5515 = vrcp.f32 %v8118_v20  ;;  %v2196_v28 = vand.u32 2147483647, %v7957_v40  ;;  %vm2447_vm3 = vweird.f32 %v8028_v56 }
 0x284   :  { %3494 = vrot.lane.b32.xlu1 %v3331_v47, %s5693_s11  ;;  %v8123_v47 = vpop.eup %5505  ;;  %5517 = vpow2.f32 %v4992_v26  ;;  %vm2437_vm14 = vcmp.eq.f32.partialorder %v2436_v25, 8.507059e+37  ;;  %v10234_v25 = vld [vmem:[#allocation101_spill] sm:$0xff]  ;;  %vm8246_vm4 = vmor %vm2447_vm3, %vm2448_vm0  ;;  %vm4320_vm0 = vcmask 261120  }
 0x285   :  { %3528 = vrot.lane.b32.xlu0 %v3348_v27, %s5693_s11  ;;  %v5508_v46 = vpop.eup %5507  ;;  %v2180_v27 = vsel %vm8112_vm6, %v7981_v16, %v2176_v49  ;;  %v4976_v16 = vmul.f32 -1.442695, %v10226_v59  ;;  %v2198_v49 = vand.u32 2147483648, %v7957_v40  ;;  %v2195_v40 = vsel %vm8171_vm13, %v8013_v19, %v2191_v53  ;;  %v10235_v59 = vld [vmem:[#allocation18_spill] sm:$0xff] }
 0x286   :  { %v8105_v37 = vpop.permute.xlu1 %3476  ;;  %3848 = vrot.lane.b32.xlu2 %v5504_v14, %s5693_s11  ;;  %v8141_v14 = vpop.eup %5509  ;;  %v8153_v44 = vadd.f32 1.0, %v5508_v46  ;;  %v8158_v34 = vsel %vm8126_vm8, %v2184_v29, %v2180_v27  ;;  %v2435_v29 = vsel %vm8162_vm12, %v7997_v6, %v2431_v61  ;;  %v2203_v46 = vmul.f32 %v8123_v47, %v8065_v36 }
 0x287   :  { %v8116_v5 = vpop.permute.xlu0 %3186  ;;  %v5512_v21 = vpop.eup %5511  ;;  %10227 = vst [vmem:[#allocation94_spill] sm:$0xff] %v8158_v34  ;;  %v3332_v31 = vmul.f32 %v7773_v54, %v8158_v34  ;;  %v2458_v13 = vmul.f32 %v8141_v14, %v8074_v18  ;;  %5519 = vpow2.f32 %v4976_v16  ;;  %v2199_v6 = vor.u32 1.1754944e-38, %v2198_v49 }
 0x288   :  { %v8139_v24 = vpop.permute.xlu2 %3190  ;;  %v5514_v10 = vpop.eup %5513  ;;  %vm2197_vm15 = vcmp.eq.f32.partialorder %v2196_v28, 8.507059e+37  ;;  %v8195_v61 = vadd.f32 %v7777_v23, %v2998_v12  ;;  %v2204_v26 = vsub.f32 1.0, %v2203_v46  ;;  %5521 = vrcp.f32 %v8153_v44 }
 0x289   :  { %v8191_v34 = vadd.f32 1.0, %v5514_v10  ;;  %v8199_v19 = vsel %vm2197_vm15, %v2199_v6, %v2195_v40  ;;  %v8206_v16 = vpop.eup %5515  ;;  %v4993_v49 = vmul.f32 -1.442695, %v7492_v1  ;;  %v2459_v12 = vsub.f32 1.0, %v2458_v13  ;;  %v10237_v1 = vld [vmem:[#allocation76_spill] sm:$0xff]  ;;  %v10238_v40 = vld [vmem:[#allocation95_spill] sm:$0xff] }
 0x28a   :  { %10232 = vst [vmem:[#allocation73_spill] sm:$0xff] %v8195_v61  ;;  %v3333_v23 = vmul.f32 %v7714_v63, %v8199_v19  ;;  %v4977_v28 = vmul.f32 -1.442695, %v10234_v25  ;;  %v4007_v46 = vmul.f32 %v7838_v38, %v10237_v1  ;;  %v2205_v63 = vmul.f32 %v8123_v47, %v2204_v26 }
 0x28b   :  { %10233 = vst [vmem:[#allocation79_spill] sm:$0xff] %v8199_v19  ;;  %5523 = vrcp.f32 %v8191_v34  ;;  %vm2208_vm2 = vweird.f32 %v8123_v47  ;;  %v2451_v38 = vand.u32 2147483647, %v8028_v56  ;;  %v2218_v1 = vmul.f32 %v8206_v16, %v8118_v20 }
 0x28c   :  { %4140 = vrot.lane.b32.xlu1 %v4006_v30, %s5694_s2  ;;  %v2444_v30 = vsub.f32 1.0, %v2443_v33  ;;  %5525 = vtanh.f32 %v8195_v61  ;;  %vm2463_vm5 = vweird.f32 %v8141_v14  ;;  %vm8269_vm6 = vmor %vm2207_vm1, %vm2208_vm2  ;;  %vm2222_vm12 = vweird.f32 %v8118_v20 }
 0x28d   :  { %3850 = vrot.lane.b32.xlu0 %v5512_v21, %s5693_s11  ;;  %v2439_v21 = vor.u32 1.1754944e-38, %v2438_v7  ;;  %5527 = vpow2.f32 %v4993_v49  ;;  %vm2452_vm8 = vcmp.eq.f32.partialorder %v2451_v38, 8.507059e+37  ;;  %vm8283_vm9 = vmor %vm2462_vm7, %vm2463_vm5  ;;  %vm2223_vm13 = vweird.f32 %v8206_v16 }
 0x28e   :  { %v8182_v27 = vpop.permute.xlu1 %3218  ;;  %3496 = vrot.lane.b32.xlu2 %v3332_v31, %s5693_s11  ;;  %v2445_v10 = vmul.f32 %v8100_v32, %v2444_v30  ;;  %v2999_v31 = vmul.f32 %v10236_v8, %v10235_v59  ;;  %5529 = vpow2.f32 %v4977_v28  ;;  %v2219_v8 = vsub.f32 1.0, %v2218_v1  ;;  %vm8358_vm15 = vmor %vm2222_vm12, %vm2223_vm13 }
 0x28f   :  { %v8189_v54 = vpop.permute.xlu0 %3832  ;;  %v8197_v33 = vsel %vm2437_vm14, %v2439_v21, %v2435_v29  ;;  %v10239_v21 = vld [vmem:[#allocation32_spill] sm:$0xff]  ;;  %vm2237_vm14 = vweird.f32 %v8191_v34  ;;  %vm4385_vm2 = vcmask 523520  }
 0x290   :  { %v3349_v53 = vmul.f32 %v7846_v43, %v8197_v33  ;;  %v8204_v7 = vpop.permute.xlu2 %3836  ;;  %v5518_v43 = vpop.eup %5517  ;;  %v2446_v13 = vadd.f32 %v8100_v32, %v2445_v10  ;;  %v3000_v6 = vmul.f32 %v10239_v21, %v10238_v40  ;;  %v10242_v40 = vld [vmem:[#allocation78_spill] sm:$0xff] }
 0x291   :  { %v5520_v29 = vpop.eup %5519  ;;  %v8241_v49 = vadd.f32 1.0, %v5518_v43  ;;  %v4008_v59 = vmul.f32 %v7745_v17, %v10242_v40  ;;  %v8278_v40 = vadd.f32 %v7877_v3, %v2999_v31 }
 0x292   :  { %v8237_v26 = vpop.eup %5521  ;;  %v8239_v10 = vadd.f32 1.0, %v5520_v29  ;;  %v2211_v29 = vand.u32 2147483647, %v8065_v36  ;;  %v2450_v43 = vsel %vm8246_vm4, %v8100_v32, %v2446_v13  ;;  %v2466_v32 = vand.u32 2147483647, %v8074_v18 }
 0x293   :  { %v2468_v13 = vand.u32 2147483648, %v8074_v18  ;;  %10245 = vst [vmem:[#allocation97_spill] sm:$0xff] %v8278_v40  ;;  %v2473_v31 = vmul.f32 %v8237_v26, %v8153_v44  ;;  %5531 = vrcp.f32 %v8241_v49  ;;  %vm2478_vm3 = vweird.f32 %v8237_v26 }
 0x294   :  { %3530 = vrot.lane.b32.xlu1 %v3349_v53, %s5693_s11  ;;  %v2460_v53 = vmul.f32 %v8141_v14, %v2459_v12  ;;  %v2213_v12 = vand.u32 2147483648, %v8065_v36  ;;  %vm8290_vm10 = vcmp.eq.f32.partialorder %v2211_v29, 8.507059e+37  ;;  %5533 = vrcp.f32 %v8239_v10  ;;  %v10250_v29 = vld [vmem:[#allocation84_spill] sm:$0xff] }
 0x295   :  { %3498 = vrot.lane.b32.xlu0 %v3333_v23, %s5693_s11  ;;  %v2453_v23 = vand.u32 2147483648, %v8028_v56  ;;  %v8252_v56 = vpop.eup %5523  ;;  %v2469_v28 = vor.u32 1.1754944e-38, %v2468_v13  ;;  %vm2467_vm11 = vcmp.eq.f32.partialorder %v2466_v32, 8.507059e+37  ;;  %5535 = vtanh.f32 %v8278_v40 }
 0x296   :  { %v8224_v30 = vpop.permute.xlu1 %3188  ;;  %4142 = vrot.lane.b32.xlu2 %v4007_v46, %s5694_s2  ;;  %v2206_v46 = vadd.f32 %v8123_v47, %v2205_v63  ;;  %v5526_v61 = vpop.eup %5525  ;;  %v2461_v19 = vadd.f32 %v8141_v14, %v2460_v53  ;;  %v2214_v53 = vor.u32 1.1754944e-38, %v2213_v12  ;;  %v2233_v12 = vmul.f32 %v8252_v56, %v8191_v34 }
 0x297   :  { %v8230_v25 = vpop.permute.xlu0 %3480  ;;  %v2454_v63 = vor.u32 1.1754944e-38, %v2453_v23  ;;  %v5528_v17 = vpop.eup %5527  ;;  %v2474_v13 = vsub.f32 1.0, %v2473_v31  ;;  %v2228_v31 = vand.u32 2147483648, %v8118_v20  ;;  %vm2238_vm1 = vweird.f32 %v8252_v56 }
 0x298   :  { %v8259_v21 = vpop.permute.xlu2 %3484  ;;  %v2210_v18 = vsel %vm8269_vm6, %v8123_v47, %v2206_v46  ;;  %v2465_v47 = vsel %vm8283_vm9, %v8141_v14, %v2461_v19  ;;  %v5530_v46 = vpop.eup %5529  ;;  %v2220_v14 = vmul.f32 %v8206_v16, %v2219_v8  ;;  %v8321_v19 = vadd.f32 %v7805_v55, %v3000_v6  ;;  %vm8389_vm4 = vmor %vm2237_vm14, %vm2238_vm1 }
 0x299   :  { %v8280_v36 = vsel %vm2452_vm8, %v2454_v63, %v2450_v43  ;;  %v4978_v43 = vmul.f32 -1.442695, %v10250_v29  ;;  %v8323_v63 = vsel %vm2467_vm11, %v2469_v28, %v2465_v47  ;;  %v8329_v32 = vadd.f32 1.0, %v5530_v46  ;;  %v8335_v55 = vpop.eup %5531  ;;  %v10254_v47 = vld [vmem:[#allocation31_spill] sm:$0xff] }
 0x29a   :  { %v3350_v3 = vmul.f32 %v7949_v48, %v8280_v36  ;;  %v8310_v48 = vadd.f32 1.0, %v5528_v17  ;;  %10251 = vst [vmem:[#allocation28_spill] sm:$0xff] %v8321_v19  ;;  %v4995_v8 = vmul.f32 -1.442695, %v7597_v11  ;;  %v8342_v6 = vpop.eup %5533  ;;  %v2475_v11 = vmul.f32 %v8237_v26, %v2474_v13 }
 0x29b   :  { %10252 = vst [vmem:[#allocation75_spill] sm:$0xff] %v8323_v63  ;;  %v2241_v29 = vand.u32 2147483647, %v8191_v34  ;;  %vm2477_vm6 = vweird.f32 %v8153_v44  ;;  %vm2252_vm11 = vweird.f32 %v8239_v10  ;;  %vm2253_vm12 = vweird.f32 %v8342_v6 }
 0x29c   :  { %3852 = vrot.lane.b32.xlu1 %v5526_v61, %s5693_s11  ;;  %v5536_v61 = vpop.eup %5535  ;;  %vm8411_vm7 = vmor %vm2477_vm6, %vm2478_vm3  ;;  %vm2492_vm13 = vweird.f32 %v8241_v49  ;;  %vm2507_vm3 = vweird.f32 %v8310_v48 }
 0x29d   :  { %4144 = vrot.lane.b32.xlu0 %v4008_v59, %s5694_s2  ;;  %v4994_v59 = vmul.f32 -1.442695, %v7528_v39  ;;  %v8317_v39 = vsel %vm8290_vm10, %v2214_v53, %v2210_v18  ;;  %v3351_v53 = vmul.f32 %v7861_v0, %v8323_v63  ;;  %v2234_v18 = vsub.f32 1.0, %v2233_v12  ;;  %vm8512_vm1 = vmor %vm2252_vm11, %vm2253_vm12 }
 0x29e   :  { %v8298_v38 = vpop.permute.xlu1 %3834  ;;  %3532 = vrot.lane.b32.xlu2 %v3350_v3, %s5693_s11  ;;  %v3334_v17 = vmul.f32 %v7882_v45, %v8317_v39  ;;  %v2221_v45 = vadd.f32 %v8206_v16, %v2220_v14  ;;  %v2243_v14 = vand.u32 2147483648, %v8191_v34  ;;  %vm2242_vm8 = vcmp.eq.f32.partialorder %v2241_v29, 8.507059e+37 }
 0x29f   :  { %v8307_v1 = vpop.permute.xlu0 %3222  ;;  %5537 = vpow2.f32 %v4994_v59  ;;  %v2235_v3 = vmul.f32 %v8252_v56, %v2234_v18  ;;  %v10253_v59 = vld [vmem:[#allocation96_spill] sm:$0xff]  ;;  %vm2493_vm10 = vweird.f32 %v8335_v55 }
 0x2a0   :  { %v8327_v23 = vpop.permute.xlu2 %3226  ;;  %5539 = vpow2.f32 %v4978_v43  ;;  %v3001_v12 = vmul.f32 %v10254_v47, %v10253_v59  ;;  %v2226_v43 = vand.u32 2147483647, %v8118_v20  ;;  %v2488_v20 = vmul.f32 %v8335_v55, %v8241_v49  ;;  %vm8489_vm14 = vmor %vm2492_vm13, %vm2493_vm10 }
 0x2a1   :  { %5541 = vrcp.f32 %v8310_v48  ;;  %v2244_v59 = vor.u32 1.1754944e-38, %v2243_v14  ;;  %v2248_v14 = vmul.f32 %v8342_v6, %v8239_v10 }
 0x2a2   :  { %5543 = vtanh.f32 %v8321_v19  ;;  %v2236_v19 = vadd.f32 %v8252_v56, %v2235_v3  ;;  %vm2227_vm5 = vcmp.eq.f32.partialorder %v2226_v43, 8.507059e+37  ;;  %v2481_v3 = vand.u32 2147483647, %v8153_v44 }
 0x2a3   :  { %5545 = vrcp.f32 %v8329_v32 }
 0x2a4   :  { %3500 = vrot.lane.b32.xlu1 %v3334_v17, %s5693_s11  ;;  %5547 = vpow2.f32 %v4995_v8  ;;  %v2225_v17 = vsel %vm8358_vm15, %v8206_v16, %v2221_v45  ;;  %v2476_v8 = vadd.f32 %v8237_v26, %v2475_v11  ;;  %v2229_v16 = vor.u32 1.1754944e-38, %v2228_v31  ;;  %v10258_v11 = vld [vmem:[#allocation103_spill] sm:$0xff]  ;;  %v10261_v31 = vld [vmem:[#allocation66_spill] sm:$0xff] }
 0x2a5   :  { %3534 = vrot.lane.b32.xlu0 %v3351_v53, %s5693_s11  ;;  %v5538_v28 = vpop.eup %5537  ;;  %v10257_v53 = vld [vmem:[#allocation80_spill] sm:$0xff]  ;;  %v2483_v45 = vand.u32 2147483648, %v8153_v44  ;;  %vm2482_vm9 = vcmp.eq.f32.partialorder %v2481_v3, 8.507059e+37 }
 0x2a6   :  { %v8346_v0 = vpop.permute.xlu1 %3482  ;;  %3854 = vrot.lane.b32.xlu2 %v5536_v61, %s5693_s11  ;;  %v5540_v13 = vpop.eup %5539  ;;  %v4009_v18 = vmul.f32 %v7954_v50, %v10257_v53  ;;  %v4979_v53 = vmul.f32 -1.442695, %v10258_v11  ;;  %v8405_v11 = vadd.f32 1.0, %v5538_v28  ;;  %v8407_v43 = vsel %vm2227_vm5, %v2229_v16, %v2225_v17 }
 0x2a7   :  { %v8353_v46 = vpop.permute.xlu0 %3192  ;;  %v8375_v47 = vpop.eup %5541  ;;  %v8403_v34 = vadd.f32 1.0, %v5540_v13  ;;  %v2480_v28 = vsel %vm8411_vm7, %v8237_v26, %v2476_v8  ;;  %v2489_v17 = vsub.f32 1.0, %v2488_v20  ;;  %v2240_v16 = vsel %vm8389_vm4, %v8252_v56, %v2236_v19 }
 0x2a8   :  { %v4131_v61 = vpop.permute.xlu2 %4130  ;;  %v5544_v50 = vpop.eup %5543  ;;  %v2503_v63 = vmul.f32 %v8375_v47, %v8310_v48  ;;  %5549 = vpow2.f32 %v4979_v53  ;;  %v4996_v26 = vmul.f32 -1.442695, %v7647_v42  ;;  %v8436_v8 = vadd.f32 %v7995_v2, %v3001_v12  ;;  %v10265_v53 = vld [vmem:[#allocation81_spill] sm:$0xff] }
 0x2a9   :  { %4322 = vst.msk [vmem:[%s9827_s4 + $0x8] sm:$0xff] %vm4320_vm0, %v4131_v61  ;;  %v8401_v61 = vpop.eup %5545  ;;  %5551 = vrcp.f32 %v8405_v11  ;;  %v8440_v56 = vsel %vm2242_vm8, %v2244_v59, %v2240_v16  ;;  %v2249_v20 = vsub.f32 1.0, %v2248_v14  ;;  %v2490_v29 = vmul.f32 %v8335_v55, %v2489_v17  ;;  %v10266_v14 = vld [vmem:[#allocation89_spill] sm:$0xff] }
 0x2aa   :  { %4387 = vst.msk [vmem:[%s9827_s4 + $0x8] sm:$0xff] %vm4385_vm2, %v10261_v31  ;;  %v5548_v31 = vpop.eup %5547  ;;  %5553 = vrcp.f32 %v8403_v34  ;;  %v3336_v2 = vmul.f32 %v7907_v35, %v8440_v56  ;;  %v2504_v12 = vsub.f32 1.0, %v2503_v63  ;;  %v4980_v59 = vmul.f32 -1.442695, %v7688_v9 }
 0x2ab   :  { %10264 = vst [vmem:[#allocation21_spill] sm:$0xff] %v8436_v8  ;;  %v8448_v42 = vadd.f32 1.0, %v5548_v31  ;;  %5555 = vpow2.f32 %v4996_v26  ;;  %v4010_v3 = vmul.f32 %v8063_v4, %v10265_v53  ;;  %v2250_v44 = vmul.f32 %v8342_v6, %v2249_v20  ;;  %v10269_v20 = vld [vmem:[#allocation99_spill] sm:$0xff] }
 0x2ac   :  { %4146 = vrot.lane.b32.xlu1 %v4009_v18, %s5694_s2  ;;  %v3335_v18 = vmul.f32 %v7988_v58, %v8407_v43  ;;  %5557 = vtanh.f32 %v8436_v8  ;;  %v2491_v31 = vadd.f32 %v8335_v55, %v2490_v29  ;;  %v2505_v9 = vmul.f32 %v8375_v47, %v2504_v12  ;;  %v10270_v29 = vld [vmem:[#allocation23_spill] sm:$0xff] }
 0x2ad   :  { %3856 = vrot.lane.b32.xlu0 %v5544_v50, %s5693_s11  ;;  %v2484_v50 = vor.u32 1.1754944e-38, %v2483_v45  ;;  %5559 = vrcp.f32 %v8448_v42  ;;  %v2251_v12 = vadd.f32 %v8342_v6, %v2250_v44  ;;  %vm2508_vm15 = vweird.f32 %v8375_v47  ;;  %v10281_v44 = vld [vmem:[#allocation82_spill] sm:$0xff] }
 0x2ae   :  { %v8423_v13 = vpop.permute.xlu1 %3224  ;;  %3502 = vrot.lane.b32.xlu2 %v3335_v18, %s5693_s11  ;;  %v2498_v18 = vand.u32 2147483648, %v8241_v49  ;;  %5561 = vpow2.f32 %v4980_v59  ;;  %v2495_v59 = vsel %vm8489_vm14, %v8335_v55, %v2491_v31  ;;  %v2506_v8 = vadd.f32 %v8375_v47, %v2505_v9  ;;  %vm8528_vm5 = vmor %vm2507_vm3, %vm2508_vm15 }
 0x2af   :  { %v8430_v58 = vpop.permute.xlu0 %3838  ;;  %v8438_v40 = vsel %vm2482_vm9, %v2484_v50, %v2480_v28  ;;  %v2496_v28 = vand.u32 2147483647, %v8241_v49  ;;  %v2258_v50 = vand.u32 2147483648, %v8239_v10  ;;  %v2263_v49 = vmul.f32 %v8401_v61, %v8329_v32 }
 0x2b0   :  { %v3352_v19 = vmul.f32 %v8069_v51, %v8438_v40  ;;  %v8445_v45 = vpop.permute.xlu2 %3196  ;;  %v5550_v51 = vpop.eup %5549  ;;  %v2499_v26 = vor.u32 1.1754944e-38, %v2498_v18  ;;  %v2511_v55 = vand.u32 2147483647, %v8310_v48  ;;  %v2513_v31 = vand.u32 2147483648, %v8310_v48 }
 0x2b1   :  { %v8461_v63 = vpop.eup %5551  ;;  %v8484_v16 = vadd.f32 1.0, %v5550_v51  ;;  %v2256_v51 = vand.u32 2147483647, %v8239_v10  ;;  %vm2497_vm4 = vcmp.eq.f32.partialorder %v2496_v28, 8.507059e+37  ;;  %v2259_v10 = vor.u32 1.1754944e-38, %v2258_v50 }
 0x2b2   :  { %v8482_v17 = vpop.eup %5553  ;;  %v2255_v48 = vsel %vm8512_vm1, %v8342_v6, %v2251_v12  ;;  %v2518_v50 = vmul.f32 %v8461_v63, %v8405_v11  ;;  %v2510_v6 = vsel %vm8528_vm5, %v8375_v47, %v2506_v8  ;;  %vm2512_vm7 = vcmp.eq.f32.partialorder %v2511_v55, 8.507059e+37 }
 0x2b3   :  { %vm8535_vm6 = vcmp.eq.f32.partialorder %v2256_v51, 8.507059e+37  ;;  %5563 = vrcp.f32 %v8484_v16  ;;  %v2278_v12 = vmul.f32 %v8482_v17, %v8403_v34  ;;  %vm2267_vm8 = vweird.f32 %v8329_v32 }
 0x2b4   :  { %3536 = vrot.lane.b32.xlu1 %v3352_v19, %s5693_s11  ;;  %v5556_v19 = vpop.eup %5555  ;;  %v8563_v47 = vsel %vm8535_vm6, %v2259_v10, %v2255_v48  ;;  %vm2268_vm9 = vweird.f32 %v8401_v61  ;;  %v2273_v10 = vand.u32 2147483648, %v8329_v32  ;;  %vm2282_vm11 = vweird.f32 %v8403_v34 }
 0x2b5   :  { %3504 = vrot.lane.b32.xlu0 %v3336_v2, %s5693_s11  ;;  %v3002_v2 = vmul.f32 %v10270_v29, %v10269_v20  ;;  %v8525_v29 = vsel %vm2497_vm4, %v2499_v26, %v2495_v59  ;;  %v10280_v59 = vld [vmem:[#allocation106_spill] sm:$0xff]  ;;  %v10282_v26 = vld [vmem:[#allocation35_spill] sm:$0xff]  ;;  %vm8588_vm10 = vmor %vm2267_vm8, %vm2268_vm9  ;;  %vm2283_vm12 = vweird.f32 %v8482_v17  ;;  %vm2523_vm14 = vweird.f32 %v8461_v63 }
 0x2b6   :  { %v4129_v35 = vpop.permute.xlu1 %4128  ;;  %4148 = vrot.lane.b32.xlu2 %v4010_v3, %s5694_s2  ;;  %v5558_v3 = vpop.eup %5557  ;;  %10275 = vst [vmem:[#allocation101_spill] sm:$0xff] %v8525_v29  ;;  %v3003_v20 = vmul.f32 %v10282_v26, %v10281_v44  ;;  %vm8636_vm15 = vmor %vm2282_vm11, %vm2283_vm12  ;;  %vm2522_vm1 = vweird.f32 %v8405_v11  ;;  %vm2537_vm9 = vweird.f32 %v8448_v42 }
 0x2b7   :  { %4321 = vst.msk [vmem:[%s9827_s4] sm:$0xff] %vm4320_vm0, %v4129_v35  ;;  %v8470_v4 = vpop.permute.xlu0 %3486  ;;  %v10271_v35 = vld [vmem:[#allocation83_spill] sm:$0xff]  ;;  %v8523_v9 = vadd.f32 %v8105_v37, %v3002_v2  ;;  %v3353_v37 = vmul.f32 %v8182_v27, %v8525_v29  ;;  %v8554_v27 = vadd.f32 1.0, %v5556_v19  ;;  %v2514_v29 = vor.u32 1.1754944e-38, %v2513_v31  ;;  %vm8653_vm3 = vmor %vm2522_vm1, %vm2523_vm14 }
 0x2b8   :  { %4386 = vst.msk [vmem:[%s9827_s4] sm:$0xff] %vm4385_vm2, %v10266_v14  ;;  %v8502_v53 = vpop.permute.xlu2 %3520  ;;  %v4011_v14 = vmul.f32 %v7971_v60, %v10271_v35  ;;  %v8520_v60 = vpop.eup %5559  ;;  %v2264_v35 = vsub.f32 1.0, %v2263_v49  ;;  %v8567_v19 = vadd.f32 %v8022_v41, %v3003_v20  ;;  %v2519_v31 = vsub.f32 1.0, %v2518_v50 }
 0x2b9   :  { %10274 = vst [vmem:[#allocation9_spill] sm:$0xff] %v8523_v9  ;;  %v5562_v2 = vpop.eup %5561  ;;  %5565 = vtanh.f32 %v8523_v9  ;;  %v8569_v18 = vsel %vm2512_vm7, %v2514_v29, %v2510_v6  ;;  %v2271_v20 = vand.u32 2147483647, %v8329_v32  ;;  %v2288_v32 = vand.u32 2147483648, %v8403_v34 }
 0x2ba   :  { %v2265_v8 = vmul.f32 %v8401_v61, %v2264_v35  ;;  %10283 = vst [vmem:[#allocation20_spill] sm:$0xff] %v8567_v19  ;;  %v3354_v55 = vmul.f32 %v8087_v22, %v8569_v18  ;;  %v8580_v41 = vpop.eup %5563  ;;  %v2520_v29 = vmul.f32 %v8461_v63, %v2519_v31  ;;  %vm2538_vm6 = vweird.f32 %v8520_v60 }
 0x2bb   :  { %vm8607_vm13 = vcmp.eq.f32.partialorder %v2271_v20, 8.507059e+37  ;;  %v2286_v20 = vand.u32 2147483647, %v8403_v34  ;;  %v10293_v34 = vld [vmem:[#allocation34_spill] sm:$0xff]  ;;  %vm2297_vm7 = vweird.f32 %v8484_v16  ;;  %vm2298_vm8 = vweird.f32 %v8580_v41 }
 0x2bc   :  { %3858 = vrot.lane.b32.xlu1 %v5558_v3, %s5693_s11  ;;  %v4997_v3 = vmul.f32 -1.442695, %v10280_v59  ;;  %v2521_v31 = vadd.f32 %v8461_v63, %v2520_v29  ;;  %v10297_v29 = vld [vmem:[#allocation107_spill] sm:$0xff]  ;;  %vm8755_vm12 = vmor %vm2297_vm7, %vm2298_vm8 }
 0x2bd   :  { %4150 = vrot.lane.b32.xlu0 %v4011_v14, %s5694_s2  ;;  %v4981_v14 = vmul.f32 -1.442695, %v7720_v62  ;;  %v3337_v62 = vmul.f32 %v8116_v5, %v8563_v47  ;;  %v2266_v5 = vadd.f32 %v8401_v61, %v2265_v8  ;;  %v10289_v8 = vld [vmem:[#allocation85_spill] sm:$0xff]  ;;  %vm2287_vm4 = vcmp.eq.f32.partialorder %v2286_v20, 8.507059e+37 }
 0x2be   :  { %v8543_v49 = vpop.permute.xlu1 %3194  ;;  %3538 = vrot.lane.b32.xlu2 %v3353_v37, %s5693_s11  ;;  %v2279_v37 = vsub.f32 1.0, %v2278_v12  ;;  %v2274_v12 = vor.u32 1.1754944e-38, %v2273_v10  ;;  %v2528_v10 = vand.u32 2147483648, %v8405_v11 }
 0x2bf   :  { %v8552_v51 = vpop.permute.xlu0 %3228  ;;  %5567 = vpow2.f32 %v4981_v14  ;;  %v5566_v48 = vpop.eup %5565  ;;  %v10288_v14 = vld [vmem:[#allocation8_spill] sm:$0xff] }
 0x2c0   :  { %v8573_v59 = vpop.permute.xlu2 %3842  ;;  %5569 = vrcp.f32 %v8554_v27  ;;  %v2280_v28 = vmul.f32 %v8482_v17, %v2279_v37 }
 0x2c1   :  { %5571 = vtanh.f32 %v8567_v19 }
 0x2c2   :  { %5573 = vpow2.f32 %v4997_v3  ;;  %v2270_v3 = vsel %vm8588_vm10, %v8401_v61, %v2266_v5  ;;  %v2533_v61 = vmul.f32 %v8520_v60, %v8448_v42  ;;  %v2281_v5 = vadd.f32 %v8482_v17, %v2280_v28  ;;  %vm8730_vm10 = vmor %vm2537_vm9, %vm2538_vm6 }
 0x2c3   :  { %v2526_v28 = vand.u32 2147483647, %v8405_v11 }
 0x2c4   :  { %3506 = vrot.lane.b32.xlu1 %v3337_v62, %s5693_s11  ;;  %v4012_v62 = vmul.f32 %v8189_v54, %v10289_v8  ;;  %v4998_v54 = vmul.f32 -1.442695, %v7785_v15  ;;  %v8647_v15 = vsel %vm8607_vm13, %v2274_v12, %v2270_v3  ;;  %v10292_v8 = vld [vmem:[#allocation102_spill] sm:$0xff]  ;;  %v2293_v3 = vmul.f32 %v8580_v41, %v8484_v16 }
 0x2c5   :  { %3540 = vrot.lane.b32.xlu0 %v3354_v55, %s5693_s11  ;;  %v5568_v26 = vpop.eup %5567  ;;  %v3004_v19 = vmul.f32 %v10293_v34, %v10292_v8  ;;  %v3338_v11 = vmul.f32 %v8224_v30, %v8647_v15  ;;  %v2534_v6 = vsub.f32 1.0, %v2533_v61  ;;  %vm2527_vm5 = vcmp.eq.f32.partialorder %v2526_v28, 8.507059e+37 }
 0x2c6   :  { %v8593_v35 = vpop.permute.xlu1 %3840  ;;  %3860 = vrot.lane.b32.xlu2 %v5566_v48, %s5693_s11  ;;  %v8624_v37 = vpop.eup %5569  ;;  %v8629_v48 = vadd.f32 1.0, %v5562_v2  ;;  %v2289_v2 = vor.u32 1.1754944e-38, %v2288_v32  ;;  %v2525_v32 = vsel %vm8653_vm3, %v8461_v63, %v2521_v31  ;;  %v4982_v28 = vmul.f32 -1.442695, %v10297_v29 }
 0x2c7   :  { %v4133_v50 = vpop.permute.xlu0 %4132  ;;  %v5572_v22 = vpop.eup %5571  ;;  %v8679_v9 = vadd.f32 %v8230_v25, %v3004_v19  ;;  %v2535_v20 = vmul.f32 %v8520_v60, %v2534_v6  ;;  %v10299_v19 = vld [vmem:[#allocation86_spill] sm:$0xff]  ;;  %v2543_v6 = vand.u32 2147483648, %v8448_v42  ;;  %vm2553_vm11 = vweird.f32 %v8624_v37 }
 0x2c8   :  { %4323 = vst.msk [vmem:[%s9827_s4 + $0x10] sm:$0xff] %vm4320_vm0, %v4133_v50  ;;  %v8622_v55 = vpop.permute.xlu2 %3490  ;;  %v5574_v50 = vpop.eup %5573  ;;  %5575 = vrcp.f32 %v8629_v48  ;;  %vm2552_vm13 = vweird.f32 %v8554_v27 }
 0x2c9   :  { %4388 = vst.msk [vmem:[%s9827_s4 + $0x10] sm:$0xff] %vm4385_vm2, %v10288_v14  ;;  %v8643_v14 = vadd.f32 1.0, %v5568_v26  ;;  %v2285_v26 = vsel %vm8636_vm15, %v8482_v17, %v2281_v5  ;;  %v8675_v63 = vadd.f32 1.0, %v5574_v50  ;;  %5577 = vpow2.f32 %v4998_v54  ;;  %vm8769_vm15 = vmor %vm2552_vm13, %vm2553_vm11 }
 0x2ca   :  { %10296 = vst [vmem:[#allocation76_spill] sm:$0xff] %v8679_v9  ;;  %v8683_v17 = vsel %vm2287_vm4, %v2289_v2, %v2285_v26  ;;  %v2294_v5 = vsub.f32 1.0, %v2293_v3  ;;  %v4013_v50 = vmul.f32 %v8298_v38, %v10299_v19  ;;  %v2536_v34 = vadd.f32 %v8520_v60, %v2535_v20 }
 0x2cb   :  { %5579 = vrcp.f32 %v8643_v14  ;;  %v3339_v54 = vmul.f32 %v8139_v24, %v8683_v17  ;;  %v2541_v38 = vand.u32 2147483647, %v8448_v42  ;;  %v2303_v20 = vand.u32 2147483648, %v8484_v16 }
 0x2cc   :  { %4152 = vrot.lane.b32.xlu1 %v4012_v62, %s5694_s2  ;;  %v2529_v62 = vor.u32 1.1754944e-38, %v2528_v10  ;;  %5581 = vrcp.f32 %v8675_v63  ;;  %v2295_v2 = vmul.f32 %v8580_v41, %v2294_v5  ;;  %vm2312_vm4 = vweird.f32 %v8629_v48 }
 0x2cd   :  { %3862 = vrot.lane.b32.xlu0 %v5572_v22, %s5693_s11  ;;  %v2548_v22 = vmul.f32 %v8624_v37, %v8554_v27  ;;  %5583 = vtanh.f32 %v8679_v9  ;;  %vm2542_vm14 = vcmp.eq.f32.partialorder %v2541_v38, 8.507059e+37  ;;  %vm2327_vm7 = vweird.f32 %v8643_v14 }
 0x2ce   :  { %v8665_v12 = vpop.permute.xlu1 %3488  ;;  %3508 = vrot.lane.b32.xlu2 %v3338_v11, %s5693_s11  ;;  %v8681_v31 = vsel %vm2527_vm5, %v2529_v62, %v2525_v32  ;;  %v8705_v24 = vpop.eup %5575  ;;  %5585 = vpow2.f32 %v4982_v28 }
 0x2cf   :  { %v8672_v30 = vpop.permute.xlu0 %3198  ;;  %v3355_v61 = vmul.f32 %v8307_v1, %v8681_v31  ;;  %v2549_v25 = vsub.f32 1.0, %v2548_v22  ;;  %v10298_v1 = vld [vmem:[#allocation5_spill] sm:$0xff]  ;;  %v5578_v32 = vpop.eup %5577  ;;  %v10300_v22 = vld [vmem:[#allocation24_spill] sm:$0xff]  ;;  %v2308_v29 = vmul.f32 %v8705_v24, %v8629_v48  ;;  %vm2313_vm5 = vweird.f32 %v8705_v24 }
 0x2d0   :  { %v4137_v10 = vpop.permute.xlu2 %4136  ;;  %v8738_v42 = vadd.f32 1.0, %v5578_v32  ;;  %v2544_v32 = vor.u32 1.1754944e-38, %v2543_v6  ;;  %vm8833_vm6 = vmor %vm2312_vm4, %vm2313_vm5 }
 0x2d1   :  { %4325 = vst.msk [vmem:[%s9827_s4 + $0x20] sm:$0xff] %vm4320_vm0, %v4137_v10  ;;  %v2550_v3 = vmul.f32 %v8624_v37, %v2549_v25  ;;  %v8723_v62 = vpop.eup %5579  ;;  %v2301_v25 = vand.u32 2147483647, %v8484_v16  ;;  %v2304_v10 = vor.u32 1.1754944e-38, %v2303_v20 }
 0x2d2   :  { %4390 = vst.msk [vmem:[%s9827_s4 + $0x20] sm:$0xff] %vm4385_vm2, %v10298_v1  ;;  %v8736_v28 = vpop.eup %5581  ;;  %v2540_v1 = vsel %vm8730_vm10, %v8520_v60, %v2536_v34  ;;  %v2556_v60 = vand.u32 2147483647, %v8554_v27  ;;  %v2558_v34 = vand.u32 2147483648, %v8554_v27  ;;  %5587 = vrcp.f32 %v8738_v42 }
 0x2d3   :  { %v8766_v16 = vsel %vm2542_vm14, %v2544_v32, %v2540_v1  ;;  %vm8776_vm1 = vcmp.eq.f32.partialorder %v2301_v25, 8.507059e+37  ;;  %v10312_v25 = vld [vmem:[#allocation38_spill] sm:$0xff]  ;;  %vm2328_vm8 = vweird.f32 %v8723_v62  ;;  %vm2568_vm9 = vweird.f32 %v8736_v28 }
 0x2d4   :  { %3542 = vrot.lane.b32.xlu1 %v3355_v61, %s5693_s11  ;;  %v10301_v61 = vld [vmem:[#allocation27_spill] sm:$0xff]  ;;  %vm2557_vm3 = vcmp.eq.f32.partialorder %v2556_v60, 8.507059e+37  ;;  %vm8868_vm11 = vmor %vm2327_vm7, %vm2328_vm8  ;;  %vm2582_vm5 = vweird.f32 %v8738_v42 }
 0x2d5   :  { %3510 = vrot.lane.b32.xlu0 %v3339_v54, %s5693_s11  ;;  %v3005_v5 = vmul.f32 %v10301_v61, %v10300_v22  ;;  %v2296_v54 = vadd.f32 %v8580_v41, %v2295_v2  ;;  %v10304_v61 = vld [vmem:[#allocation88_spill] sm:$0xff]  ;;  %v2551_v22 = vadd.f32 %v8624_v37, %v2550_v3 }
 0x2d6   :  { %v8712_v11 = vpop.permute.xlu1 %3230  ;;  %4154 = vrot.lane.b32.xlu2 %v4013_v50, %s5694_s2  ;;  %v5584_v50 = vpop.eup %5583  ;;  %v4014_v9 = vmul.f32 %v8204_v7, %v10304_v61  ;;  %v2309_v61 = vsub.f32 1.0, %v2308_v29  ;;  %v2323_v29 = vmul.f32 %v8723_v62, %v8643_v14 }
 0x2d7   :  { %v8716_v26 = vpop.permute.xlu0 %3522  ;;  %v5586_v7 = vpop.eup %5585  ;;  %v8764_v3 = vadd.f32 %v8346_v0, %v3005_v5  ;;  %v2300_v27 = vsel %vm8755_vm12, %v8580_v41, %v2296_v54  ;;  %v3356_v0 = vmul.f32 %v8423_v13, %v8766_v16  ;;  %v2563_v5 = vmul.f32 %v8736_v28, %v8675_v63  ;;  %v10311_v13 = vld [vmem:[#allocation104_spill] sm:$0xff] }
 0x2d8   :  { %v8745_v19 = vpop.permute.xlu2 %3526  ;;  %v8795_v54 = vadd.f32 1.0, %v5586_v7  ;;  %v3006_v1 = vmul.f32 %v10312_v25, %v10311_v13  ;;  %v2310_v2 = vmul.f32 %v8705_v24, %v2309_v61  ;;  %v2316_v61 = vand.u32 2147483647, %v8629_v48 }
 0x2d9   :  { %5589 = vtanh.f32 %v8764_v3  ;;  %v2564_v6 = vsub.f32 1.0, %v2563_v5  ;;  %v2333_v25 = vand.u32 2147483648, %v8643_v14  ;;  %vm2567_vm12 = vweird.f32 %v8675_v63 }
 0x2da   :  { %v8813_v32 = vadd.f32 %v8259_v21, %v3006_v1  ;;  %5591 = vrcp.f32 %v8795_v54  ;;  %v2311_v21 = vadd.f32 %v8705_v24, %v2310_v2  ;;  %vm2317_vm10 = vcmp.eq.f32.partialorder %v2316_v61, 8.507059e+37  ;;  %vm8879_vm13 = vmor %vm2567_vm12, %vm2568_vm9 }
 0x2db   :  { %v2334_v61 = vor.u32 1.1754944e-38, %v2333_v25 }
 0x2dc   :  { %3864 = vrot.lane.b32.xlu1 %v5584_v50, %s5693_s11  ;;  %v2559_v50 = vor.u32 1.1754944e-38, %v2558_v34  ;;  %10314 = vst [vmem:[#allocation32_spill] sm:$0xff] %v8813_v32  ;;  %5593 = vtanh.f32 %v8813_v32 }
 0x2dd   :  { %4156 = vrot.lane.b32.xlu0 %v4014_v9, %s5694_s2  ;;  %v2555_v9 = vsel %vm8769_vm15, %v8624_v37, %v2551_v22  ;;  %v10313_v37 = vld [vmem:[#allocation68_spill] sm:$0xff]  ;;  %v8809_v22 = vsel %vm8776_vm1, %v2304_v10, %v2300_v27  ;;  %v2318_v10 = vand.u32 2147483648, %v8629_v48  ;;  %v2565_v27 = vmul.f32 %v8736_v28, %v2564_v6 }
 0x2de   :  { %v4135_v20 = vpop.permute.xlu1 %4134  ;;  %3544 = vrot.lane.b32.xlu2 %v3356_v0, %s5693_s11  ;;  %v8815_v34 = vsel %vm2557_vm3, %v2559_v50, %v2555_v9  ;;  %v3340_v7 = vmul.f32 %v8353_v46, %v8809_v22  ;;  %v8830_v46 = vpop.eup %5587  ;;  %v2315_v48 = vsel %vm8833_vm6, %v8705_v24, %v2311_v21  ;;  %v10317_v50 = vld [vmem:[#allocation12_spill] sm:$0xff]  ;;  %v2331_v24 = vand.u32 2147483647, %v8643_v14 }
 0x2df   :  { %4324 = vst.msk [vmem:[%s9827_s4 + $0x18] sm:$0xff] %vm4320_vm0, %v4135_v20  ;;  %v8793_v41 = vpop.permute.xlu0 %3844  ;;  %v3357_v60 = vmul.f32 %v8327_v23, %v8815_v34  ;;  %v2324_v20 = vsub.f32 1.0, %v2323_v29  ;;  %v5590_v5 = vpop.eup %5589  ;;  %v2319_v1 = vor.u32 1.1754944e-38, %v2318_v10  ;;  %v2566_v2 = vadd.f32 %v8736_v28, %v2565_v27 }
 0x2e0   :  { %4389 = vst.msk [vmem:[%s9827_s4 + $0x18] sm:$0xff] %vm4385_vm2, %v10313_v37  ;;  %v8819_v0 = vpop.permute.xlu2 %3848  ;;  %v4015_v37 = vmul.f32 %v8430_v58, %v10317_v50  ;;  %v2573_v21 = vand.u32 2147483648, %v8675_v63  ;;  %v2571_v23 = vand.u32 2147483647, %v8675_v63  ;;  %vm2332_vm14 = vcmp.eq.f32.partialorder %v2331_v24, 8.507059e+37  ;;  %v10322_v50 = vld [vmem:[#allocation105_spill] sm:$0xff] }
 0x2e1   :  { %v2325_v9 = vmul.f32 %v8723_v62, %v2324_v20  ;;  %v8875_v27 = vsel %vm2317_vm10, %v2319_v1, %v2315_v48  ;;  %v2570_v63 = vsel %vm8879_vm13, %v8736_v28, %v2566_v2  ;;  %vm2583_vm1 = vweird.f32 %v8830_v46 }
 0x2e2   :  { %v3341_v14 = vmul.f32 %v8543_v49, %v8875_v27  ;;  %v2574_v32 = vor.u32 1.1754944e-38, %v2573_v21  ;;  %vm2572_vm15 = vcmp.eq.f32.partialorder %v2571_v23, 8.507059e+37  ;;  %vm2342_vm3 = vweird.f32 %v8795_v54  ;;  %vm8950_vm6 = vmor %vm2582_vm5, %vm2583_vm1 }
 0x2e3   :  { %v2326_v20 = vadd.f32 %v8723_v62, %v2325_v9 }
 0x2e4   :  { %3512 = vrot.lane.b32.xlu1 %v3340_v7, %s5693_s11  ;;  %v2578_v7 = vmul.f32 %v8830_v46, %v8738_v42  ;;  %v8906_v2 = vsel %vm2572_vm15, %v2574_v32, %v2570_v63  ;;  %v10325_v32 = vld [vmem:[#allocation13_spill] sm:$0xff]  ;;  %v10328_v63 = vld [vmem:[#allocation54_spill] sm:$0xff] }
 0x2e5   :  { %3546 = vrot.lane.b32.xlu0 %v3357_v60, %s5693_s11  ;;  %v8859_v60 = vpop.eup %5591  ;;  %v2330_v1 = vsel %vm8868_vm11, %v8723_v62, %v2326_v20  ;;  %v10324_v62 = vld [vmem:[#allocation6_spill] sm:$0xff]  ;;  %v3358_v20 = vmul.f32 %v8552_v51, %v8906_v2 }
 0x2e6   :  { %v8839_v38 = vpop.permute.xlu1 %3524  ;;  %3866 = vrot.lane.b32.xlu2 %v5590_v5, %s5693_s11  ;;  %v5594_v10 = vpop.eup %5593  ;;  %v2338_v9 = vmul.f32 %v8859_v60, %v8795_v54  ;;  %v2579_v25 = vsub.f32 1.0, %v2578_v7  ;;  %v8913_v7 = vsel %vm2332_vm14, %v2334_v61, %v2330_v1  ;;  %v10326_v51 = vld [vmem:[#allocation90_spill] sm:$0xff]  ;;  %vm2343_vm4 = vweird.f32 %v8859_v60 }
 0x2e7   :  { %v8842_v29 = vpop.permute.xlu0 %3492  ;;  %vm8970_vm7 = vmor %vm2342_vm3, %vm2343_vm4 }
 0x2e8   :  { %v8857_v6 = vpop.permute.xlu2 %3496  ;;  %v2339_v24 = vsub.f32 1.0, %v2338_v9  ;;  %v2580_v21 = vmul.f32 %v8830_v46, %v2579_v25  ;;  %v2588_v25 = vand.u32 2147483648, %v8738_v42 }
 0x2ea   :  { %v2340_v23 = vmul.f32 %v8859_v60, %v2339_v24  ;;  %v2581_v61 = vadd.f32 %v8830_v46, %v2580_v21 }
 0x2ec   :  { %4158 = vrot.lane.b32.xlu1 %v4015_v37, %s5694_s2  ;;  %v10323_v37 = vld [vmem:[#allocation36_spill] sm:$0xff]  ;;  %v2585_v24 = vsel %vm8950_vm6, %v8830_v46, %v2581_v61 }
 0x2ed   :  { %3868 = vrot.lane.b32.xlu0 %v5594_v10, %s5693_s11  ;;  %v3007_v10 = vmul.f32 %v10323_v37, %v10322_v50  ;;  %v2348_v37 = vand.u32 2147483648, %v8795_v54 }
 0x2ee   :  { %v8891_v48 = vpop.permute.xlu1 %3846  ;;  %3514 = vrot.lane.b32.xlu2 %v3341_v14, %s5693_s11  ;;  %v10327_v14 = vld [vmem:[#allocation109_spill] sm:$0xff] }
 0x2ef   :  { %v4139_v49 = vpop.permute.xlu0 %4138  ;;  %v8904_v28 = vadd.f32 %v8470_v4, %v3007_v10  ;;  %v3342_v4 = vmul.f32 %v8445_v45, %v8913_v7  ;;  %v4016_v45 = vmul.f32 %v8593_v35, %v10326_v51  ;;  %v3024_v9 = vmul.f32 %v10328_v63, %v10327_v14  ;;  %v10333_v51 = vld [vmem:[#allocation30_spill] sm:$0xff]  ;;  %v10338_v10 = vld [vmem:[#allocation71_spill] sm:$0xff] }
 0x2f0   :  { %4326 = vst.msk [vmem:[%s9827_s4 + $0x28] sm:$0xff] %vm4320_vm0, %v4139_v49  ;;  %v4143_v58 = vpop.permute.xlu2 %4142  ;;  %v2586_v35 = vand.u32 2147483647, %v8738_v42  ;;  %v2349_v61 = vor.u32 1.1754944e-38, %v2348_v37 }
 0x2f1   :  { %4391 = vst.msk [vmem:[%s9827_s4 + $0x28] sm:$0xff] %vm4385_vm2, %v10324_v62  ;;  %5595 = vtanh.f32 %v8904_v28  ;;  %v8955_v49 = vadd.f32 %v8502_v53, %v3024_v9  ;;  %v2341_v62 = vadd.f32 %v8859_v60, %v2340_v23  ;;  %v2589_v23 = vor.u32 1.1754944e-38, %v2588_v25  ;;  %v10336_v25 = vld [vmem:[#allocation111_spill] sm:$0xff] }
 0x2f2   :  { %4328 = vst.msk [vmem:[%s9827_s4 + $0x38] sm:$0xff] %vm4320_vm0, %v4143_v58  ;;  %v10331_v58 = vld [vmem:[#allocation10_spill] sm:$0xff]  ;;  %vm2587_vm8 = vcmp.eq.f32.partialorder %v2586_v35, 8.507059e+37  ;;  %v10337_v35 = vld [vmem:[#allocation40_spill] sm:$0xff]  ;;  %v10342_v53 = vld [vmem:[#allocation91_spill] sm:$0xff] }
 0x2f3   :  { %4393 = vst.msk [vmem:[%s9827_s4 + $0x38] sm:$0xff] %vm4385_vm2, %v10325_v32  ;;  %v10332_v32 = vld [vmem:[#allocation108_spill] sm:$0xff]  ;;  %v8978_v63 = vsel %vm2587_vm8, %v2589_v23, %v2585_v24  ;;  %5597 = vtanh.f32 %v8955_v49  ;;  %v3009_v37 = vmul.f32 %v10337_v35, %v10336_v25  ;;  %v4018_v23 = vmul.f32 %v8793_v41, %v10342_v53  ;;  %v10347_v41 = vld [vmem:[#allocation74_spill] sm:$0xff] }
 0x2f4   :  { %3548 = vrot.lane.b32.xlu1 %v3358_v20, %s5693_s11  ;;  %v2346_v20 = vand.u32 2147483647, %v8795_v54  ;;  %v3359_v54 = vmul.f32 %v8712_v11, %v8978_v63 }
 0x2f5   :  { %3516 = vrot.lane.b32.xlu0 %v3342_v4, %s5693_s11  ;;  %v4017_v4 = vmul.f32 %v8573_v59, %v10331_v58  ;;  %v2345_v59 = vsel %vm8970_vm7, %v8859_v60, %v2341_v62  ;;  %v9005_v60 = vadd.f32 %v8622_v55, %v3009_v37 }
 0x2f6   :  { %v8937_v5 = vpop.permute.xlu1 %3494  ;;  %4160 = vrot.lane.b32.xlu2 %v4016_v45, %s5694_s2  ;;  %v3008_v45 = vmul.f32 %v10333_v51, %v10332_v32  ;;  %vm2347_vm9 = vcmp.eq.f32.partialorder %v2346_v20, 8.507059e+37  ;;  %v10341_v51 = vld [vmem:[#allocation53_spill] sm:$0xff] }
 0x2f7   :  { %v8942_v1 = vpop.permute.xlu0 %3528  ;;  %v5596_v21 = vpop.eup %5595  ;;  %v9002_v11 = vsel %vm2347_vm9, %v2349_v61, %v2345_v59  ;;  %10339 = vst [vmem:[#allocation78_spill] sm:$0xff] %v9005_v60  ;;  %v10343_v59 = vld [vmem:[#allocation112_spill] sm:$0xff] }
 0x2f8   :  { %v8962_v42 = vpop.permute.xlu2 %3532  ;;  %v8976_v46 = vadd.f32 %v8665_v12, %v3008_v45  ;;  %v3343_v62 = vmul.f32 %v8672_v30, %v9002_v11 }
 0x2f9   :  { %v5598_v24 = vpop.eup %5597 }
 0x2fa   :  { %5599 = vtanh.f32 %v8976_v46 }
 0x2fb   :  { %5601 = vtanh.f32 %v9005_v60 }
 0x2fc   :  { %3870 = vrot.lane.b32.xlu1 %v5596_v21, %s5693_s11 }
 0x2fd   :  { %4162 = vrot.lane.b32.xlu0 %v4017_v4, %s5694_s2  ;;  %v10340_v4 = vld [vmem:[#allocation110_spill] sm:$0xff] }
 0x2fe   :  { %v4141_v9 = vpop.permute.xlu1 %4140  ;;  %3550 = vrot.lane.b32.xlu2 %v3359_v54, %s5693_s11  ;;  %v3025_v45 = vmul.f32 %v10341_v51, %v10340_v4  ;;  %v10344_v54 = vld [vmem:[#allocation51_spill] sm:$0xff] }
 0x2ff   :  { %4327 = vst.msk [vmem:[%s9827_s4 + $0x30] sm:$0xff] %vm4320_vm0, %v4141_v9  ;;  %v8991_v12 = vpop.permute.xlu0 %3850  ;;  %v3026_v9 = vmul.f32 %v10344_v54, %v10343_v59 }
 0x300   :  { %4392 = vst.msk [vmem:[%s9827_s4 + $0x30] sm:$0xff] %vm4385_vm2, %v10338_v10  ;;  %v9009_v20 = vpop.permute.xlu2 %3854  ;;  %v5600_v58 = vpop.eup %5599  ;;  %v9022_v30 = vadd.f32 %v8716_v26, %v3025_v45  ;;  %v10346_v26 = vld [vmem:[#allocation92_spill] sm:$0xff]  ;;  %v10349_v45 = vld [vmem:[#allocation57_spill] sm:$0xff] }
 0x301   :  { %v5602_v35 = vpop.eup %5601  ;;  %v9033_v37 = vadd.f32 %v8839_v38, %v3026_v9  ;;  %v4019_v10 = vmul.f32 %v8891_v48, %v10346_v26  ;;  %v3027_v53 = vmul.f32 %v10349_v45, %v8053_v57  ;;  %v10350_v48 = vld [vmem:[#allocation7_spill] sm:$0xff]  ;;  %v10356_v45 = vld [vmem:[#allocation94_spill] sm:$0xff] }
 0x302   :  { %5603 = vtanh.f32 %v9022_v30 }
 0x303   :  { %10345 = vst [vmem:[#allocation84_spill] sm:$0xff] %v9033_v37  ;;  %5605 = vtanh.f32 %v9033_v37  ;;  %v10369_v37 = vld [vmem:[#allocation60_spill] sm:$0xff] }
 0x304   :  { %3518 = vrot.lane.b32.xlu1 %v3343_v62, %s5693_s11 }
 0x305   :  { %3904 = vrot.lane.b32.xlu0 %v5598_v24, %s5693_s11  ;;  %v10348_v24 = vld [vmem:[#allocation39_spill] sm:$0xff] }
 0x306   :  { %v9014_v21 = vpop.permute.xlu1 %3530  ;;  %3872 = vrot.lane.b32.xlu2 %v5600_v58, %s5693_s11  ;;  %v3010_v58 = vmul.f32 %v10348_v24, %v10347_v41 }
 0x307   :  { %v9018_v55 = vpop.permute.xlu0 %3498 }
 0x308   :  { %v9026_v61 = vpop.permute.xlu2 %3502  ;;  %v9049_v38 = vadd.f32 %v8842_v29, %v3010_v58  ;;  %v5604_v9 = vpop.eup %5603  ;;  %v10354_v29 = vld [vmem:[#allocation16_spill] sm:$0xff] }
 0x309   :  { %v5606_v58 = vpop.eup %5605 }
 0x30a   :  { %5607 = vtanh.f32 %v9049_v38 }
 0x30c   :  { %4164 = vrot.lane.b32.xlu1 %v4018_v23, %s5694_s2  ;;  %v9057_v23 = vadd.f32 %v8745_v19, %v3027_v53  ;;  %v10357_v53 = vld [vmem:[#allocation43_spill] sm:$0xff] }
 0x30d   :  { %3874 = vrot.lane.b32.xlu0 %v5602_v35, %s5693_s11  ;;  %v10352_v35 = vld [vmem:[#allocation15_spill] sm:$0xff] }
 0x30e   :  { %v3853_v62 = vpop.permute.xlu1 %3852  ;;  %4166 = vrot.lane.b32.xlu2 %v4019_v10, %s5694_s2  ;;  %10351 = vst [vmem:[#allocation31_spill] sm:$0xff] %v9057_v23  ;;  %v4020_v26 = vmul.f32 %v8819_v0, %v10352_v35  ;;  %v10353_v10 = vld [vmem:[#allocation33_spill] sm:$0xff]  ;;  %5609 = vtanh.f32 %v9057_v23 }
 0x30f   :  { %v4145_v51 = vpop.permute.xlu0 %4144  ;;  %v3011_v24 = vmul.f32 %v10353_v10, %v8079_v52 }
 0x310   :  { %4329 = vst.msk [vmem:[%s9827_s4 + $0x40] sm:$0xff] %vm4320_vm0, %v4145_v51  ;;  %v4149_v54 = vpop.permute.xlu2 %4148 }
 0x311   :  { %4394 = vst.msk [vmem:[%s9827_s4 + $0x40] sm:$0xff] %vm4385_vm2, %v10350_v48  ;;  %v9075_v19 = vadd.f32 %v8937_v5, %v3011_v24  ;;  %v3012_v48 = vmul.f32 %v10357_v53, %v10356_v45  ;;  %v10359_v24 = vld [vmem:[#allocation29_spill] sm:$0xff] }
 0x312   :  { %4331 = vst.msk [vmem:[%s9827_s4 + $0x50] sm:$0xff] %vm4320_vm0, %v4149_v54  ;;  %v10361_v53 = vld [vmem:[#allocation77_spill] sm:$0xff] }
 0x313   :  { %4396 = vst.msk [vmem:[%s9827_s4 + $0x50] sm:$0xff] %vm4385_vm2, %v10354_v29  ;;  %5611 = vtanh.f32 %v9075_v19  ;;  %v9086_v54 = vadd.f32 %v8857_v6, %v3012_v48  ;;  %v10360_v29 = vld [vmem:[#allocation56_spill] sm:$0xff] }
 0x314   :  { %3906 = vrot.lane.b32.xlu1 %v5604_v9, %s5693_s11  ;;  %10355 = vst [vmem:[#allocation80_spill] sm:$0xff] %v9075_v19  ;;  %v5608_v9 = vpop.eup %5607  ;;  %v10367_v19 = vld [vmem:[#allocation79_spill] sm:$0xff] }
 0x315   :  { %4168 = vrot.lane.b32.xlu0 %v4020_v26, %s5694_s2  ;;  %10358 = vst [vmem:[#allocation103_spill] sm:$0xff] %v9086_v54  ;;  %v5610_v35 = vpop.eup %5609  ;;  %5613 = vtanh.f32 %v9086_v54  ;;  %v10364_v54 = vld [vmem:[#allocation55_spill] sm:$0xff] }
 0x316   :  { %v3501_v0 = vpop.permute.xlu1 %3500  ;;  %3908 = vrot.lane.b32.xlu2 %v5606_v58, %s5693_s11  ;;  %v3028_v58 = vmul.f32 %v10360_v29, %v10359_v24 }
 0x317   :  { %v9079_v51 = vpop.permute.xlu0 %3534 }
 0x318   :  { %v9088_v5 = vpop.permute.xlu2 %3538  ;;  %v9106_v48 = vadd.f32 %v8942_v1, %v3028_v58  ;;  %v10366_v1 = vld [vmem:[#allocation93_spill] sm:$0xff] }
 0x319   :  { %v5612_v10 = vpop.eup %5611  ;;  %v4022_v58 = vmul.f32 %v3853_v62, %v10366_v1 }
 0x31a   :  { %10362 = vst [vmem:[#allocation66_spill] sm:$0xff] %v9106_v48  ;;  %5615 = vtanh.f32 %v9106_v48 }
 0x31b   :  { %v5614_v23 = vpop.eup %5613 }
 0x31c   :  { %3876 = vrot.lane.b32.xlu1 %v5608_v9, %s5693_s11  ;;  %v10363_v9 = vld [vmem:[#allocation72_spill] sm:$0xff] }
 0x31d   :  { %3910 = vrot.lane.b32.xlu0 %v5610_v35, %s5693_s11  ;;  %v4021_v35 = vmul.f32 %v8991_v12, %v10363_v9  ;;  %v10368_v12 = vld [vmem:[#allocation42_spill] sm:$0xff] }
 0x31e   :  { %v4147_v26 = vpop.permute.xlu1 %4146  ;;  %3878 = vrot.lane.b32.xlu2 %v5612_v10, %s5693_s11  ;;  %v3013_v9 = vmul.f32 %v10368_v12, %v10367_v19  ;;  %v10372_v12 = vld [vmem:[#allocation37_spill] sm:$0xff] }
 0x31f   :  { %4330 = vst.msk [vmem:[%s9827_s4 + $0x48] sm:$0xff] %vm4320_vm0, %v4147_v26  ;;  %v3857_v6 = vpop.permute.xlu0 %3856  ;;  %v3029_v26 = vmul.f32 %v10364_v54, %v8197_v33  ;;  %v3030_v54 = vmul.f32 %v10369_v37, %v8280_v36  ;;  %v3014_v48 = vmul.f32 %v10372_v12, %v8317_v39 }
 0x320   :  { %4395 = vst.msk [vmem:[%s9827_s4 + $0x48] sm:$0xff] %vm4385_vm2, %v10361_v53  ;;  %v9110_v29 = vpop.permute.xlu2 %3860  ;;  %v5616_v62 = vpop.eup %5615 }
 0x321   :  { %v9117_v10 = vadd.f32 %v9014_v21, %v3029_v26  ;;  %v9131_v21 = vadd.f32 %v8962_v42, %v3030_v54  ;;  %v10371_v26 = vld [vmem:[#allocation18_spill] sm:$0xff]  ;;  %v9141_v37 = vadd.f32 %v3501_v0, %v3014_v48 }
 0x322   :  { %v4023_v1 = vmul.f32 %v9009_v20, %v10371_v26  ;;  %v10375_v20 = vld [vmem:[#allocation98_spill] sm:$0xff] }
 0x323   :  { %10365 = vst [vmem:[#allocation81_spill] sm:$0xff] %v9117_v10  ;;  %5617 = vtanh.f32 %v9117_v10 }
 0x324   :  { %4170 = vrot.lane.b32.xlu1 %v4021_v35, %s5694_s2  ;;  %v9128_v35 = vadd.f32 %v9018_v55, %v3013_v9  ;;  %10370 = vst [vmem:[#allocation89_spill] sm:$0xff] %v9131_v21  ;;  %v10374_v9 = vld [vmem:[#allocation46_spill] sm:$0xff] }
 0x325   :  { %3880 = vrot.lane.b32.xlu0 %v5614_v23, %s5693_s11  ;;  %10373 = vst [vmem:[#allocation23_spill] sm:$0xff] %v9141_v37  ;;  %v3015_v54 = vmul.f32 %v10374_v9, %v8407_v43 }
 0x326   :  { %v3537_v53 = vpop.permute.xlu1 %3536  ;;  %4172 = vrot.lane.b32.xlu2 %v4022_v58, %s5694_s2  ;;  %5619 = vtanh.f32 %v9128_v35 }
 0x327   :  { %v3505_v60 = vpop.permute.xlu0 %3504  ;;  %5621 = vtanh.f32 %v9131_v21  ;;  %v9159_v0 = vadd.f32 %v9026_v61, %v3015_v54 }
 0x328   :  { %v9133_v23 = vpop.permute.xlu2 %3508  ;;  %5623 = vtanh.f32 %v9141_v37 }
 0x329   :  { %v5618_v55 = vpop.eup %5617  ;;  %10376 = vst [vmem:[#allocation83_spill] sm:$0xff] %v9159_v0  ;;  %5625 = vtanh.f32 %v9159_v0 }
 0x32c   :  { %3912 = vrot.lane.b32.xlu1 %v5616_v62, %s5693_s11  ;;  %v5620_v62 = vpop.eup %5619 }
 0x32d   :  { %4174 = vrot.lane.b32.xlu0 %v4023_v1, %s5694_s2  ;;  %v5622_v26 = vpop.eup %5621  ;;  %v10377_v1 = vld [vmem:[#allocation19_spill] sm:$0xff] }
 0x32e   :  { %v3859_v42 = vpop.permute.xlu1 %3858  ;;  %3914 = vrot.lane.b32.xlu2 %v5618_v55, %s5693_s11  ;;  %v5624_v12 = vpop.eup %5623  ;;  %v10378_v55 = vld [vmem:[#allocation75_spill] sm:$0xff] }
 0x32f   :  { %v4151_v58 = vpop.permute.xlu0 %4150  ;;  %v5626_v37 = vpop.eup %5625 }
 0x330   :  { %4332 = vst.msk [vmem:[%s9827_s4 + $0x58] sm:$0xff] %vm4320_vm0, %v4151_v58  ;;  %v4155_v48 = vpop.permute.xlu2 %4154  ;;  %v10379_v58 = vld [vmem:[#allocation59_spill] sm:$0xff] }
 0x331   :  { %4397 = vst.msk [vmem:[%s9827_s4 + $0x58] sm:$0xff] %vm4385_vm2, %v10375_v20  ;;  %v3031_v9 = vmul.f32 %v10379_v58, %v10378_v55 }
 0x332   :  { %4334 = vst.msk [vmem:[%s9827_s4 + $0x68] sm:$0xff] %vm4320_vm0, %v4155_v48  ;;  %v10380_v48 = vld [vmem:[#allocation95_spill] sm:$0xff] }
 0x333   :  { %4399 = vst.msk [vmem:[%s9827_s4 + $0x68] sm:$0xff] %vm4385_vm2, %v10377_v1  ;;  %v9177_v20 = vadd.f32 %v9079_v51, %v3031_v9  ;;  %v4024_v21 = vmul.f32 %v3857_v6, %v10380_v48  ;;  %v10384_v9 = vld [vmem:[#allocation45_spill] sm:$0xff] }
 0x334   :  { %3882 = vrot.lane.b32.xlu1 %v5620_v62, %s5693_s11  ;;  %v10381_v62 = vld [vmem:[#allocation58_spill] sm:$0xff]  ;;  %v3016_v6 = vmul.f32 %v10384_v9, %v8440_v56 }
 0x335   :  { %3916 = vrot.lane.b32.xlu0 %v5622_v26, %s5693_s11  ;;  %v3032_v26 = vmul.f32 %v10381_v62, %v8438_v40  ;;  %5627 = vtanh.f32 %v9177_v20  ;;  %v10385_v62 = vld [vmem:[#allocation101_spill] sm:$0xff] }
 0x336   :  { %v3507_v61 = vpop.permute.xlu1 %3506  ;;  %3884 = vrot.lane.b32.xlu2 %v5624_v12, %s5693_s11  ;;  %v10383_v12 = vld [vmem:[#allocation96_spill] sm:$0xff] }
 0x337   :  { %v3541_v54 = vpop.permute.xlu0 %3540  ;;  %v9186_v0 = vadd.f32 %v3537_v53, %v3032_v26  ;;  %v4025_v58 = vmul.f32 %v3859_v42, %v10383_v12  ;;  %v10387_v53 = vld [vmem:[#allocation100_spill] sm:$0xff] }
 0x338   :  { %v9180_v1 = vpop.permute.xlu2 %3544 }
 0x339   :  { %10382 = vst [vmem:[#allocation106_spill] sm:$0xff] %v9186_v0  ;;  %5629 = vtanh.f32 %v9186_v0 }
 0x33b   :  { %v5628_v12 = vpop.eup %5627 }
 0x33c   :  { %4176 = vrot.lane.b32.xlu1 %v4024_v21, %s5694_s2  ;;  %v10386_v21 = vld [vmem:[#allocation63_spill] sm:$0xff] }
 0x33d   :  { %3886 = vrot.lane.b32.xlu0 %v5626_v37, %s5693_s11  ;;  %v3033_v10 = vmul.f32 %v10386_v21, %v10385_v62  ;;  %v9205_v37 = vadd.f32 %v3505_v60, %v3016_v6  ;;  %v10391_v6 = vld [vmem:[#allocation49_spill] sm:$0xff] }
 0x33e   :  { %v4153_v51 = vpop.permute.xlu1 %4152  ;;  %4178 = vrot.lane.b32.xlu2 %v4025_v58, %s5694_s2  ;;  %v10390_v58 = vld [vmem:[#allocation41_spill] sm:$0xff]  ;;  %v3018_v0 = vmul.f32 %v10391_v6, %v8647_v15 }
 0x33f   :  { %4333 = vst.msk [vmem:[%s9827_s4 + $0x60] sm:$0xff] %vm4320_vm0, %v4153_v51  ;;  %v3863_v48 = vpop.permute.xlu0 %3862  ;;  %v9208_v42 = vadd.f32 %v9088_v5, %v3033_v10  ;;  %v10389_v51 = vld [vmem:[#allocation99_spill] sm:$0xff]  ;;  %v3017_v21 = vmul.f32 %v10390_v58, %v8563_v47  ;;  %5631 = vtanh.f32 %v9205_v37  ;;  %v5630_v5 = vpop.eup %5629 }
 0x340   :  { %4398 = vst.msk [vmem:[%s9827_s4 + $0x60] sm:$0xff] %vm4385_vm2, %v10387_v53  ;;  %v3867_v26 = vpop.permute.xlu2 %3866  ;;  %v4026_v9 = vmul.f32 %v9110_v29, %v10389_v51  ;;  %v9225_v29 = vadd.f32 %v9133_v23, %v3018_v0  ;;  %v10394_v0 = vld [vmem:[#allocation11_spill] sm:$0xff] }
 0x341   :  { %10388 = vst [vmem:[#allocation82_spill] sm:$0xff] %v9208_v42  ;;  %v9216_v53 = vadd.f32 %v3507_v61, %v3017_v21  ;;  %5633 = vtanh.f32 %v9208_v42  ;;  %v10393_v21 = vld [vmem:[#allocation62_spill] sm:$0xff] }
 0x342   :  { %10392 = vst [vmem:[#allocation35_spill] sm:$0xff] %v9225_v29  ;;  %v3034_v6 = vmul.f32 %v10393_v21, %v8569_v18  ;;  %v10395_v21 = vld [vmem:[#allocation61_spill] sm:$0xff] }
 0x343   :  { %5635 = vtanh.f32 %v9216_v53 }
 0x344   :  { %3918 = vrot.lane.b32.xlu1 %v5628_v12, %s5693_s11  ;;  %5637 = vtanh.f32 %v9225_v29  ;;  %v9237_v23 = vadd.f32 %v3541_v54, %v3034_v6  ;;  %v3035_v29 = vmul.f32 %v10395_v21, %v8681_v31  ;;  %v10396_v54 = vld [vmem:[#allocation22_spill] sm:$0xff]  ;;  %v10398_v21 = vld [vmem:[#allocation67_spill] sm:$0xff] }
 0x345   :  { %4180 = vrot.lane.b32.xlu0 %v4026_v9, %s5694_s2  ;;  %v5632_v61 = vpop.eup %5631  ;;  %v3036_v42 = vmul.f32 %v10398_v21, %v8766_v16 }
 0x346   :  { %v3543_v60 = vpop.permute.xlu1 %3542  ;;  %3920 = vrot.lane.b32.xlu2 %v5630_v5, %s5693_s11  ;;  %5639 = vtanh.f32 %v9237_v23 }
 0x347   :  { %v3511_v10 = vpop.permute.xlu0 %3510  ;;  %v5634_v51 = vpop.eup %5633 }
 0x348   :  { %v3515_v12 = vpop.permute.xlu2 %3514 }
 0x349   :  { %v5636_v58 = vpop.eup %5635 }
 0x34c   :  { %3888 = vrot.lane.b32.xlu1 %v5632_v61, %s5693_s11  ;;  %v4027_v61 = vmul.f32 %v3863_v48, %v10281_v44  ;;  %v9258_v44 = vadd.f32 %v3543_v60, %v3035_v29  ;;  %v9271_v60 = vadd.f32 %v9180_v1, %v3036_v42 }
 0x34d   :  { %3922 = vrot.lane.b32.xlu0 %v5634_v51, %s5693_s11 }
 0x34e   :  { %v3865_v9 = vpop.permute.xlu1 %3864  ;;  %3890 = vrot.lane.b32.xlu2 %v5636_v58, %s5693_s11  ;;  %v5638_v58 = vpop.eup %5637  ;;  %5641 = vtanh.f32 %v9258_v44  ;;  %10399 = vst [vmem:[#allocation8_spill] sm:$0xff] %v9271_v60 }
 0x34f   :  { %v4157_v5 = vpop.permute.xlu0 %4156  ;;  %v4028_v48 = vmul.f32 %v3865_v9, %v10292_v8  ;;  %v10400_v8 = vld [vmem:[#allocation24_spill] sm:$0xff] }
 0x350   :  { %4335 = vst.msk [vmem:[%s9827_s4 + $0x70] sm:$0xff] %vm4320_vm0, %v4157_v5  ;;  %v4161_v51 = vpop.permute.xlu2 %4160  ;;  %v10397_v5 = vld [vmem:[#allocation48_spill] sm:$0xff]  ;;  %v4029_v9 = vmul.f32 %v3867_v26, %v10400_v8 }
 0x351   :  { %4400 = vst.msk [vmem:[%s9827_s4 + $0x70] sm:$0xff] %vm4385_vm2, %v10394_v0  ;;  %v3019_v0 = vmul.f32 %v10397_v5, %v8683_v17  ;;  %v10402_v26 = vld [vmem:[#allocation52_spill] sm:$0xff] }
 0x352   :  { %4337 = vst.msk [vmem:[%s9827_s4 + $0x80] sm:$0xff] %vm4320_vm0, %v4161_v51 }
 0x353   :  { %4402 = vst.msk [vmem:[%s9827_s4 + $0x80] sm:$0xff] %vm4385_vm2, %v10396_v54  ;;  %v10401_v54 = vld [vmem:[#allocation44_spill] sm:$0xff] }
 0x354   :  { %4182 = vrot.lane.b32.xlu1 %v4027_v61, %s5694_s2  ;;  %v9268_v61 = vadd.f32 %v3511_v10, %v3019_v0  ;;  %v3020_v5 = vmul.f32 %v10401_v54, %v8809_v22  ;;  %v10403_v0 = vld [vmem:[#allocation87_spill] sm:$0xff] }
 0x355   :  { %3892 = vrot.lane.b32.xlu0 %v5638_v58, %s5693_s11  ;;  %v5640_v58 = vpop.eup %5639 }
 0x356   :  { %v3513_v6 = vpop.permute.xlu1 %3512  ;;  %4184 = vrot.lane.b32.xlu2 %v4028_v48, %s5694_s2  ;;  %5643 = vtanh.f32 %v9268_v61  ;;  %v5642_v1 = vpop.eup %5641  ;;  %v3021_v48 = vmul.f32 %v10402_v26, %v8875_v27 }
 0x357   :  { %v3547_v51 = vpop.permute.xlu0 %3546  ;;  %v9278_v21 = vadd.f32 %v3513_v6, %v3020_v5  ;;  %5645 = vtanh.f32 %v9271_v60  ;;  %v10407_v60 = vld [vmem:[#allocation25_spill] sm:$0xff] }
 0x358   :  { %v3551_v29 = vpop.permute.xlu2 %3550  ;;  %v9295_v6 = vadd.f32 %v3515_v12, %v3021_v48 }
 0x359   :  { %5647 = vtanh.f32 %v9278_v21 }
 0x35a   :  { %10404 = vst [vmem:[#allocation85_spill] sm:$0xff] %v9295_v6  ;;  %5649 = vtanh.f32 %v9295_v6 }
 0x35c   :  { %3924 = vrot.lane.b32.xlu1 %v5640_v58, %s5693_s11  ;;  %v5644_v8 = vpop.eup %5643 }
 0x35d   :  { %4186 = vrot.lane.b32.xlu0 %v4029_v9, %s5694_s2  ;;  %v5646_v9 = vpop.eup %5645 }
 0x35e   :  { %v4159_v10 = vpop.permute.xlu1 %4158  ;;  %3926 = vrot.lane.b32.xlu2 %v5642_v1, %s5693_s11 }
 0x35f   :  { %4336 = vst.msk [vmem:[%s9827_s4 + $0x78] sm:$0xff] %vm4320_vm0, %v4159_v10  ;;  %v3869_v42 = vpop.permute.xlu0 %3868  ;;  %v5648_v5 = vpop.eup %5647  ;;  %v10405_v10 = vld [vmem:[#allocation64_spill] sm:$0xff] }
 0x360   :  { %4401 = vst.msk [vmem:[%s9827_s4 + $0x78] sm:$0xff] %vm4385_vm2, %v10403_v0  ;;  %v3873_v58 = vpop.permute.xlu2 %3872  ;;  %v3037_v1 = vmul.f32 %v10405_v10, %v8815_v34  ;;  %v4030_v12 = vmul.f32 %v3869_v42, %v10311_v13  ;;  %v10408_v42 = vld [vmem:[#allocation50_spill] sm:$0xff] }
 0x362   :  { %v9303_v0 = vadd.f32 %v3547_v51, %v3037_v1 }
 0x364   :  { %3894 = vrot.lane.b32.xlu1 %v5644_v8, %s5693_s11  ;;  %v5650_v8 = vpop.eup %5649  ;;  %5651 = vtanh.f32 %v9303_v0 }
 0x365   :  { %3928 = vrot.lane.b32.xlu0 %v5646_v9, %s5693_s11  ;;  %v10406_v9 = vld [vmem:[#allocation65_spill] sm:$0xff] }
 0x366   :  { %v3549_v54 = vpop.permute.xlu1 %3548  ;;  %3896 = vrot.lane.b32.xlu2 %v5648_v5, %s5693_s11  ;;  %v3038_v6 = vmul.f32 %v10406_v9, %v8906_v2  ;;  %v3022_v5 = vmul.f32 %v10408_v42, %v8913_v7 }
 0x367   :  { %v3517_v26 = vpop.permute.xlu0 %3516 }
 0x368   :  { %v4167_v48 = vpop.permute.xlu2 %4166  ;;  %v9320_v13 = vadd.f32 %v3549_v54, %v3038_v6 }
 0x369   :  { %4340 = vst.msk [vmem:[%s9827_s4 + $0x98] sm:$0xff] %vm4320_vm0, %v4167_v48  ;;  %v10409_v48 = vld [vmem:[#allocation69_spill] sm:$0xff] }
 0x36a   :  { %4405 = vst.msk [vmem:[%s9827_s4 + $0x98] sm:$0xff] %vm4385_vm2, %v10407_v60  ;;  %v3039_v9 = vmul.f32 %v10409_v48, %v8978_v63  ;;  %v9331_v60 = vadd.f32 %v3517_v26, %v3022_v5  ;;  %5653 = vtanh.f32 %v9320_v13  ;;  %v5652_v54 = vpop.eup %5651  ;;  %v10411_v26 = vld [vmem:[#allocation47_spill] sm:$0xff] }
 0x36c   :  { %4188 = vrot.lane.b32.xlu1 %v4030_v12, %s5694_s2  ;;  %v10410_v12 = vld [vmem:[#allocation14_spill] sm:$0xff]  ;;  %5655 = vtanh.f32 %v9331_v60 }
 0x36d   :  { %3898 = vrot.lane.b32.xlu0 %v5650_v8, %s5693_s11  ;;  %v4032_v8 = vmul.f32 %v3873_v58, %v10332_v32 }
 0x36e   :  { %v3871_v51 = vpop.permute.xlu1 %3870 }
 0x36f   :  { %v4031_v10 = vmul.f32 %v3871_v51, %v10322_v50  ;;  %v4163_v1 = vpop.permute.xlu0 %4162  ;;  %v9339_v50 = vadd.f32 %v3551_v29, %v3039_v9  ;;  %v3023_v51 = vmul.f32 %v10411_v26, %v9002_v11 }
 0x370   :  { %4338 = vst.msk [vmem:[%s9827_s4 + $0x88] sm:$0xff] %vm4320_vm0, %v4163_v1  ;;  %v3909_v6 = vpop.permute.xlu2 %3908 }
 0x371   :  { %4403 = vst.msk [vmem:[%s9827_s4 + $0x88] sm:$0xff] %vm4385_vm2, %v10410_v12  ;;  %4190 = vrot.lane.b32.xlu2 %v4031_v10, %s5694_s2  ;;  %5657 = vtanh.f32 %v9339_v50  ;;  %v5654_v10 = vpop.eup %5653 }
 0x372   :  { %v5656_v58 = vpop.eup %5655 }
 0x374   :  { %3930 = vrot.lane.b32.xlu1 %v5652_v54, %s5693_s11  ;;  %v10412_v54 = vld [vmem:[#allocation26_spill] sm:$0xff] }
 0x375   :  { %4192 = vrot.lane.b32.xlu0 %v4032_v8, %s5694_s2 }
 0x376   :  { %v3519_v42 = vpop.permute.xlu1 %3518 }
 0x377   :  { %v9349_v29 = vadd.f32 %v3519_v42, %v3023_v51  ;;  %v3905_v5 = vpop.permute.xlu0 %3904  ;;  %v5658_v1 = vpop.eup %5657  ;;  %v4050_v51 = vmul.f32 %v3909_v6, %v10343_v59  ;;  %v10413_v42 = vld [vmem:[#allocation73_spill] sm:$0xff]  ;;  %v10414_v59 = vld [vmem:[#allocation70_spill] sm:$0xff] }
 0x378   :  { %v3879_v32 = vpop.permute.xlu2 %3878  ;;  %v4048_v8 = vmul.f32 %v3905_v5, %v10327_v14 }
 0x379   :  { %5659 = vtanh.f32 %v9349_v29  ;;  %3932 = vrot.lane.b32.xlu2 %v5654_v10, %s5693_s11 }
 0x37c   :  { %3900 = vrot.lane.b32.xlu1 %v5656_v58, %s5693_s11 }
 0x37d   :  { %3934 = vrot.lane.b32.xlu0 %v5658_v1, %s5693_s11  ;;  %v4035_v1 = vmul.f32 %v3879_v32, %v8079_v52 }
 0x37e   :  { %v4165_v48 = vpop.permute.xlu1 %4164 }
 0x37f   :  { %v5660_v9 = vpop.eup %5659  ;;  %4339 = vst.msk [vmem:[%s9827_s4 + $0x90] sm:$0xff] %vm4320_vm0, %v4165_v48  ;;  %v3875_v12 = vpop.permute.xlu0 %3874 }
 0x380   :  { %4404 = vst.msk [vmem:[%s9827_s4 + $0x90] sm:$0xff] %vm4385_vm2, %v10412_v54  ;;  %v4173_v26 = vpop.permute.xlu2 %4172  ;;  %v4033_v6 = vmul.f32 %v3875_v12, %v10336_v25  ;;  %v10416_v12 = vld [vmem:[#allocation21_spill] sm:$0xff] }
 0x381   :  { %3902 = vrot.lane.b32.xlu2 %v5660_v9, %s5693_s11  ;;  %4343 = vst.msk [vmem:[%s9827_s4 + $0xb0] sm:$0xff] %vm4320_vm0, %v4173_v26 }
 0x382   :  { %4408 = vst.msk [vmem:[%s9827_s4 + $0xb0] sm:$0xff] %vm4385_vm2, %v10413_v42 }
 0x384   :  { %4224 = vrot.lane.b32.xlu1 %v4048_v8, %s5694_s2 }
 0x385   :  { %4228 = vrot.lane.b32.xlu0 %v4050_v51, %s5694_s2 }
 0x386   :  { %v3907_v10 = vpop.permute.xlu1 %3906 }
 0x387   :  { %v4049_v14 = vmul.f32 %v3907_v10, %v10340_v4  ;;  %v4169_v5 = vpop.permute.xlu0 %4168 }
 0x388   :  { %4341 = vst.msk [vmem:[%s9827_s4 + $0xa0] sm:$0xff] %vm4320_vm0, %v4169_v5  ;;  %v3915_v58 = vpop.permute.xlu2 %3914 }
 0x389   :  { %4406 = vst.msk [vmem:[%s9827_s4 + $0xa0] sm:$0xff] %vm4385_vm2, %v10414_v59  ;;  %4226 = vrot.lane.b32.xlu2 %v4049_v14, %s5694_s2  ;;  %v4053_v26 = vmul.f32 %v3915_v58, %v8197_v33 }
 0x38c   :  { %4194 = vrot.lane.b32.xlu1 %v4033_v6, %s5694_s2 }
 0x38d   :  { %4198 = vrot.lane.b32.xlu0 %v4035_v1, %s5694_s2 }
 0x38e   :  { %v3877_v4 = vpop.permute.xlu1 %3876 }
 0x38f   :  { %v4034_v48 = vmul.f32 %v3877_v4, %v10347_v41  ;;  %v3911_v9 = vpop.permute.xlu0 %3910  ;;  %v10415_v41 = vld [vmem:[#allocation17_spill] sm:$0xff] }
 0x390   :  { %v4051_v54 = vmul.f32 %v3911_v9, %v8053_v57  ;;  %v3885_v8 = vpop.permute.xlu2 %3884 }
 0x391   :  { %4196 = vrot.lane.b32.xlu2 %v4034_v48, %s5694_s2  ;;  %v4038_v32 = vmul.f32 %v3885_v8, %v8317_v39  ;;  %v10417_v39 = vld [vmem:[#allocation97_spill] sm:$0xff] }
 0x394   :  { %4230 = vrot.lane.b32.xlu1 %v4051_v54, %s5694_s2 }
 0x395   :  { %4234 = vrot.lane.b32.xlu0 %v4053_v26, %s5694_s2 }
 0x396   :  { %v4171_v52 = vpop.permute.xlu1 %4170 }
 0x397   :  { %4342 = vst.msk [vmem:[%s9827_s4 + $0xa8] sm:$0xff] %vm4320_vm0, %v4171_v52  ;;  %v3881_v25 = vpop.permute.xlu0 %3880 }
 0x398   :  { %4407 = vst.msk [vmem:[%s9827_s4 + $0xa8] sm:$0xff] %vm4385_vm2, %v10415_v41  ;;  %v4036_v57 = vmul.f32 %v3881_v25, %v10356_v45  ;;  %v4179_v33 = vpop.permute.xlu2 %4178 }
 0x399   :  { %4346 = vst.msk [vmem:[%s9827_s4 + $0xc8] sm:$0xff] %vm4320_vm0, %v4179_v33 }
 0x39a   :  { %4411 = vst.msk [vmem:[%s9827_s4 + $0xc8] sm:$0xff] %vm4385_vm2, %v10416_v12 }
 0x39c   :  { %4200 = vrot.lane.b32.xlu1 %v4036_v57, %s5694_s2 }
 0x39d   :  { %4204 = vrot.lane.b32.xlu0 %v4038_v32, %s5694_s2 }
 0x39e   :  { %v3913_v51 = vpop.permute.xlu1 %3912 }
 0x39f   :  { %v4052_v45 = vmul.f32 %v3913_v51, %v10359_v24  ;;  %v4175_v42 = vpop.permute.xlu0 %4174 }
 0x3a0   :  { %4344 = vst.msk [vmem:[%s9827_s4 + $0xb8] sm:$0xff] %vm4320_vm0, %v4175_v42  ;;  %v3921_v10 = vpop.permute.xlu2 %3920 }
 0x3a1   :  { %4409 = vst.msk [vmem:[%s9827_s4 + $0xb8] sm:$0xff] %vm4385_vm2, %v10417_v39  ;;  %4232 = vrot.lane.b32.xlu2 %v4052_v45, %s5694_s2  ;;  %v4056_v14 = vmul.f32 %v3921_v10, %v8438_v40 }
 0x3a5   :  { %4240 = vrot.lane.b32.xlu0 %v4056_v14, %s5694_s2 }
 0x3a6   :  { %v3883_v24 = vpop.permute.xlu1 %3882 }
 0x3a7   :  { %v4037_v5 = vmul.f32 %v3883_v24, %v10367_v19  ;;  %v3917_v59 = vpop.permute.xlu0 %3916  ;;  %v10418_v19 = vld [vmem:[#allocation28_spill] sm:$0xff] }
 0x3a8   :  { %v4054_v6 = vmul.f32 %v3917_v59, %v8280_v36  ;;  %v3891_v58 = vpop.permute.xlu2 %3890 }
 0x3a9   :  { %4202 = vrot.lane.b32.xlu2 %v4037_v5, %s5694_s2  ;;  %v4041_v1 = vmul.f32 %v3891_v58, %v8563_v47  ;;  %v10419_v47 = vld [vmem:[#allocation76_spill] sm:$0xff] }
 0x3aa   :  { %4236 = vrot.lane.b32.xlu1 %v4054_v6, %s5694_s2 }
 0x3ad   :  { %4210 = vrot.lane.b32.xlu0 %v4041_v1, %s5694_s2 }
 0x3ae   :  { %v4177_v4 = vpop.permute.xlu1 %4176 }
 0x3af   :  { %4345 = vst.msk [vmem:[%s9827_s4 + $0xc0] sm:$0xff] %vm4320_vm0, %v4177_v4  ;;  %v3887_v40 = vpop.permute.xlu0 %3886 }
 0x3b0   :  { %4410 = vst.msk [vmem:[%s9827_s4 + $0xc0] sm:$0xff] %vm4385_vm2, %v10418_v19  ;;  %v4039_v36 = vmul.f32 %v3887_v40, %v8407_v43  ;;  %v4185_v48 = vpop.permute.xlu2 %4184  ;;  %v10420_v43 = vld [vmem:[#allocation9_spill] sm:$0xff] }
 0x3b1   :  { %4349 = vst.msk [vmem:[%s9827_s4 + $0xe0] sm:$0xff] %vm4320_vm0, %v4185_v48  ;;  %v10426_v48 = vld [vmem:[#allocation80_spill] sm:$0xff] }
 0x3b2   :  { %4206 = vrot.lane.b32.xlu1 %v4039_v36, %s5694_s2  ;;  %4414 = vst.msk [vmem:[%s9827_s4 + $0xe0] sm:$0xff] %vm4385_vm2, %v10419_v47  ;;  %v10425_v36 = vld [vmem:[#allocation78_spill] sm:$0xff] }
 0x3b6   :  { %v3919_v9 = vpop.permute.xlu1 %3918 }
 0x3b7   :  { %v4055_v54 = vmul.f32 %v3919_v9, %v10378_v55  ;;  %v4181_v8 = vpop.permute.xlu0 %4180 }
 0x3b8   :  { %4347 = vst.msk [vmem:[%s9827_s4 + $0xd0] sm:$0xff] %vm4320_vm0, %v4181_v8  ;;  %v3927_v26 = vpop.permute.xlu2 %3926  ;;  %v10427_v8 = vld [vmem:[#allocation31_spill] sm:$0xff] }
 0x3b9   :  { %4412 = vst.msk [vmem:[%s9827_s4 + $0xd0] sm:$0xff] %vm4385_vm2, %v10420_v43  ;;  %4238 = vrot.lane.b32.xlu2 %v4055_v54, %s5694_s2  ;;  %v4059_v52 = vmul.f32 %v3927_v26, %v8681_v31  ;;  %v10428_v43 = vld [vmem:[#allocation81_spill] sm:$0xff] }
 0x3bb   :  { %4246 = vrot.lane.b32.xlu0 %v4059_v52, %s5694_s2  ;;  %v10429_v52 = vld [vmem:[#allocation103_spill] sm:$0xff] }
 0x3be   :  { %v3889_v55 = vpop.permute.xlu1 %3888 }
 0x3bf   :  { %v4040_v25 = vmul.f32 %v3889_v55, %v8440_v56  ;;  %v3923_v41 = vpop.permute.xlu0 %3922  ;;  %v10421_v56 = vld [vmem:[#allocation20_spill] sm:$0xff]  ;;  %v10430_v55 = vld [vmem:[#allocation23_spill] sm:$0xff] }
 0x3c0   :  { %v4057_v57 = vmul.f32 %v3923_v41, %v10385_v62  ;;  %v3897_v33 = vpop.permute.xlu2 %3896 }
 0x3c1   :  { %4208 = vrot.lane.b32.xlu2 %v4040_v25, %s5694_s2  ;;  %v4044_v32 = vmul.f32 %v3897_v33, %v8809_v22 }
 0x3c2   :  { %4242 = vrot.lane.b32.xlu1 %v4057_v57, %s5694_s2  ;;  %v10431_v57 = vld [vmem:[#allocation106_spill] sm:$0xff] }
 0x3c3   :  { %4216 = vrot.lane.b32.xlu0 %v4044_v32, %s5694_s2 }
 0x3c6   :  { %v4183_v12 = vpop.permute.xlu1 %4182 }
 0x3c7   :  { %4348 = vst.msk [vmem:[%s9827_s4 + $0xd8] sm:$0xff] %vm4320_vm0, %v4183_v12  ;;  %v3893_v31 = vpop.permute.xlu0 %3892 }
 0x3c8   :  { %4413 = vst.msk [vmem:[%s9827_s4 + $0xd8] sm:$0xff] %vm4385_vm2, %v10421_v56  ;;  %v4042_v62 = vmul.f32 %v3893_v31, %v8647_v15  ;;  %v10433_v31 = vld [vmem:[#allocation83_spill] sm:$0xff] }
 0x3ca   :  { %4212 = vrot.lane.b32.xlu1 %v4042_v62, %s5694_s2 }
 0x3cb   :  { %v4191_v22 = vpop.permute.xlu2 %4190 }
 0x3cc   :  { %4352 = vst.msk [vmem:[%s9827_s4 + $0xf8] sm:$0xff] %vm4320_vm0, %v4191_v22 }
 0x3cd   :  { %4417 = vst.msk [vmem:[%s9827_s4 + $0xf8] sm:$0xff] %vm4385_vm2, %v8904_v28 }
 0x3ce   :  { %v3925_v51 = vpop.permute.xlu1 %3924 }
 0x3cf   :  { %v4058_v45 = vmul.f32 %v3925_v51, %v8569_v18  ;;  %v4187_v42 = vpop.permute.xlu0 %4186  ;;  %v10435_v51 = vld [vmem:[#allocation35_spill] sm:$0xff] }
 0x3d0   :  { %4350 = vst.msk [vmem:[%s9827_s4 + $0xe8] sm:$0xff] %vm4320_vm0, %v4187_v42 }
 0x3d1   :  { %4415 = vst.msk [vmem:[%s9827_s4 + $0xe8] sm:$0xff] %vm4385_vm2, %v8764_v3  ;;  %4244 = vrot.lane.b32.xlu2 %v4058_v45, %s5694_s2 }
 0x3d3   :  { %v3933_v15 = vpop.permute.xlu2 %3932 }
 0x3d4   :  { %v4062_v59 = vmul.f32 %v3933_v15, %v8906_v2 }
 0x3d6   :  { %v3895_v39 = vpop.permute.xlu1 %3894 }
 0x3d7   :  { %v4043_v28 = vmul.f32 %v3895_v39, %v8683_v17  ;;  %v3929_v10 = vpop.permute.xlu0 %3928  ;;  %v10422_v17 = vld [vmem:[#allocation32_spill] sm:$0xff] }
 0x3d8   :  { %v4060_v18 = vmul.f32 %v3929_v10, %v8766_v16 }
 0x3d9   :  { %4214 = vrot.lane.b32.xlu2 %v4043_v28, %s5694_s2  ;;  %v10437_v28 = vld [vmem:[#allocation85_spill] sm:$0xff] }
 0x3da   :  { %4248 = vrot.lane.b32.xlu1 %v4060_v18, %s5694_s2 }
 0x3db   :  { %v3903_v14 = vpop.permute.xlu2 %3902 }
 0x3dc   :  { %v4047_v24 = vmul.f32 %v3903_v14, %v9002_v11 }
 0x3de   :  { %4222 = vrot.lane.b32.xlu0 %v4047_v24, %s5694_s2  ;;  %v4189_v5 = vpop.permute.xlu1 %4188 }
 0x3df   :  { %4351 = vst.msk [vmem:[%s9827_s4 + $0xf0] sm:$0xff] %vm4320_vm0, %v4189_v5  ;;  %v3899_v3 = vpop.permute.xlu0 %3898 }
 0x3e0   :  { %4416 = vst.msk [vmem:[%s9827_s4 + $0xf0] sm:$0xff] %vm4385_vm2, %v10422_v17  ;;  %v4045_v16 = vmul.f32 %v3899_v3, %v8875_v27 }
 0x3e2   :  { %4218 = vrot.lane.b32.xlu1 %v4045_v16, %s5694_s2 }
 0x3e3   :  { %v4227_v11 = vpop.permute.xlu2 %4226 }
 0x3e4   :  { %4370 = vst.msk [vmem:[%s9827_s4 + $0x188] sm:$0xff] %vm4320_vm0, %v4227_v11 }
 0x3e5   :  { %4435 = vst.msk [vmem:[%s9827_s4 + $0x188] sm:$0xff] %vm4385_vm2, %v9022_v30 }
 0x3e6   :  { %4252 = vrot.lane.b32.xlu0 %v4062_v59, %s5694_s2  ;;  %v3931_v6 = vpop.permute.xlu1 %3930 }
 0x3e7   :  { %v4193_v27 = vpop.permute.xlu0 %4192  ;;  %v4061_v40 = vmul.f32 %v3931_v6, %v8815_v34  ;;  %v10423_v34 = vld [vmem:[#allocation84_spill] sm:$0xff] }
 0x3e8   :  { %4353 = vst.msk [vmem:[%s9827_s4 + $0x100] sm:$0xff] %vm4320_vm0, %v4193_v27 }
 0x3e9   :  { %4418 = vst.msk [vmem:[%s9827_s4 + $0x100] sm:$0xff] %vm4385_vm2, %v8976_v46 }
 0x3eb   :  { %v4197_v2 = vpop.permute.xlu2 %4196 }
 0x3ec   :  { %4355 = vst.msk [vmem:[%s9827_s4 + $0x110] sm:$0xff] %vm4320_vm0, %v4197_v2 }
 0x3ed   :  { %4420 = vst.msk [vmem:[%s9827_s4 + $0x110] sm:$0xff] %vm4385_vm2, %v9049_v38 }
 0x3ee   :  { %v3901_v30 = vpop.permute.xlu1 %3900 }
 0x3ef   :  { %v4046_v58 = vmul.f32 %v3901_v30, %v8913_v7  ;;  %v3935_v1 = vpop.permute.xlu0 %3934 }
 0x3f0   :  { %v4063_v4 = vmul.f32 %v3935_v1, %v8978_v63 }
 0x3f1   :  { %4220 = vrot.lane.b32.xlu2 %v4046_v58, %s5694_s2 }
 0x3f2   :  { %4254 = vrot.lane.b32.xlu1 %v4063_v4, %s5694_s2 }
 0x3f6   :  { %v4225_v46 = vpop.permute.xlu1 %4224 }
 0x3f7   :  { %4369 = vst.msk [vmem:[%s9827_s4 + $0x180] sm:$0xff] %vm4320_vm0, %v4225_v46  ;;  %v4229_v19 = vpop.permute.xlu0 %4228 }
 0x3f8   :  { %4434 = vst.msk [vmem:[%s9827_s4 + $0x180] sm:$0xff] %vm4385_vm2, %v8955_v49  ;;  %v10424_v49 = vld [vmem:[#allocation66_spill] sm:$0xff] }
 0x3f9   :  { %4371 = vst.msk [vmem:[%s9827_s4 + $0x190] sm:$0xff] %vm4320_vm0, %v4229_v19  ;;  %4250 = vrot.lane.b32.xlu2 %v4061_v40, %s5694_s2 }
 0x3fa   :  { %4436 = vst.msk [vmem:[%s9827_s4 + $0x190] sm:$0xff] %vm4385_vm2, %v10423_v34 }
 0x3fb   :  { %v4233_v7 = vpop.permute.xlu2 %4232 }
 0x3fc   :  { %4373 = vst.msk [vmem:[%s9827_s4 + $0x1a0] sm:$0xff] %vm4320_vm0, %v4233_v7 }
 0x3fd   :  { %4438 = vst.msk [vmem:[%s9827_s4 + $0x1a0] sm:$0xff] %vm4385_vm2, %v10424_v49 }
 0x3fe   :  { %v4195_v63 = vpop.permute.xlu1 %4194 }
 0x3ff   :  { %4354 = vst.msk [vmem:[%s9827_s4 + $0x108] sm:$0xff] %vm4320_vm0, %v4195_v63  ;;  %v4199_v38 = vpop.permute.xlu0 %4198 }
 0x400   :  { %4419 = vst.msk [vmem:[%s9827_s4 + $0x108] sm:$0xff] %vm4385_vm2, %v10425_v36 }
 0x401   :  { %4356 = vst.msk [vmem:[%s9827_s4 + $0x118] sm:$0xff] %vm4320_vm0, %v4199_v38 }
 0x402   :  { %4421 = vst.msk [vmem:[%s9827_s4 + $0x118] sm:$0xff] %vm4385_vm2, %v10426_v48 }
 0x403   :  { %v4203_v47 = vpop.permute.xlu2 %4202 }
 0x404   :  { %4358 = vst.msk [vmem:[%s9827_s4 + $0x128] sm:$0xff] %vm4320_vm0, %v4203_v47 }
 0x405   :  { %4423 = vst.msk [vmem:[%s9827_s4 + $0x128] sm:$0xff] %vm4385_vm2, %v9128_v35 }
 0x406   :  { %v4231_v9 = vpop.permute.xlu1 %4230 }
 0x407   :  { %4372 = vst.msk [vmem:[%s9827_s4 + $0x198] sm:$0xff] %vm4320_vm0, %v4231_v9  ;;  %v4235_v54 = vpop.permute.xlu0 %4234 }
 0x408   :  { %4437 = vst.msk [vmem:[%s9827_s4 + $0x198] sm:$0xff] %vm4385_vm2, %v10427_v8 }
 0x409   :  { %4374 = vst.msk [vmem:[%s9827_s4 + $0x1a8] sm:$0xff] %vm4320_vm0, %v4235_v54 }
 0x40a   :  { %4439 = vst.msk [vmem:[%s9827_s4 + $0x1a8] sm:$0xff] %vm4385_vm2, %v10428_v43 }
 0x40e   :  { %v4201_v35 = vpop.permute.xlu1 %4200 }
 0x40f   :  { %4357 = vst.msk [vmem:[%s9827_s4 + $0x120] sm:$0xff] %vm4320_vm0, %v4201_v35  ;;  %v4205_v26 = vpop.permute.xlu0 %4204 }
 0x410   :  { %4422 = vst.msk [vmem:[%s9827_s4 + $0x120] sm:$0xff] %vm4385_vm2, %v10429_v52 }
 0x411   :  { %4359 = vst.msk [vmem:[%s9827_s4 + $0x130] sm:$0xff] %vm4320_vm0, %v4205_v26 }
 0x412   :  { %4424 = vst.msk [vmem:[%s9827_s4 + $0x130] sm:$0xff] %vm4385_vm2, %v10430_v55 }
 0x413   :  { %v4239_v25 = vpop.permute.xlu2 %4238 }
 0x414   :  { %4376 = vst.msk [vmem:[%s9827_s4 + $0x1b8] sm:$0xff] %vm4320_vm0, %v4239_v25 }
 0x415   :  { %4441 = vst.msk [vmem:[%s9827_s4 + $0x1b8] sm:$0xff] %vm4385_vm2, %v9177_v20  ;;  %v10432_v20 = vld [vmem:[#allocation89_spill] sm:$0xff] }
 0x417   :  { %v4241_v41 = vpop.permute.xlu0 %4240 }
 0x418   :  { %4377 = vst.msk [vmem:[%s9827_s4 + $0x1c0] sm:$0xff] %vm4320_vm0, %v4241_v41 }
 0x419   :  { %4442 = vst.msk [vmem:[%s9827_s4 + $0x1c0] sm:$0xff] %vm4385_vm2, %v10431_v57 }
 0x41b   :  { %v4209_v33 = vpop.permute.xlu2 %4208 }
 0x41c   :  { %4361 = vst.msk [vmem:[%s9827_s4 + $0x140] sm:$0xff] %vm4320_vm0, %v4209_v33  ;;  %v4237_v32 = vpop.permute.xlu1 %4236 }
 0x41d   :  { %4426 = vst.msk [vmem:[%s9827_s4 + $0x140] sm:$0xff] %vm4385_vm2, %v9205_v37 }
 0x41e   :  { %4375 = vst.msk [vmem:[%s9827_s4 + $0x1b0] sm:$0xff] %vm4320_vm0, %v4237_v32 }
 0x41f   :  { %4440 = vst.msk [vmem:[%s9827_s4 + $0x1b0] sm:$0xff] %vm4385_vm2, %v10432_v20  ;;  %v4211_v12 = vpop.permute.xlu0 %4210 }
 0x420   :  { %4362 = vst.msk [vmem:[%s9827_s4 + $0x148] sm:$0xff] %vm4320_vm0, %v4211_v12 }
 0x421   :  { %4427 = vst.msk [vmem:[%s9827_s4 + $0x148] sm:$0xff] %vm4385_vm2, %v9216_v53 }
 0x424   :  { %v4207_v37 = vpop.permute.xlu1 %4206 }
 0x425   :  { %4360 = vst.msk [vmem:[%s9827_s4 + $0x138] sm:$0xff] %vm4320_vm0, %v4207_v37 }
 0x426   :  { %4425 = vst.msk [vmem:[%s9827_s4 + $0x138] sm:$0xff] %vm4385_vm2, %v10433_v31 }
 0x42b   :  { %v4245_v56 = vpop.permute.xlu2 %4244 }
 0x42c   :  { %4379 = vst.msk [vmem:[%s9827_s4 + $0x1d0] sm:$0xff] %vm4320_vm0, %v4245_v56 }
 0x42d   :  { %4444 = vst.msk [vmem:[%s9827_s4 + $0x1d0] sm:$0xff] %vm4385_vm2, %v9237_v23  ;;  %v4247_v53 = vpop.permute.xlu0 %4246  ;;  %v10434_v23 = vld [vmem:[#allocation82_spill] sm:$0xff] }
 0x42e   :  { %4380 = vst.msk [vmem:[%s9827_s4 + $0x1d8] sm:$0xff] %vm4320_vm0, %v4247_v53 }
 0x42f   :  { %4445 = vst.msk [vmem:[%s9827_s4 + $0x1d8] sm:$0xff] %vm4385_vm2, %v9258_v44 }
 0x433   :  { %v4215_v62 = vpop.permute.xlu2 %4214 }
 0x434   :  { %4364 = vst.msk [vmem:[%s9827_s4 + $0x158] sm:$0xff] %vm4320_vm0, %v4215_v62  ;;  %v4243_v22 = vpop.permute.xlu1 %4242 }
 0x435   :  { %4429 = vst.msk [vmem:[%s9827_s4 + $0x158] sm:$0xff] %vm4385_vm2, %v9268_v61  ;;  %v4217_v44 = vpop.permute.xlu0 %4216 }
 0x436   :  { %4378 = vst.msk [vmem:[%s9827_s4 + $0x1c8] sm:$0xff] %vm4320_vm0, %v4243_v22 }
 0x437   :  { %4443 = vst.msk [vmem:[%s9827_s4 + $0x1c8] sm:$0xff] %vm4385_vm2, %v10434_v23 }
 0x438   :  { %4365 = vst.msk [vmem:[%s9827_s4 + $0x160] sm:$0xff] %vm4320_vm0, %v4217_v44 }
 0x439   :  { %4430 = vst.msk [vmem:[%s9827_s4 + $0x160] sm:$0xff] %vm4385_vm2, %v9278_v21  ;;  %v10436_v21 = vld [vmem:[#allocation8_spill] sm:$0xff] }
 0x43c   :  { %v4213_v61 = vpop.permute.xlu1 %4212 }
 0x43d   :  { %4363 = vst.msk [vmem:[%s9827_s4 + $0x150] sm:$0xff] %vm4320_vm0, %v4213_v61 }
 0x43e   :  { %4428 = vst.msk [vmem:[%s9827_s4 + $0x150] sm:$0xff] %vm4385_vm2, %v10435_v51 }
 0x44b   :  { %v4221_v45 = vpop.permute.xlu2 %4220 }
 0x44c   :  { %4367 = vst.msk [vmem:[%s9827_s4 + $0x170] sm:$0xff] %vm4320_vm0, %v4221_v45  ;;  %v4249_v42 = vpop.permute.xlu1 %4248 }
 0x44d   :  { %4432 = vst.msk [vmem:[%s9827_s4 + $0x170] sm:$0xff] %vm4385_vm2, %v9331_v60 }
 0x44e   :  { %4381 = vst.msk [vmem:[%s9827_s4 + $0x1e0] sm:$0xff] %vm4320_vm0, %v4249_v42 }
 0x44f   :  { %4446 = vst.msk [vmem:[%s9827_s4 + $0x1e0] sm:$0xff] %vm4385_vm2, %v10436_v21 }
 0x450   :  { %v4223_v15 = vpop.permute.xlu0 %4222 }
 0x451   :  { %4368 = vst.msk [vmem:[%s9827_s4 + $0x178] sm:$0xff] %vm4320_vm0, %v4223_v15 }
 0x452   :  { %4433 = vst.msk [vmem:[%s9827_s4 + $0x178] sm:$0xff] %vm4385_vm2, %v9349_v29 }
 0x453   :  { %v4251_v60 = vpop.permute.xlu2 %4250 }
 0x454   :  { %4382 = vst.msk [vmem:[%s9827_s4 + $0x1e8] sm:$0xff] %vm4320_vm0, %v4251_v60  ;;  %v4219_v39 = vpop.permute.xlu1 %4218 }
 0x455   :  { %4447 = vst.msk [vmem:[%s9827_s4 + $0x1e8] sm:$0xff] %vm4385_vm2, %v9303_v0 }
 0x456   :  { %4366 = vst.msk [vmem:[%s9827_s4 + $0x168] sm:$0xff] %vm4320_vm0, %v4219_v39 }
 0x457   :  { %4431 = vst.msk [vmem:[%s9827_s4 + $0x168] sm:$0xff] %vm4385_vm2, %v10437_v28 }
 0x458   :  { %v4253_v29 = vpop.permute.xlu0 %4252 }
 0x459   :  { %4383 = vst.msk [vmem:[%s9827_s4 + $0x1f0] sm:$0xff] %vm4320_vm0, %v4253_v29 }
 0x45a   :  { %4448 = vst.msk [vmem:[%s9827_s4 + $0x1f0] sm:$0xff] %vm4385_vm2, %v9320_v13 }
 0x464   :  { %v4255_v0 = vpop.permute.xlu1 %4254 }
 0x465   :  { %4384 = vst.msk [vmem:[%s9827_s4 + $0x1f8] sm:$0xff] %vm4320_vm0, %v4255_v0 }
 0x466   :  { %4449 = vst.msk [vmem:[%s9827_s4 + $0x1f8] sm:$0xff] %vm4385_vm2, %v9339_v50 }
 0x467   :  { %4454 = vsyncpa [#allocation3], 1 }

</bundles_post_ra>
